<compile_context>
chip_gen: v6e
topology: v6e:2x2x1
jax: 0.10.0
libtpu: 0.0.40
codegen_flags: <defaults>
</compile_context>

<pallas_src>
import jax
import jax.numpy as jnp
from jax import lax
from jax.experimental import pallas as pl
from jax.experimental.pallas import tpu as pltpu


def _round_up(v, m):
    return ((v + m - 1) // m) * m


def _make_context_embedding_kernel(H, W, pad):
    """Builds the per-image kernel; H, W, pad are static Python ints."""
    HW = H * W

    def kernel(x_ref, w1_ref, b1_ref, w3_ref, b3_ref, o_ref, zpad_ref, acc_ref):
        # x_ref   : (1, HW, C)       one image as a flat (rows, channels) slab
        # w1_ref  : (C, C)           fused (I + 1x1conv*BN) weight, (Cin, Cout)
        # b1_ref  : (1, C)           fused 1x1-conv+BN bias
        # w3_ref  : (9, C, C)        3x3 conv taps, tap-major, each (Cin, Cout)
        # b3_ref  : (1, C)           3x3 conv bias
        # zpad_ref: (HW + 2*pad, C)  f32 scratch: zero halo + z slab
        # acc_ref : (HW, C)          f32 conv accumulator scratch
        C = x_ref.shape[-1]

        # Zero only the halo strips (2*pad rows); the interior is fully
        # overwritten below.  Unconditional so it is correct under megacore
        # grid sharding (per-core scratch never sees program_id == 0 on the
        # second core).
        halo = jnp.zeros((pad, C), jnp.float32)
        zpad_ref[0:pad, :] = halo
        zpad_ref[pad + HW:pad + HW + pad, :] = halo

        # 1x1 conv + BN with the residual folded into the weight:
        #   z = x + (x @ Wf + b1)  ==  x @ (I + Wf) + b1
        z = jnp.dot(x_ref[0], w1_ref[...],
                    preferred_element_type=jnp.float32) + b1_ref[...]
        zpad_ref[pad:pad + HW, :] = z            # sublane-aligned (pad % 8 == 0)

        # W-edge validity masks; H edges are handled by the zero halo rows.
        wcol = lax.broadcasted_iota(jnp.int32, (HW, C), 0) % W
        not_left = wcol > 0
        not_right = wcol < (W - 1)

        # 3x3 conv (stride 1, padding 1, cross-correlation like nn.Conv2d):
        # 9 statically shifted 2-D reads of the flat padded slab, one MXU
        # matmul each, accumulated into a VMEM f32 scratch.
        # TODO(synk): for production C >= 128, stage a (HW, 9C) im2col slab in
        # VMEM and do a single K=9C contraction instead (lane-aligned there).
        first = True
        for kh in range(3):
            for kw in range(3):
                shift = (kh - 1) * W + (kw - 1)
                patch = zpad_ref[pad + shift:pad + shift + HW, :]
                if kw == 0:
                    patch = jnp.where(not_left, patch, 0.0)
                elif kw == 2:
                    patch = jnp.where(not_right, patch, 0.0)
                contrib = jnp.dot(patch, w3_ref[kh * 3 + kw],
                                  preferred_element_type=jnp.float32)
                if first:
                    acc_ref[...] = contrib
                    first = False
                else:
                    acc_ref[...] += contrib

        o_ref[0] = (acc_ref[...] + b3_ref[...]).astype(o_ref.dtype)

    return kernel


def context_embedding_nhwc(x_nhwc, w1p_mat, b1_row, w3_taps, b3_row):
    """ContextEmbedding forward on NHWC input (preferred layout, no transposes).

    Weights must be pre-fused with `fuse_context_embedding_params`.
    For bf16 deployment (v6e/v7x), pass bf16 x / weights; accumulation stays
    f32 via preferred_element_type.
    """
    N, H, W, C = x_nhwc.shape
    HW = H * W
    pad = _round_up(W + 1, 8)            # halo rows, sublane-aligned

    x2d = x_nhwc.reshape(N, HW, C)       # contiguous -> free reshape

    out2d = pl.pallas_call(
        _make_context_embedding_kernel(H, W, pad),
        out_shape=jax.ShapeDtypeStruct((N, HW, C), x_nhwc.dtype),
        grid_spec=pltpu.PrefetchScalarGridSpec(
            num_scalar_prefetch=0,
            grid=(N,),
            in_specs=[
                pl.BlockSpec((1, HW, C), lambda n: (n, 0, 0)),
                # Constant index maps: weights are DMA'd once and stay
                # resident in VMEM across grid steps.
                pl.BlockSpec((C, C), lambda n: (0, 0)),
                pl.BlockSpec((1, C), lambda n: (0, 0)),
                pl.BlockSpec((9, C, C), lambda n: (0, 0, 0)),
                pl.BlockSpec((1, C), lambda n: (0, 0)),
            ],
            out_specs=pl.BlockSpec((1, HW, C), lambda n: (n, 0, 0)),
            scratch_shapes=[
                pltpu.VMEM((HW + 2 * pad, C), jnp.float32),  # zero-halo'd z
                pltpu.VMEM((HW, C), jnp.float32),            # conv accumulator
            ],
        ),
        compiler_params=pltpu.CompilerParams(
            # Batch axis parallel -> megacore sharding on multi-TC parts.
            dimension_semantics=("parallel",),
            vmem_limit_bytes=32 * 1024 * 1024,
        ),
    )(x2d, w1p_mat, b1_row, w3_taps, b3_row)
    # TODO(synk): for production feature maps where the whole-image f32 slabs
    # no longer fit comfortably in VMEM (esp. v7x 64 MiB), tile H into row
    # chunks with a 1-row halo via an overlapping index_map.
    return out2d.reshape(N, H, W, C)


def context_embedding(x_nchw, w1p_mat, b1_row, w3_taps, b3_row):
    """Drop-in for the PyTorch NCHW interface.  The two transposes here are a
    compatibility shim only; keep the surrounding model in NHWC and call
    `context_embedding_nhwc` directly to avoid two full HBM round trips."""
    x_nhwc = jnp.transpose(x_nchw, (0, 2, 3, 1))
    out = context_embedding_nhwc(x_nhwc, w1p_mat, b1_row, w3_taps, b3_row)
    return jnp.transpose(out, (0, 3, 1, 2))


def fuse_context_embedding_params(w1_oi, bn_gamma, bn_beta, bn_mean, bn_var,
                                  w3_oihw, b3_vec, eps=1e-5):
    """Fuse RepConvBN (1x1 conv + BN, eval mode) and the residual add into one
    (Cin, Cout) matrix; lay the 3x3 conv out tap-major as (9, Cin, Cout)."""
    C = w1_oi.shape[0]
    scale = bn_gamma / jnp.sqrt(bn_var + eps)
    w1_fused_oi = w1_oi * scale[:, None]                        # (Cout, Cin)
    b1 = bn_beta - bn_mean * scale                              # (Cout,)
    # residual fold:  x + (x @ Wf.T + b1)  ==  x @ (I + Wf.T) + b1
    w1p_mat = jnp.eye(C, dtype=w1_oi.dtype) + w1_fused_oi.T     # (Cin, Cout)
    w3_taps = jnp.transpose(w3_oihw, (2, 3, 1, 0)).reshape(9, C, C)
    return w1p_mat, b1.reshape(1, C), w3_taps, b3_vec.reshape(1, C)


if __name__ == "__main__":
    key = jax.random.PRNGKey(0)
    N, C, H, W = 2, 4, 16, 16
    ks = jax.random.split(key, 8)

    x = jax.random.normal(ks[0], (N, C, H, W), jnp.float32)     # NCHW (PyTorch)

    # RepConvBN(C, C, 1): 1x1 conv (no bias) + BatchNorm2d parameters.
    w1_oi = jax.random.normal(ks[1], (C, C), jnp.float32) * 0.1  # (Cout, Cin)
    gamma = 1.0 + 0.1 * jax.random.normal(ks[2], (C,), jnp.float32)
    beta = 0.1 * jax.random.normal(ks[3], (C,), jnp.float32)
    mean = 0.1 * jax.random.normal(ks[4], (C,), jnp.float32)
    var = jax.random.uniform(ks[5], (C,), jnp.float32, 0.5, 1.5)

    # 3x3 conv (PyTorch OIHW layout) + bias.
    w3_oihw = jax.random.normal(ks[6], (C, C, 3, 3), jnp.float32) * 0.1
    b3_vec = 0.1 * jax.random.normal(ks[7], (C,), jnp.float32)

    w1p, b1, w3_taps, b3 = fuse_context_embedding_params(
        w1_oi, gamma, beta, mean, var, w3_oihw, b3_vec)

    out = context_embedding(x, w1p, b1, w3_taps, b3)
    out = jax.block_until_ready(out)

    # Pure-JAX reference.  It uses the same fused 1x1 operand (the fold
    # x + (x@Wf + b) == x@(I+Wf) + b is exact algebra), so the comparison is
    # matched to the kernel's matmul operand numerics.
    x_nhwc = jnp.transpose(x, (0, 2, 3, 1))
    z_ref = jnp.einsum('nhwc,cd->nhwd', x_nhwc, w1p) + b1[0]
    w3_hwio = jnp.transpose(w3_oihw, (2, 3, 1, 0))
    ref = lax.conv_general_dilated(
        z_ref, w3_hwio, window_strides=(1, 1), padding='SAME',
        dimension_numbers=('NHWC', 'HWIO', 'NHWC')) + b3_vec
    ref = jnp.transpose(ref, (0, 3, 1, 2))

    assert out.shape == (N, C, H, W)
    err = float(jnp.max(jnp.abs(out - ref)))
    assert jnp.allclose(out, ref, atol=2e-4, rtol=2e-4), err

    print("KERNEL_OK")
</pallas_src>

<mosaic_0001>
module attributes {stable_mosaic.version = 11 : i64} {
  func.func @kernel(%arg0: i32, %arg1: memref<1x256x4xf32, #tpu.memory_space<vmem>>, %arg2: memref<4x4xf32, #tpu.memory_space<vmem>>, %arg3: memref<1x4xf32, #tpu.memory_space<vmem>>, %arg4: memref<9x4x4xf32, #tpu.memory_space<vmem>>, %arg5: memref<1x4xf32, #tpu.memory_space<vmem>>, %arg6: memref<1x256x4xf32, #tpu.memory_space<vmem>>, %arg7: memref<304x4xf32, #tpu.memory_space<vmem>>, %arg8: memref<256x4xf32, #tpu.memory_space<vmem>>) attributes {dimension_semantics = [#tpu.dimension_semantics<parallel>], iteration_bounds = array<i64: 2>, scalar_prefetch = 0 : i64, scratch_operands = 2 : i64, tpu.core_type = #tpu.core_type<tc>, window_params = [{transform_indices = @transform_0, window_bounds = array<i64: 1, 256, 4>}, {pipeline_mode = #tpu.pipeline_mode<synchronous>, transform_indices = @transform_1, window_bounds = array<i64: 4, 4>}, {pipeline_mode = #tpu.pipeline_mode<synchronous>, transform_indices = @transform_2, window_bounds = array<i64: 1, 4>}, {pipeline_mode = #tpu.pipeline_mode<synchronous>, transform_indices = @transform_3, window_bounds = array<i64: 9, 4, 4>}, {pipeline_mode = #tpu.pipeline_mode<synchronous>, transform_indices = @transform_4, window_bounds = array<i64: 1, 4>}, {transform_indices = @transform_5, window_bounds = array<i64: 1, 256, 4>}]} {
    %cst = arith.constant 0.000000e+00 : f32
    %0 = vector.broadcast %cst : f32 to vector<24x4xf32>
    %c0 = arith.constant 0 : index
    %c0_0 = arith.constant 0 : index
    %1 = vector.load %arg7[%c0, %c0_0] : memref<304x4xf32, #tpu.memory_space<vmem>>, vector<24x4xf32>
    tpu.vector_store %arg7[%c0, %c0_0], %0 {strides = array<i32>} : memref<304x4xf32, #tpu.memory_space<vmem>>, vector<24x4xf32>,
    %c280 = arith.constant 280 : index
    %c0_1 = arith.constant 0 : index
    %2 = vector.load %arg7[%c280, %c0_1] : memref<304x4xf32, #tpu.memory_space<vmem>>, vector<24x4xf32>
    tpu.vector_store %arg7[%c280, %c0_1], %0 {strides = array<i32>} : memref<304x4xf32, #tpu.memory_space<vmem>>, vector<24x4xf32>,
    %c0_2 = arith.constant 0 : index
    %c0_3 = arith.constant 0 : index
    %c0_4 = arith.constant 0 : index
    %3 = vector.load %arg1[%c0_2, %c0_3, %c0_4] : memref<1x256x4xf32, #tpu.memory_space<vmem>>, vector<1x256x4xf32>
    %4 = vector.shape_cast %3 : vector<1x256x4xf32> to vector<256x4xf32>
    %c0_5 = arith.constant 0 : index
    %c0_6 = arith.constant 0 : index
    %5 = vector.load %arg2[%c0_5, %c0_6] : memref<4x4xf32, #tpu.memory_space<vmem>>, vector<4x4xf32>
    %cst_7 = arith.constant dense<0.000000e+00> : vector<256x4xf32>
    %6 = tpu.matmul %4, %5, %cst_7 {dimension_numbers = #tpu.dot_dimension_numbers<[1], [0], [0], [1], [0, 0, 1, 1], [], []>} : vector<256x4xf32>, vector<4x4xf32>, vector<256x4xf32> -> vector<256x4xf32>
    %c0_8 = arith.constant 0 : index
    %c0_9 = arith.constant 0 : index
    %7 = vector.load %arg3[%c0_8, %c0_9] : memref<1x4xf32, #tpu.memory_space<vmem>>, vector<1x4xf32>
    %8 = vector.broadcast %7 : vector<1x4xf32> to vector<256x4xf32>
    %9 = arith.addf %6, %8 : vector<256x4xf32>
    %c24 = arith.constant 24 : index
    %c0_10 = arith.constant 0 : index
    %10 = vector.load %arg7[%c24, %c0_10] : memref<304x4xf32, #tpu.memory_space<vmem>>, vector<256x4xf32>
    tpu.vector_store %arg7[%c24, %c0_10], %9 {strides = array<i32>} : memref<304x4xf32, #tpu.memory_space<vmem>>, vector<256x4xf32>,
    %11 = tpu.iota {dimensions = array<i32: 0>} : vector<256x4xi32>
    %c16_i32 = arith.constant 16 : i32
    %c0_i32 = arith.constant 0 : i32
    %12 = arith.cmpi eq, %c16_i32, %c0_i32 : i32
    %c1_i32 = arith.constant 1 : i32
    %13 = arith.select %12, %c1_i32, %c16_i32 : i32
    %14 = vector.broadcast %13 : i32 to vector<256x4xi32>
    %15 = arith.remsi %11, %14 : vector<256x4xi32>
    %c0_i32_11 = arith.constant 0 : i32
    %16 = vector.broadcast %c0_i32_11 : i32 to vector<256x4xi32>
    %17 = arith.cmpi ne, %15, %16 : vector<256x4xi32>
    %c0_i32_12 = arith.constant 0 : i32
    %18 = vector.broadcast %c0_i32_12 : i32 to vector<256x4xi32>
    %19 = arith.cmpi slt, %15, %18 : vector<256x4xi32>
    %c0_i32_13 = arith.constant 0 : i32
    %20 = arith.cmpi slt, %13, %c0_i32_13 : i32
    %21 = vector.broadcast %20 : i1 to vector<256x4xi1>
    %22 = vector.broadcast %21 : vector<256x4xi1> to vector<256x4xi1>
    %23 = arith.xori %19, %22 : vector<256x4xi1>
    %24 = arith.andi %23, %17 : vector<256x4xi1>
    %25 = vector.broadcast %13 : i32 to vector<256x4xi32>
    %26 = arith.addi %15, %25 : vector<256x4xi32>
    %27 = arith.select %24, %26, %15 : vector<256x4xi1>, vector<256x4xi32>
    %c0_i32_14 = arith.constant 0 : i32
    %28 = vector.broadcast %c0_i32_14 : i32 to vector<256x4xi32>
    %29 = arith.cmpi sgt, %27, %28 : vector<256x4xi32>
    %c15_i32 = arith.constant 15 : i32
    %30 = vector.broadcast %c15_i32 : i32 to vector<256x4xi32>
    %31 = arith.cmpi slt, %27, %30 : vector<256x4xi32>
    %c7 = arith.constant 7 : index
    %c0_15 = arith.constant 0 : index
    %32 = vector.load %arg7[%c7, %c0_15] : memref<304x4xf32, #tpu.memory_space<vmem>>, vector<256x4xf32>
    %cst_16 = arith.constant 0.000000e+00 : f32
    %33 = vector.broadcast %cst_16 : f32 to vector<256x4xf32>
    %34 = arith.select %29, %32, %33 : vector<256x4xi1>, vector<256x4xf32>
    %c0_17 = arith.constant 0 : index
    %c0_18 = arith.constant 0 : index
    %c0_19 = arith.constant 0 : index
    %35 = vector.load %arg4[%c0_17, %c0_18, %c0_19] : memref<9x4x4xf32, #tpu.memory_space<vmem>>, vector<1x4x4xf32>
    %36 = vector.shape_cast %35 : vector<1x4x4xf32> to vector<4x4xf32>
    %cst_20 = arith.constant dense<0.000000e+00> : vector<256x4xf32>
    %37 = tpu.matmul %34, %36, %cst_20 {dimension_numbers = #tpu.dot_dimension_numbers<[1], [0], [0], [1], [0, 0, 1, 1], [], []>} : vector<256x4xf32>, vector<4x4xf32>, vector<256x4xf32> -> vector<256x4xf32>
    %c0_21 = arith.constant 0 : index
    %c0_22 = arith.constant 0 : index
    %38 = vector.load %arg8[%c0_21, %c0_22] : memref<256x4xf32, #tpu.memory_space<vmem>>, vector<256x4xf32>
    tpu.vector_store %arg8[%c0_21, %c0_22], %37 {strides = array<i32>} : memref<256x4xf32, #tpu.memory_space<vmem>>, vector<256x4xf32>,
    %c8 = arith.constant 8 : index
    %c0_23 = arith.constant 0 : index
    %39 = vector.load %arg7[%c8, %c0_23] : memref<304x4xf32, #tpu.memory_space<vmem>>, vector<256x4xf32>
    %c1 = arith.constant 1 : index
    %c0_24 = arith.constant 0 : index
    %c0_25 = arith.constant 0 : index
    %40 = vector.load %arg4[%c1, %c0_24, %c0_25] : memref<9x4x4xf32, #tpu.memory_space<vmem>>, vector<1x4x4xf32>
    %41 = vector.shape_cast %40 : vector<1x4x4xf32> to vector<4x4xf32>
    %cst_26 = arith.constant dense<0.000000e+00> : vector<256x4xf32>
    %42 = tpu.matmul %39, %41, %cst_26 {dimension_numbers = #tpu.dot_dimension_numbers<[1], [0], [0], [1], [0, 0, 1, 1], [], []>} : vector<256x4xf32>, vector<4x4xf32>, vector<256x4xf32> -> vector<256x4xf32>
    %c0_27 = arith.constant 0 : index
    %c0_28 = arith.constant 0 : index
    %43 = vector.load %arg8[%c0_27, %c0_28] : memref<256x4xf32, #tpu.memory_space<vmem>>, vector<256x4xf32>
    %44 = arith.addf %43, %42 : vector<256x4xf32>
    %c0_29 = arith.constant 0 : index
    %c0_30 = arith.constant 0 : index
    %45 = vector.load %arg8[%c0_29, %c0_30] : memref<256x4xf32, #tpu.memory_space<vmem>>, vector<256x4xf32>
    tpu.vector_store %arg8[%c0_29, %c0_30], %44 {strides = array<i32>} : memref<256x4xf32, #tpu.memory_space<vmem>>, vector<256x4xf32>,
    %c9 = arith.constant 9 : index
    %c0_31 = arith.constant 0 : index
    %46 = vector.load %arg7[%c9, %c0_31] : memref<304x4xf32, #tpu.memory_space<vmem>>, vector<256x4xf32>
    %cst_32 = arith.constant 0.000000e+00 : f32
    %47 = vector.broadcast %cst_32 : f32 to vector<256x4xf32>
    %48 = arith.select %31, %46, %47 : vector<256x4xi1>, vector<256x4xf32>
    %c2 = arith.constant 2 : index
    %c0_33 = arith.constant 0 : index
    %c0_34 = arith.constant 0 : index
    %49 = vector.load %arg4[%c2, %c0_33, %c0_34] : memref<9x4x4xf32, #tpu.memory_space<vmem>>, vector<1x4x4xf32>
    %50 = vector.shape_cast %49 : vector<1x4x4xf32> to vector<4x4xf32>
    %cst_35 = arith.constant dense<0.000000e+00> : vector<256x4xf32>
    %51 = tpu.matmul %48, %50, %cst_35 {dimension_numbers = #tpu.dot_dimension_numbers<[1], [0], [0], [1], [0, 0, 1, 1], [], []>} : vector<256x4xf32>, vector<4x4xf32>, vector<256x4xf32> -> vector<256x4xf32>
    %c0_36 = arith.constant 0 : index
    %c0_37 = arith.constant 0 : index
    %52 = vector.load %arg8[%c0_36, %c0_37] : memref<256x4xf32, #tpu.memory_space<vmem>>, vector<256x4xf32>
    %53 = arith.addf %52, %51 : vector<256x4xf32>
    %c0_38 = arith.constant 0 : index
    %c0_39 = arith.constant 0 : index
    %54 = vector.load %arg8[%c0_38, %c0_39] : memref<256x4xf32, #tpu.memory_space<vmem>>, vector<256x4xf32>
    tpu.vector_store %arg8[%c0_38, %c0_39], %53 {strides = array<i32>} : memref<256x4xf32, #tpu.memory_space<vmem>>, vector<256x4xf32>,
    %c23 = arith.constant 23 : index
    %c0_40 = arith.constant 0 : index
    %55 = vector.load %arg7[%c23, %c0_40] : memref<304x4xf32, #tpu.memory_space<vmem>>, vector<256x4xf32>
    %cst_41 = arith.constant 0.000000e+00 : f32
    %56 = vector.broadcast %cst_41 : f32 to vector<256x4xf32>
    %57 = arith.select %29, %55, %56 : vector<256x4xi1>, vector<256x4xf32>
    %c3 = arith.constant 3 : index
    %c0_42 = arith.constant 0 : index
    %c0_43 = arith.constant 0 : index
    %58 = vector.load %arg4[%c3, %c0_42, %c0_43] : memref<9x4x4xf32, #tpu.memory_space<vmem>>, vector<1x4x4xf32>
    %59 = vector.shape_cast %58 : vector<1x4x4xf32> to vector<4x4xf32>
    %cst_44 = arith.constant dense<0.000000e+00> : vector<256x4xf32>
    %60 = tpu.matmul %57, %59, %cst_44 {dimension_numbers = #tpu.dot_dimension_numbers<[1], [0], [0], [1], [0, 0, 1, 1], [], []>} : vector<256x4xf32>, vector<4x4xf32>, vector<256x4xf32> -> vector<256x4xf32>
    %c0_45 = arith.constant 0 : index
    %c0_46 = arith.constant 0 : index
    %61 = vector.load %arg8[%c0_45, %c0_46] : memref<256x4xf32, #tpu.memory_space<vmem>>, vector<256x4xf32>
    %62 = arith.addf %61, %60 : vector<256x4xf32>
    %c0_47 = arith.constant 0 : index
    %c0_48 = arith.constant 0 : index
    %63 = vector.load %arg8[%c0_47, %c0_48] : memref<256x4xf32, #tpu.memory_space<vmem>>, vector<256x4xf32>
    tpu.vector_store %arg8[%c0_47, %c0_48], %62 {strides = array<i32>} : memref<256x4xf32, #tpu.memory_space<vmem>>, vector<256x4xf32>,
    %c24_49 = arith.constant 24 : index
    %c0_50 = arith.constant 0 : index
    %64 = vector.load %arg7[%c24_49, %c0_50] : memref<304x4xf32, #tpu.memory_space<vmem>>, vector<256x4xf32>
    %c4 = arith.constant 4 : index
    %c0_51 = arith.constant 0 : index
    %c0_52 = arith.constant 0 : index
    %65 = vector.load %arg4[%c4, %c0_51, %c0_52] : memref<9x4x4xf32, #tpu.memory_space<vmem>>, vector<1x4x4xf32>
    %66 = vector.shape_cast %65 : vector<1x4x4xf32> to vector<4x4xf32>
    %cst_53 = arith.constant dense<0.000000e+00> : vector<256x4xf32>
    %67 = tpu.matmul %64, %66, %cst_53 {dimension_numbers = #tpu.dot_dimension_numbers<[1], [0], [0], [1], [0, 0, 1, 1], [], []>} : vector<256x4xf32>, vector<4x4xf32>, vector<256x4xf32> -> vector<256x4xf32>
    %c0_54 = arith.constant 0 : index
    %c0_55 = arith.constant 0 : index
    %68 = vector.load %arg8[%c0_54, %c0_55] : memref<256x4xf32, #tpu.memory_space<vmem>>, vector<256x4xf32>
    %69 = arith.addf %68, %67 : vector<256x4xf32>
    %c0_56 = arith.constant 0 : index
    %c0_57 = arith.constant 0 : index
    %70 = vector.load %arg8[%c0_56, %c0_57] : memref<256x4xf32, #tpu.memory_space<vmem>>, vector<256x4xf32>
    tpu.vector_store %arg8[%c0_56, %c0_57], %69 {strides = array<i32>} : memref<256x4xf32, #tpu.memory_space<vmem>>, vector<256x4xf32>,
    %c25 = arith.constant 25 : index
    %c0_58 = arith.constant 0 : index
    %71 = vector.load %arg7[%c25, %c0_58] : memref<304x4xf32, #tpu.memory_space<vmem>>, vector<256x4xf32>
    %cst_59 = arith.constant 0.000000e+00 : f32
    %72 = vector.broadcast %cst_59 : f32 to vector<256x4xf32>
    %73 = arith.select %31, %71, %72 : vector<256x4xi1>, vector<256x4xf32>
    %c5 = arith.constant 5 : index
    %c0_60 = arith.constant 0 : index
    %c0_61 = arith.constant 0 : index
    %74 = vector.load %arg4[%c5, %c0_60, %c0_61] : memref<9x4x4xf32, #tpu.memory_space<vmem>>, vector<1x4x4xf32>
    %75 = vector.shape_cast %74 : vector<1x4x4xf32> to vector<4x4xf32>
    %cst_62 = arith.constant dense<0.000000e+00> : vector<256x4xf32>
    %76 = tpu.matmul %73, %75, %cst_62 {dimension_numbers = #tpu.dot_dimension_numbers<[1], [0], [0], [1], [0, 0, 1, 1], [], []>} : vector<256x4xf32>, vector<4x4xf32>, vector<256x4xf32> -> vector<256x4xf32>
    %c0_63 = arith.constant 0 : index
    %c0_64 = arith.constant 0 : index
    %77 = vector.load %arg8[%c0_63, %c0_64] : memref<256x4xf32, #tpu.memory_space<vmem>>, vector<256x4xf32>
    %78 = arith.addf %77, %76 : vector<256x4xf32>
    %c0_65 = arith.constant 0 : index
    %c0_66 = arith.constant 0 : index
    %79 = vector.load %arg8[%c0_65, %c0_66] : memref<256x4xf32, #tpu.memory_space<vmem>>, vector<256x4xf32>
    tpu.vector_store %arg8[%c0_65, %c0_66], %78 {strides = array<i32>} : memref<256x4xf32, #tpu.memory_space<vmem>>, vector<256x4xf32>,
    %c39 = arith.constant 39 : index
    %c0_67 = arith.constant 0 : index
    %80 = vector.load %arg7[%c39, %c0_67] : memref<304x4xf32, #tpu.memory_space<vmem>>, vector<256x4xf32>
    %cst_68 = arith.constant 0.000000e+00 : f32
    %81 = vector.broadcast %cst_68 : f32 to vector<256x4xf32>
    %82 = arith.select %29, %80, %81 : vector<256x4xi1>, vector<256x4xf32>
    %c6 = arith.constant 6 : index
    %c0_69 = arith.constant 0 : index
    %c0_70 = arith.constant 0 : index
    %83 = vector.load %arg4[%c6, %c0_69, %c0_70] : memref<9x4x4xf32, #tpu.memory_space<vmem>>, vector<1x4x4xf32>
    %84 = vector.shape_cast %83 : vector<1x4x4xf32> to vector<4x4xf32>
    %cst_71 = arith.constant dense<0.000000e+00> : vector<256x4xf32>
    %85 = tpu.matmul %82, %84, %cst_71 {dimension_numbers = #tpu.dot_dimension_numbers<[1], [0], [0], [1], [0, 0, 1, 1], [], []>} : vector<256x4xf32>, vector<4x4xf32>, vector<256x4xf32> -> vector<256x4xf32>
    %c0_72 = arith.constant 0 : index
    %c0_73 = arith.constant 0 : index
    %86 = vector.load %arg8[%c0_72, %c0_73] : memref<256x4xf32, #tpu.memory_space<vmem>>, vector<256x4xf32>
    %87 = arith.addf %86, %85 : vector<256x4xf32>
    %c0_74 = arith.constant 0 : index
    %c0_75 = arith.constant 0 : index
    %88 = vector.load %arg8[%c0_74, %c0_75] : memref<256x4xf32, #tpu.memory_space<vmem>>, vector<256x4xf32>
    tpu.vector_store %arg8[%c0_74, %c0_75], %87 {strides = array<i32>} : memref<256x4xf32, #tpu.memory_space<vmem>>, vector<256x4xf32>,
    %c40 = arith.constant 40 : index
    %c0_76 = arith.constant 0 : index
    %89 = vector.load %arg7[%c40, %c0_76] : memref<304x4xf32, #tpu.memory_space<vmem>>, vector<256x4xf32>
    %c7_77 = arith.constant 7 : index
    %c0_78 = arith.constant 0 : index
    %c0_79 = arith.constant 0 : index
    %90 = vector.load %arg4[%c7_77, %c0_78, %c0_79] : memref<9x4x4xf32, #tpu.memory_space<vmem>>, vector<1x4x4xf32>
    %91 = vector.shape_cast %90 : vector<1x4x4xf32> to vector<4x4xf32>
    %cst_80 = arith.constant dense<0.000000e+00> : vector<256x4xf32>
    %92 = tpu.matmul %89, %91, %cst_80 {dimension_numbers = #tpu.dot_dimension_numbers<[1], [0], [0], [1], [0, 0, 1, 1], [], []>} : vector<256x4xf32>, vector<4x4xf32>, vector<256x4xf32> -> vector<256x4xf32>
    %c0_81 = arith.constant 0 : index
    %c0_82 = arith.constant 0 : index
    %93 = vector.load %arg8[%c0_81, %c0_82] : memref<256x4xf32, #tpu.memory_space<vmem>>, vector<256x4xf32>
    %94 = arith.addf %93, %92 : vector<256x4xf32>
    %c0_83 = arith.constant 0 : index
    %c0_84 = arith.constant 0 : index
    %95 = vector.load %arg8[%c0_83, %c0_84] : memref<256x4xf32, #tpu.memory_space<vmem>>, vector<256x4xf32>
    tpu.vector_store %arg8[%c0_83, %c0_84], %94 {strides = array<i32>} : memref<256x4xf32, #tpu.memory_space<vmem>>, vector<256x4xf32>,
    %c41 = arith.constant 41 : index
    %c0_85 = arith.constant 0 : index
    %96 = vector.load %arg7[%c41, %c0_85] : memref<304x4xf32, #tpu.memory_space<vmem>>, vector<256x4xf32>
    %cst_86 = arith.constant 0.000000e+00 : f32
    %97 = vector.broadcast %cst_86 : f32 to vector<256x4xf32>
    %98 = arith.select %31, %96, %97 : vector<256x4xi1>, vector<256x4xf32>
    %c8_87 = arith.constant 8 : index
    %c0_88 = arith.constant 0 : index
    %c0_89 = arith.constant 0 : index
    %99 = vector.load %arg4[%c8_87, %c0_88, %c0_89] : memref<9x4x4xf32, #tpu.memory_space<vmem>>, vector<1x4x4xf32>
    %100 = vector.shape_cast %99 : vector<1x4x4xf32> to vector<4x4xf32>
    %cst_90 = arith.constant dense<0.000000e+00> : vector<256x4xf32>
    %101 = tpu.matmul %98, %100, %cst_90 {dimension_numbers = #tpu.dot_dimension_numbers<[1], [0], [0], [1], [0, 0, 1, 1], [], []>} : vector<256x4xf32>, vector<4x4xf32>, vector<256x4xf32> -> vector<256x4xf32>
    %c0_91 = arith.constant 0 : index
    %c0_92 = arith.constant 0 : index
    %102 = vector.load %arg8[%c0_91, %c0_92] : memref<256x4xf32, #tpu.memory_space<vmem>>, vector<256x4xf32>
    %103 = arith.addf %102, %101 : vector<256x4xf32>
    %c0_93 = arith.constant 0 : index
    %c0_94 = arith.constant 0 : index
    %104 = vector.load %arg8[%c0_93, %c0_94] : memref<256x4xf32, #tpu.memory_space<vmem>>, vector<256x4xf32>
    tpu.vector_store %arg8[%c0_93, %c0_94], %103 {strides = array<i32>} : memref<256x4xf32, #tpu.memory_space<vmem>>, vector<256x4xf32>,
    %c0_95 = arith.constant 0 : index
    %c0_96 = arith.constant 0 : index
    %105 = vector.load %arg8[%c0_95, %c0_96] : memref<256x4xf32, #tpu.memory_space<vmem>>, vector<256x4xf32>
    %c0_97 = arith.constant 0 : index
    %c0_98 = arith.constant 0 : index
    %106 = vector.load %arg5[%c0_97, %c0_98] : memref<1x4xf32, #tpu.memory_space<vmem>>, vector<1x4xf32>
    %107 = vector.broadcast %106 : vector<1x4xf32> to vector<256x4xf32>
    %108 = arith.addf %105, %107 : vector<256x4xf32>
    %c0_99 = arith.constant 0 : index
    %c0_100 = arith.constant 0 : index
    %c0_101 = arith.constant 0 : index
    %109 = vector.load %arg6[%c0_99, %c0_100, %c0_101] : memref<1x256x4xf32, #tpu.memory_space<vmem>>, vector<1x256x4xf32>
    %110 = vector.shape_cast %109 : vector<1x256x4xf32> to vector<256x4xf32>
    %111 = vector.shape_cast %108 : vector<256x4xf32> to vector<1x256x4xf32>
    tpu.vector_store %arg6[%c0_99, %c0_100, %c0_101], %111 {strides = array<i32>} : memref<1x256x4xf32, #tpu.memory_space<vmem>>, vector<1x256x4xf32>,
    return
  }
  func.func @transform_0(%arg0: i32) -> (i32, i32, i32) {
    %c0_i32 = arith.constant 0 : i32
    %c0_i32_0 = arith.constant 0 : i32
    %c0_i32_1 = arith.constant 0 : i32
    return %arg0, %c0_i32, %c0_i32_0 : i32, i32, i32
  }
  func.func @transform_1(%arg0: i32) -> (i32, i32) {
    %c0_i32 = arith.constant 0 : i32
    %c0_i32_0 = arith.constant 0 : i32
    %c0_i32_1 = arith.constant 0 : i32
    return %c0_i32, %c0_i32_0 : i32, i32
  }
  func.func @transform_2(%arg0: i32) -> (i32, i32) {
    %c0_i32 = arith.constant 0 : i32
    %c0_i32_0 = arith.constant 0 : i32
    %c0_i32_1 = arith.constant 0 : i32
    return %c0_i32, %c0_i32_0 : i32, i32
  }
  func.func @transform_3(%arg0: i32) -> (i32, i32, i32) {
    %c0_i32 = arith.constant 0 : i32
    %c0_i32_0 = arith.constant 0 : i32
    %c0_i32_1 = arith.constant 0 : i32
    %c0_i32_2 = arith.constant 0 : i32
    return %c0_i32, %c0_i32_0, %c0_i32_1 : i32, i32, i32
  }
  func.func @transform_4(%arg0: i32) -> (i32, i32) {
    %c0_i32 = arith.constant 0 : i32
    %c0_i32_0 = arith.constant 0 : i32
    %c0_i32_1 = arith.constant 0 : i32
    return %c0_i32, %c0_i32_0 : i32, i32
  }
  func.func @transform_5(%arg0: i32) -> (i32, i32, i32) {
    %c0_i32 = arith.constant 0 : i32
    %c0_i32_0 = arith.constant 0 : i32
    %c0_i32_1 = arith.constant 0 : i32
    return %arg0, %c0_i32, %c0_i32_0 : i32, i32, i32
  }
}

</mosaic_0001>

<bundles_post_ra>
// kernel: tpu_custom_call.1
= control target key start
LH: loop header
LB: loop body
LE: loop exit
PB: predicated region body
PF: predicated region fallthrough
CT: control target
= control target key end

     0   :  { %s6712_s18 = smov 0   ;;  %s8423_s0 = inlined_call_operand.vmem [shape: f32[2,256,4], index: 0, kind: input, shape index: {}]   ;;  %s8424_s1 = inlined_call_operand.vmem [shape: f32[4,4], index: 1, kind: input, shape index: {}]   ;;  %s8425_s2 = inlined_call_operand.vmem [shape: f32[1,4], index: 2, kind: input, shape index: {}]   ;;  %s8426_s3 = inlined_call_operand.vmem [shape: f32[9,4,4], index: 3, kind: input, shape index: {}]   ;;  %s8427_s4 = inlined_call_operand.vmem [shape: f32[1,4], index: 4, kind: input, shape index: {}]   ;;  %s8428_s5 = inlined_call_operand.vmem [shape: f32[2,256,4], index: 5, kind: output, shape index: {}]  }
   0x1 LB: > { %s5481_s19 = sadd.s32 4294967295, %s6679_s18   ;;  %p5485_p0 = scmp.ge.s32.totalorder %s6679_s18, 1  ;;  %s6679_s18 = sphi %s6712_s18, %s15_s18  }
   0x2   : > { %p187_p1 = scmp.lt.s32.totalorder %s6679_s18, 3 }
   0x4   : > { %p188_p2 = pnand %p5485_p0, %p187_p1 }
   0x6   : > { %191 = sbr.rel (%p188_p2) target bundleno = 746 (0x2ea), region = 40 }
   0xb   : > { %v264_v0 = vld [vmem:[%s8424_s1] sm:$0xf]  ;;  %vm8442_vm0 = vcmask 1043456   ;;  %p215_p3 = scmp.lt.s32.totalorder %s5481_s19, 1  ;;  %vm225_vm1 = vcmask 31744   ;;  %v6681_v33 = vmov 0.0   ;;  %v629_v34 = vlaneseq }
   0xc   : > { %6164 = vmatprep.subr.msk.mxu0 %vm8442_vm0, %v264_v0  ;;  %226 = vst.msk [vmem:[#allocation2] sm:$0xff] %vm225_vm1, %v6681_v33  ;;  %227 = vst.msk [vmem:[#allocation2 + $0x8] sm:$0xff] %vm225_vm1, %v6681_v33  ;;  %v5557_v36 = vld [vmem:[%s8426_s3 + $0x4] sm:$0xf]  ;;  %v1174_v38 = vld [vmem:[%s8426_s3] sm:$0xf] }
   0xd   : > { %6165 = vmatpush3.msk.msra.mxu0 %vm8442_vm0, %v264_v0  ;;  %s8667_s19 = smov (!%p215_p3, %s5481_s19), 1  ;;  %228 = vst.msk [vmem:[#allocation2 + $0x10] sm:$0xff] %vm225_vm1, %v6681_v33  ;;  %229 = vst.msk [vmem:[#allocation2 + $0x118] sm:$0xff] %vm225_vm1, %v6681_v33  ;;  %v6805_v35 = vshrl.u32 %v629_v34, 7  ;;  %v8494_v39 = vmov 0  ;;  %6214 = vmatprep.subr.msk.mxu1 %vm8442_vm0, %v1174_v38  ;;  %v8497_v0 = vmov 0 }
   0xe   : > { %s5832_s22 = sshll.u32 %s8667_s19, 8  ;;  %230 = vst.msk [vmem:[#allocation2 + $0x120] sm:$0xff] %vm225_vm1, %v6681_v33  ;;  %231 = vst.msk [vmem:[#allocation2 + $0x128] sm:$0xff] %vm225_vm1, %v6681_v33  ;;  %6264 = vmatprep.subr.msk.mxu0 %vm8442_vm0, %v5557_v36  ;;  %6215 = vmatpush3.msk.msra.mxu1 %vm8442_vm0, %v1174_v38  ;;  %v5591_v45 = vld [vmem:[%s8426_s3 + $0x8] sm:$0xf] }
   0xf   : > { %s6733_s25 = scalar_lea.vmem %s8423_s0, %s5832_s22  ;;  %v666_v37 = vand.u32 15, %v6805_v35  ;;  %6314 = vmatprep.subr.msk.mxu1 %vm8442_vm0, %v5591_v45  ;;  %v5625_v46 = vld [vmem:[%s8426_s3 + $0xc] sm:$0xf]  ;;  %v6841_v47 = vld [vmem:[%s8426_s3 + $0x10] sm:$0xf]  ;;  %v632_v53 = vadd.s32 16, %v6805_v35  ;;  %s8293_s28 = scalar_lea.vmem %s8428_s5, %s5832_s22 }
  0x10   : > { %v232_v1 = vld [vmem:[%s6733_s25] sm:$0xff]  ;;  %v233_v2 = vld [vmem:[%s6733_s25 + $0x8] sm:$0xff]  ;;  %v234_v3 = vld [vmem:[%s6733_s25 + $0x10] sm:$0xff]  ;;  %v634_v59 = vadd.s32 32, %v6805_v35 }
  0x11   : > { %6166 = vmatprep.mubr.msk.f32.mxu0 %vm225_vm1, %v232_v1  ;;  %v235_v4 = vld [vmem:[%s6733_s25 + $0x18] sm:$0xff]  ;;  %v236_v5 = vld [vmem:[%s6733_s25 + $0x20] sm:$0xff]  ;;  %v237_v6 = vld [vmem:[%s6733_s25 + $0x28] sm:$0xff]  ;;  %vm6816_vm2 = vcmp.gt.s32.totalorder %v666_v37, 0  ;;  %v680_v58 = vand.u32 15, %v632_v53  ;;  %v8508_v37 = vmov 0 }
  0x12   : > { %6167 = vmatmul.mubr.msk.f32.vlgmr.msra.gmra.mxu0 %vm225_vm1, %v233_v2  ;;  %v238_v7 = vld [vmem:[%s6733_s25 + $0x30] sm:$0xff]  ;;  %v239_v8 = vld [vmem:[%s6733_s25 + $0x38] sm:$0xff]  ;;  %v240_v9 = vld [vmem:[%s6733_s25 + $0x40] sm:$0xff]  ;;  %v8495_v39 = vsel %vm6816_vm2, 4294967295, %v8494_v39  ;;  %v694_v1 = vand.u32 15, %v634_v59  ;;  %v636_v2 = vadd.s32 48, %v6805_v35 }
  0x13   : > { %6169 = vmatprep.mubr.msk.f32.mxu0 %vm225_vm1, %v234_v3  ;;  %v241_v10 = vld [vmem:[%s6733_s25 + $0x48] sm:$0xff]  ;;  %v242_v11 = vld [vmem:[%s6733_s25 + $0x50] sm:$0xff]  ;;  %v243_v12 = vld [vmem:[%s6733_s25 + $0x58] sm:$0xff]  ;;  %6265 = vmatpush3.msk.msra.mxu0 %vm8442_vm0, %v5557_v36  ;;  %8496 = vst [vmem:[#allocation4_spill] sm:$0xff] %v8495_v39  ;;  %vm6868_vm3 = vcmp.gt.s32.totalorder %v680_v58, 0  ;;  %v8512_v53 = vmov 0 }
  0x14   : > { %v244_v13 = vld [vmem:[%s6733_s25 + $0x60] sm:$0xff]  ;;  %v245_v14 = vld [vmem:[%s6733_s25 + $0x68] sm:$0xff]  ;;  %v246_v15 = vld [vmem:[%s6733_s25 + $0x70] sm:$0xff]  ;;  %6364 = vmatprep.subr.msk.mxu0 %vm8442_vm0, %v5625_v46  ;;  %v8498_v0 = vsel %vm6868_vm3, 4294967295, %v8497_v0  ;;  %vm6893_vm4 = vcmp.gt.s32.totalorder %v694_v1, 0 }
  0x15   : > { %v247_v16 = vld [vmem:[%s6733_s25 + $0x78] sm:$0xff]  ;;  %v248_v17 = vld [vmem:[%s6733_s25 + $0x80] sm:$0xff]  ;;  %v249_v18 = vld [vmem:[%s6733_s25 + $0x88] sm:$0xff]  ;;  %8499 = vst [vmem:[#allocation5_spill] sm:$0xff] %v8498_v0 }
  0x16   : > { %6170 = vmatmul.mubr.msk.f32.gmra.mxu0 %vm225_vm1, %v235_v4  ;;  %v250_v19 = vld [vmem:[%s6733_s25 + $0x90] sm:$0xff]  ;;  %v251_v20 = vld [vmem:[%s6733_s25 + $0x98] sm:$0xff]  ;;  %v252_v21 = vld [vmem:[%s6733_s25 + $0xa0] sm:$0xff] }
  0x17   : > { %6172 = vmatprep.mubr.msk.f32.mxu0 %vm225_vm1, %v236_v5  ;;  %v253_v22 = vld [vmem:[%s6733_s25 + $0xa8] sm:$0xff]  ;;  %v254_v23 = vld [vmem:[%s6733_s25 + $0xb0] sm:$0xff]  ;;  %v255_v24 = vld [vmem:[%s6733_s25 + $0xb8] sm:$0xff] }
  0x18   : > { %v256_v25 = vld [vmem:[%s6733_s25 + $0xc0] sm:$0xff]  ;;  %v257_v26 = vld [vmem:[%s6733_s25 + $0xc8] sm:$0xff]  ;;  %v258_v27 = vld [vmem:[%s6733_s25 + $0xd0] sm:$0xff] }
  0x19   : > { %v259_v28 = vld [vmem:[%s6733_s25 + $0xd8] sm:$0xff]  ;;  %v260_v29 = vld [vmem:[%s6733_s25 + $0xe0] sm:$0xff]  ;;  %v261_v30 = vld [vmem:[%s6733_s25 + $0xe8] sm:$0xff] }
  0x1a   : > { %6173 = vmatmul.mubr.msk.f32.gmra.mxu0 %vm225_vm1, %v237_v6  ;;  %v262_v31 = vld [vmem:[%s6733_s25 + $0xf0] sm:$0xff]  ;;  %v263_v32 = vld [vmem:[%s6733_s25 + $0xf8] sm:$0xff]  ;;  %v1110_v40 = vld [vmem:[#allocation2 + $0x7] sm:$0xff] }
  0x1b   : > { %6175 = vmatprep.mubr.msk.f32.mxu0 %vm225_vm1, %v238_v7  ;;  %v1142_v41 = vsel %vm6816_vm2, %v1110_v40, 0.0  ;;  %v1111_v42 = vld [vmem:[#allocation2 + $0xf] sm:$0xff]  ;;  %v6848_v48 = vld [vmem:[%s8425_s2] ss:$0 sm:$0xff]  ;;  %v642_v40 = vadd.s32 96, %v6805_v35 }
  0x1c   : > { %6216 = vmatprep.mubr.msk.f32.mxu1 %vm225_vm1, %v1142_v41  ;;  %v1531_v43 = vld [vmem:[#allocation2 + $0x8] sm:$0xff]  ;;  %v1532_v44 = vld [vmem:[#allocation2 + $0x10] sm:$0xff] }
  0x1d   : > { %6217 = vmatmul.mubr.msk.f32.vlgmr.msra.gmra.mxu1 %vm225_vm1, %v1111_v42  ;;  %v6853_v50 = vld [vmem:[%s8426_s3 + $0x14] sm:$0xf] }
  0x1e   : > { %6176 = vmatmul.mubr.msk.f32.gmra.mxu0 %vm225_vm1, %v239_v8  ;;  %6315 = vmatpush3.msk.msra.mxu1 %vm8442_vm0, %v5591_v45 }
  0x1f   : > { %6178 = vmatprep.mubr.msk.f32.mxu0 %vm225_vm1, %v240_v9  ;;  %6414 = vmatprep.subr.msk.mxu1 %vm8442_vm0, %v6841_v47 }
  0x22   : > { %6179 = vmatmul.mubr.msk.f32.gmra.mxu0 %vm225_vm1, %v241_v10 }
  0x23   : > { %6181 = vmatprep.mubr.msk.f32.mxu0 %vm225_vm1, %v242_v11 }
  0x26   : > { %6182 = vmatmul.mubr.msk.f32.gmra.mxu0 %vm225_vm1, %v243_v12  ;;  %v8500_v12 = vmov 0 }
  0x27   : > { %6184 = vmatprep.mubr.msk.f32.mxu0 %vm225_vm1, %v244_v13  ;;  %v8501_v12 = vsel %vm6893_vm4, 4294967295, %v8500_v12  ;;  %v708_v13 = vand.u32 15, %v636_v2  ;;  %v8516_v2 = vmov 0 }
  0x28   : > { %8502 = vst [vmem:[#allocation6_spill] sm:$0xff] %v8501_v12 }
  0x29   : > { %vm6920_vm5 = vcmp.gt.s32.totalorder %v708_v13, 0 }
  0x2a   : > { %6185 = vmatmul.mubr.msk.f32.gmra.mxu0 %vm225_vm1, %v245_v14  ;;  %v638_v14 = vadd.s32 64, %v6805_v35 }
  0x2b   : > { %6187 = vmatprep.mubr.msk.f32.mxu0 %vm225_vm1, %v246_v15 }
  0x2e   : > { %6188 = vmatmul.mubr.msk.f32.gmra.mxu0 %vm225_vm1, %v247_v16 }
  0x2f   : > { %6190 = vmatprep.mubr.msk.f32.mxu0 %vm225_vm1, %v248_v17 }
  0x32   : > { %6191 = vmatmul.mubr.msk.f32.gmra.mxu0 %vm225_vm1, %v249_v18 }
  0x33   : > { %6193 = vmatprep.mubr.msk.f32.mxu0 %vm225_vm1, %v250_v19 }
  0x36   : > { %6194 = vmatmul.mubr.msk.f32.gmra.mxu0 %vm225_vm1, %v251_v20 }
  0x37   : > { %6196 = vmatprep.mubr.msk.f32.mxu0 %vm225_vm1, %v252_v21 }
  0x3a   : > { %6197 = vmatmul.mubr.msk.f32.gmra.mxu0 %vm225_vm1, %v253_v22 }
  0x3b   : > { %6199 = vmatprep.mubr.msk.f32.mxu0 %vm225_vm1, %v254_v23 }
  0x3e   : > { %6200 = vmatmul.mubr.msk.f32.gmra.mxu0 %vm225_vm1, %v255_v24  ;;  %v8504_v24 = vmov 0 }
  0x3f   : > { %6202 = vmatprep.mubr.msk.f32.mxu0 %vm225_vm1, %v256_v25  ;;  %v8505_v24 = vsel %vm6920_vm5, 4294967295, %v8504_v24  ;;  %v722_v25 = vand.u32 15, %v638_v14 }
  0x41   : > { %vm6947_vm6 = vcmp.gt.s32.totalorder %v722_v25, 0 }
  0x42   : > { %6203 = vmatmul.mubr.msk.f32.gmra.mxu0 %vm225_vm1, %v257_v26  ;;  %v640_v26 = vadd.s32 80, %v6805_v35  ;;  %v8509_v37 = vsel %vm6947_vm6, 4294967295, %v8508_v37 }
  0x43   : > { %6205 = vmatprep.mubr.msk.f32.mxu0 %vm225_vm1, %v258_v27 }
  0x44   : > { %v736_v38 = vand.u32 15, %v640_v26  ;;  %v648_v26 = vadd.s32 144, %v6805_v35 }
  0x46   : > { %6206 = vmatmul.mubr.msk.f32.gmra.mxu0 %vm225_vm1, %v259_v28  ;;  %vm6974_vm7 = vcmp.gt.s32.totalorder %v736_v38, 0 }
  0x47   : > { %6208 = vmatprep.mubr.msk.f32.mxu0 %vm225_vm1, %v260_v29  ;;  %v8513_v53 = vsel %vm6974_vm7, 4294967295, %v8512_v53 }
  0x4a   : > { %6209 = vmatmul.mubr.msk.f32.gmra.mxu0 %vm225_vm1, %v261_v30 }
  0x4b   : > { %6211 = vmatprep.mubr.msk.f32.mxu0 %vm225_vm1, %v262_v31 }
  0x4e   : > { %6212 = vmatmul.mubr.msk.f32.gmra.mxu0 %vm225_vm1, %v263_v32 }
  0x4f   : > { %6266 = vmatprep.mubr.msk.f32.mxu0 %vm225_vm1, %v1531_v43 }
  0x52   : > { %6267 = vmatmul.mubr.msk.f32.vlgmr.msra.gmra.mxu0 %vm225_vm1, %v1532_v44 }
  0x53   : > { %6365 = vmatpush3.msk.msra.mxu0 %vm8442_vm0, %v5625_v46 }
  0x54   : > { %6464 = vmatprep.subr.msk.mxu0 %vm8442_vm0, %v6853_v50 }
  0xd2   : > { %v6168_v49 = vpop.f32.mrf.mxu0 }
  0xd3   : > { %v444_v51 = vadd.f32 %v6168_v49, %v6848_v48 }
  0xd4   : > { %v438_v52 = vpop.f32.mrf.mxu0 }
  0xd5   : > { %598 = vst.msk [vmem:[#allocation2 + $0x20] sm:$0xff] %vm225_vm1, %v444_v51  ;;  %v439_v54 = vadd.f32 %v6848_v48, %v438_v52 }
  0xd6   : > { %v6171_v55 = vpop.f32.mrf.mxu0 }
  0xd7   : > { %597 = vst.msk [vmem:[#allocation2 + $0x18] sm:$0xff] %vm225_vm1, %v439_v54  ;;  %v454_v56 = vadd.f32 %v6171_v55, %v6848_v48  ;;  %v750_v54 = vand.u32 15, %v642_v40  ;;  %v644_v55 = vadd.s32 112, %v6805_v35 }
  0xd8   : > { %v448_v57 = vpop.f32.mrf.mxu0 }
  0xd9   : > { %600 = vst.msk [vmem:[#allocation2 + $0x30] sm:$0xff] %vm225_vm1, %v454_v56  ;;  %v449_v60 = vadd.f32 %v6848_v48, %v448_v57  ;;  %vm7001_vm8 = vcmp.gt.s32.totalorder %v750_v54, 0 }
  0xda   : > { %v6174_v61 = vpop.f32.mrf.mxu0  ;;  %v8517_v2 = vsel %vm7001_vm8, 4294967295, %v8516_v2 }
  0xdb   : > { %599 = vst.msk [vmem:[#allocation2 + $0x28] sm:$0xff] %vm225_vm1, %v449_v60  ;;  %v464_v62 = vadd.f32 %v6174_v61, %v6848_v48 }
  0xdc   : > { %v458_v63 = vpop.f32.mrf.mxu0  ;;  %v6886_v9 = vld [vmem:[#allocation2 + $0x20] sm:$0xff] }
  0xdd   : > { %602 = vst.msk [vmem:[#allocation2 + $0x40] sm:$0xff] %vm225_vm1, %v464_v62  ;;  %v459_v3 = vadd.f32 %v6848_v48, %v458_v63 }
  0xde   : > { %v6177_v4 = vpop.f32.mrf.mxu0  ;;  %v6875_v5 = vld [vmem:[#allocation2 + $0x18] sm:$0xff] }
  0xdf   : > { %v6877_v6 = vld [vmem:[#allocation2 + $0x17] sm:$0xff]  ;;  %601 = vst.msk [vmem:[#allocation2 + $0x38] sm:$0xff] %vm225_vm1, %v459_v3  ;;  %v474_v7 = vadd.f32 %v6177_v4, %v6848_v48  ;;  %6269 = vmatprep.mubr.msk.f32.mxu0 %vm225_vm1, %v6875_v5  ;;  %v6891_v11 = vld [vmem:[#allocation2 + $0x1f] sm:$0xff]  ;;  %v764_v3 = vand.u32 15, %v644_v55  ;;  %v646_v4 = vadd.s32 128, %v6805_v35 }
  0xe0   : > { %v1144_v8 = vsel %vm6868_vm3, %v6877_v6, 0.0  ;;  %v468_v10 = vpop.f32.mrf.mxu0  ;;  %6270 = vmatmul.mubr.msk.f32.gmra.mxu0 %vm225_vm1, %v6886_v9  ;;  %v6913_v21 = vld [vmem:[#allocation2 + $0x30] sm:$0xff] }
  0xe1   : > { %6219 = vmatprep.mubr.msk.f32.mxu1 %vm225_vm1, %v1144_v8  ;;  %604 = vst.msk [vmem:[#allocation2 + $0x50] sm:$0xff] %vm225_vm1, %v474_v7  ;;  %v469_v15 = vadd.f32 %v6848_v48, %v468_v10  ;;  %8503 = vst [vmem:[#allocation7_spill] sm:$0xff] %v6913_v21  ;;  %vm7028_vm9 = vcmp.gt.s32.totalorder %v764_v3, 0  ;;  %v778_v25 = vand.u32 15, %v646_v4 }
  0xe2   : > { %6220 = vmatmul.mubr.msk.f32.gmra.mxu1 %vm225_vm1, %v6891_v11  ;;  %v6180_v16 = vpop.f32.mrf.mxu0  ;;  %v6902_v17 = vld [vmem:[#allocation2 + $0x28] sm:$0xff] }
  0xe3   : > { %v6904_v18 = vld [vmem:[#allocation2 + $0x27] sm:$0xff]  ;;  %603 = vst.msk [vmem:[#allocation2 + $0x48] sm:$0xff] %vm225_vm1, %v469_v15  ;;  %v484_v19 = vadd.f32 %v6180_v16, %v6848_v48  ;;  %6272 = vmatprep.mubr.msk.f32.mxu0 %vm225_vm1, %v6902_v17  ;;  %v6918_v23 = vld [vmem:[#allocation2 + $0x2f] sm:$0xff]  ;;  %vm7055_vm10 = vcmp.gt.s32.totalorder %v778_v25, 0 }
  0xe4   : > { %v1146_v20 = vsel %vm6893_vm4, %v6904_v18, 0.0  ;;  %v478_v22 = vpop.f32.mrf.mxu0  ;;  %6273 = vmatmul.mubr.msk.f32.gmra.mxu0 %vm225_vm1, %v6913_v21  ;;  %v6940_v33 = vld [vmem:[#allocation2 + $0x40] sm:$0xff] }
  0xe5   : > { %6222 = vmatprep.mubr.msk.f32.mxu1 %vm225_vm1, %v1146_v20  ;;  %606 = vst.msk [vmem:[#allocation2 + $0x60] sm:$0xff] %vm225_vm1, %v484_v19  ;;  %v479_v27 = vadd.f32 %v6848_v48, %v478_v22  ;;  %8507 = vst [vmem:[#allocation9_spill] sm:$0xff] %v6940_v33  ;;  %v8520_v22 = vmov 0 }
  0xe6   : > { %6223 = vmatmul.mubr.msk.f32.gmra.mxu1 %vm225_vm1, %v6918_v23  ;;  %v6183_v28 = vpop.f32.mrf.mxu0  ;;  %v6929_v29 = vld [vmem:[#allocation2 + $0x38] sm:$0xff]  ;;  %v8521_v22 = vsel %vm7028_vm9, 4294967295, %v8520_v22 }
  0xe7   : > { %8506 = vst [vmem:[#allocation8_spill] sm:$0xff] %v6929_v29  ;;  %v6931_v30 = vld [vmem:[#allocation2 + $0x37] sm:$0xff]  ;;  %605 = vst.msk [vmem:[#allocation2 + $0x58] sm:$0xff] %vm225_vm1, %v479_v27  ;;  %v494_v31 = vadd.f32 %v6183_v28, %v6848_v48  ;;  %6275 = vmatprep.mubr.msk.f32.mxu0 %vm225_vm1, %v6929_v29  ;;  %v6945_v36 = vld [vmem:[#allocation2 + $0x3f] sm:$0xff] }
  0xe8   : > { %v1148_v32 = vsel %vm6920_vm5, %v6931_v30, 0.0  ;;  %v488_v34 = vpop.f32.mrf.mxu0  ;;  %6276 = vmatmul.mubr.msk.f32.gmra.mxu0 %vm225_vm1, %v6940_v33  ;;  %v6967_v49 = vld [vmem:[#allocation2 + $0x50] sm:$0xff]  ;;  %v6218_v33 = vpop.f32.mrf.mxu1 }
  0xe9   : > { %6225 = vmatprep.mubr.msk.f32.mxu1 %vm225_vm1, %v1148_v32  ;;  %608 = vst.msk [vmem:[#allocation2 + $0x70] sm:$0xff] %vm225_vm1, %v494_v31  ;;  %v489_v41 = vadd.f32 %v6848_v48, %v488_v34  ;;  %8511 = vst [vmem:[#allocation11_spill] sm:$0xff] %v6967_v49 }
  0xea   : > { %6226 = vmatmul.mubr.msk.f32.gmra.mxu1 %vm225_vm1, %v6945_v36  ;;  %v6186_v42 = vpop.f32.mrf.mxu0  ;;  %v6956_v43 = vld [vmem:[#allocation2 + $0x48] sm:$0xff]  ;;  %1500 = vst.msk [vmem:[#allocation3 + $0x8] sm:$0xff] %vm225_vm1, %v6218_v33  ;;  %v1340_v0 = vpop.f32.mrf.mxu1 }
  0xeb   : > { %8510 = vst [vmem:[#allocation10_spill] sm:$0xff] %v6956_v43  ;;  %v6958_v44 = vld [vmem:[#allocation2 + $0x47] sm:$0xff]  ;;  %607 = vst.msk [vmem:[#allocation2 + $0x68] sm:$0xff] %vm225_vm1, %v489_v41  ;;  %v504_v45 = vadd.f32 %v6186_v42, %v6848_v48  ;;  %6278 = vmatprep.mubr.msk.f32.mxu0 %vm225_vm1, %v6956_v43  ;;  %v6972_v52 = vld [vmem:[#allocation2 + $0x4f] sm:$0xff]  ;;  %v635_v43 = vadd.s32 40, %v6805_v35 }
  0xec   : > { %v1150_v46 = vsel %vm6947_vm6, %v6958_v44, 0.0  ;;  %v498_v51 = vpop.f32.mrf.mxu0  ;;  %6279 = vmatmul.mubr.msk.f32.gmra.mxu0 %vm225_vm1, %v6967_v49  ;;  %v6994_v62 = vld [vmem:[#allocation2 + $0x60] sm:$0xff]  ;;  %1499 = vst.msk [vmem:[#allocation3] sm:$0xff] %vm225_vm1, %v1340_v0  ;;  %v8569_v0 = vmov 0 }
  0xed   : > { %6228 = vmatprep.mubr.msk.f32.mxu1 %vm225_vm1, %v1150_v46  ;;  %610 = vst.msk [vmem:[#allocation2 + $0x80] sm:$0xff] %vm225_vm1, %v504_v45  ;;  %v499_v56 = vadd.f32 %v6848_v48, %v498_v51  ;;  %8515 = vst [vmem:[#allocation13_spill] sm:$0xff] %v6994_v62  ;;  %v8524_v45 = vmov 0  ;;  %v792_v46 = vand.u32 15, %v648_v26  ;;  %v650_v51 = vadd.s32 160, %v6805_v35 }
  0xee   : > { %6229 = vmatmul.mubr.msk.f32.gmra.mxu1 %vm225_vm1, %v6972_v52  ;;  %v6189_v57 = vpop.f32.mrf.mxu0  ;;  %v6983_v58 = vld [vmem:[#allocation2 + $0x58] sm:$0xff]  ;;  %v8525_v45 = vsel %vm7055_vm10, 4294967295, %v8524_v45 }
  0xef   : > { %8514 = vst [vmem:[#allocation12_spill] sm:$0xff] %v6983_v58  ;;  %v6985_v59 = vld [vmem:[#allocation2 + $0x57] sm:$0xff]  ;;  %609 = vst.msk [vmem:[#allocation2 + $0x78] sm:$0xff] %vm225_vm1, %v499_v56  ;;  %v514_v60 = vadd.f32 %v6189_v57, %v6848_v48  ;;  %6281 = vmatprep.mubr.msk.f32.mxu0 %vm225_vm1, %v6983_v58  ;;  %v6999_v1 = vld [vmem:[#allocation2 + $0x5f] sm:$0xff]  ;;  %vm7082_vm11 = vcmp.gt.s32.totalorder %v792_v46, 0  ;;  %v8534_v46 = vmov 0 }
  0xf0   : > { %v1152_v61 = vsel %vm6974_vm7, %v6985_v59, 0.0  ;;  %v508_v63 = vpop.f32.mrf.mxu0  ;;  %6282 = vmatmul.mubr.msk.f32.gmra.mxu0 %vm225_vm1, %v6994_v62  ;;  %v7021_v16 = vld [vmem:[#allocation2 + $0x70] sm:$0xff]  ;;  %8526 = vst [vmem:[#allocation18_spill] sm:$0xff] %v8525_v45  ;;  %v2503_v58 = vsel %vm6816_vm2, %v6877_v6, 0.0  ;;  %v7310_v6 = vld [vmem:[%s8426_s3 + $0x1c] sm:$0xf] }
  0xf1   : > { %6231 = vmatprep.mubr.msk.f32.mxu1 %vm225_vm1, %v1152_v61  ;;  %612 = vst.msk [vmem:[#allocation2 + $0x90] sm:$0xff] %vm225_vm1, %v514_v60  ;;  %v509_v7 = vadd.f32 %v6848_v48, %v508_v63  ;;  %8519 = vst [vmem:[#allocation15_spill] sm:$0xff] %v7021_v16  ;;  %v653_v45 = vadd.s32 184, %v6805_v35 }
  0xf2   : > { %6232 = vmatmul.mubr.msk.f32.gmra.mxu1 %vm225_vm1, %v6999_v1  ;;  %v6192_v8 = vpop.f32.mrf.mxu0  ;;  %v7010_v10 = vld [vmem:[#allocation2 + $0x68] sm:$0xff] }
  0xf3   : > { %8518 = vst [vmem:[#allocation14_spill] sm:$0xff] %v7010_v10  ;;  %v7012_v13 = vld [vmem:[#allocation2 + $0x67] sm:$0xff]  ;;  %611 = vst.msk [vmem:[#allocation2 + $0x88] sm:$0xff] %vm225_vm1, %v509_v7  ;;  %v524_v14 = vadd.f32 %v6192_v8, %v6848_v48  ;;  %6284 = vmatprep.mubr.msk.f32.mxu0 %vm225_vm1, %v7010_v10  ;;  %v7026_v20 = vld [vmem:[#allocation2 + $0x6f] sm:$0xff]  ;;  %v8529_v7 = vmov 0  ;;  %v806_v8 = vand.u32 15, %v650_v51 }
  0xf4   : > { %v1154_v15 = vsel %vm7001_vm8, %v7012_v13, 0.0  ;;  %v518_v19 = vpop.f32.mrf.mxu0  ;;  %6285 = vmatmul.mubr.msk.f32.gmra.mxu0 %vm225_vm1, %v7021_v16  ;;  %v7048_v40 = vld [vmem:[#allocation2 + $0x80] sm:$0xff]  ;;  %v8530_v7 = vsel %vm7082_vm11, 4294967295, %v8529_v7  ;;  %v631_v10 = vadd.s32 8, %v6805_v35  ;;  %v1889_v21 = vld [vmem:[#allocation3] sm:$0xff] }
  0xf5   : > { %6234 = vmatprep.mubr.msk.f32.mxu1 %vm225_vm1, %v1154_v15  ;;  %614 = vst.msk [vmem:[#allocation2 + $0xa0] sm:$0xff] %vm225_vm1, %v524_v14  ;;  %v519_v27 = vadd.f32 %v6848_v48, %v518_v19  ;;  %8523 = vst [vmem:[#allocation17_spill] sm:$0xff] %v7048_v40  ;;  %v652_v14 = vadd.s32 176, %v6805_v35  ;;  %vm7109_vm12 = vcmp.gt.s32.totalorder %v806_v8, 0 }
  0xf6   : > { %6235 = vmatmul.mubr.msk.f32.gmra.mxu1 %vm225_vm1, %v7026_v20  ;;  %v6195_v28 = vpop.f32.mrf.mxu0  ;;  %v7037_v31 = vld [vmem:[#allocation2 + $0x78] sm:$0xff]  ;;  %8531 = vst [vmem:[#allocation21_spill] sm:$0xff] %v8530_v7  ;;  %v8535_v46 = vsel %vm7109_vm12, 4294967295, %v8534_v46  ;;  %v655_v7 = vadd.s32 200, %v6805_v35 }
  0xf7   : > { %8522 = vst [vmem:[#allocation16_spill] sm:$0xff] %v7037_v31  ;;  %v7039_v32 = vld [vmem:[#allocation2 + $0x77] sm:$0xff]  ;;  %613 = vst.msk [vmem:[#allocation2 + $0x98] sm:$0xff] %vm225_vm1, %v519_v27  ;;  %v534_v34 = vadd.f32 %v6195_v28, %v6848_v48  ;;  %6287 = vmatprep.mubr.msk.f32.mxu0 %vm225_vm1, %v7037_v31  ;;  %v7053_v42 = vld [vmem:[#allocation2 + $0x7f] sm:$0xff]  ;;  %v820_v51 = vand.u32 15, %v652_v14 }
  0xf8   : > { %v1156_v38 = vsel %vm7028_vm9, %v7039_v32, 0.0  ;;  %v528_v41 = vpop.f32.mrf.mxu0  ;;  %6288 = vmatmul.mubr.msk.f32.gmra.mxu0 %vm225_vm1, %v7048_v40  ;;  %v7075_v63 = vld [vmem:[#allocation2 + $0x90] sm:$0xff]  ;;  %8536 = vst [vmem:[#allocation24_spill] sm:$0xff] %v8535_v46  ;;  %v657_v46 = vadd.s32 216, %v6805_v35 }
  0xf9   : > { %6237 = vmatprep.mubr.msk.f32.mxu1 %vm225_vm1, %v1156_v38  ;;  %616 = vst.msk [vmem:[#allocation2 + $0xb0] sm:$0xff] %vm225_vm1, %v534_v34  ;;  %v529_v54 = vadd.f32 %v6848_v48, %v528_v41  ;;  %8528 = vst [vmem:[#allocation20_spill] sm:$0xff] %v7075_v63  ;;  %vm7136_vm13 = vcmp.gt.s32.totalorder %v820_v51, 0 }
  0xfa   : > { %6238 = vmatmul.mubr.msk.f32.gmra.mxu1 %vm225_vm1, %v7053_v42  ;;  %v6198_v55 = vpop.f32.mrf.mxu0  ;;  %v7064_v56 = vld [vmem:[#allocation2 + $0x88] sm:$0xff] }
  0xfb   : > { %8527 = vst [vmem:[#allocation19_spill] sm:$0xff] %v7064_v56  ;;  %v7066_v57 = vld [vmem:[#allocation2 + $0x87] sm:$0xff]  ;;  %615 = vst.msk [vmem:[#allocation2 + $0xa8] sm:$0xff] %vm225_vm1, %v529_v54  ;;  %v544_v60 = vadd.f32 %v6198_v55, %v6848_v48  ;;  %6290 = vmatprep.mubr.msk.f32.mxu0 %vm225_vm1, %v7064_v56  ;;  %v7080_v4 = vld [vmem:[#allocation2 + $0x8f] sm:$0xff]  ;;  %v654_v54 = vadd.s32 192, %v6805_v35 }
  0xfc   : > { %v1158_v61 = vsel %vm7055_vm10, %v7066_v57, 0.0  ;;  %v538_v3 = vpop.f32.mrf.mxu0  ;;  %6291 = vmatmul.mubr.msk.f32.gmra.mxu0 %vm225_vm1, %v7075_v63  ;;  %v7102_v34 = vld [vmem:[#allocation2 + $0xa0] sm:$0xff] }
  0xfd   : > { %6240 = vmatprep.mubr.msk.f32.mxu1 %vm225_vm1, %v1158_v61  ;;  %618 = vst.msk [vmem:[#allocation2 + $0xc0] sm:$0xff] %vm225_vm1, %v544_v60  ;;  %v539_v15 = vadd.f32 %v6848_v48, %v538_v3  ;;  %8533 = vst [vmem:[#allocation23_spill] sm:$0xff] %v7102_v34 }
  0xfe   : > { %6241 = vmatmul.mubr.msk.f32.gmra.mxu1 %vm225_vm1, %v7080_v4  ;;  %v6201_v19 = vpop.f32.mrf.mxu0  ;;  %v7091_v25 = vld [vmem:[#allocation2 + $0x98] sm:$0xff] }
  0xff   : > { %8532 = vst [vmem:[#allocation22_spill] sm:$0xff] %v7091_v25  ;;  %v7093_v26 = vld [vmem:[#allocation2 + $0x97] sm:$0xff]  ;;  %617 = vst.msk [vmem:[#allocation2 + $0xb8] sm:$0xff] %vm225_vm1, %v539_v15  ;;  %v554_v27 = vadd.f32 %v6201_v19, %v6848_v48  ;;  %6293 = vmatprep.mubr.msk.f32.mxu0 %vm225_vm1, %v7091_v25  ;;  %v7107_v41 = vld [vmem:[#allocation2 + $0x9f] sm:$0xff] }
 0x100   : > { %v1160_v28 = vsel %vm7082_vm11, %v7093_v26, 0.0  ;;  %v548_v38 = vpop.f32.mrf.mxu0  ;;  %6294 = vmatmul.mubr.msk.f32.gmra.mxu0 %vm225_vm1, %v7102_v34  ;;  %v7129_v15 = vld [vmem:[#allocation2 + $0xb0] sm:$0xff] }
 0x101   : > { %6243 = vmatprep.mubr.msk.f32.mxu1 %vm225_vm1, %v1160_v28  ;;  %620 = vst.msk [vmem:[#allocation2 + $0xd0] sm:$0xff] %vm225_vm1, %v554_v27  ;;  %v549_v55 = vadd.f32 %v6848_v48, %v548_v38  ;;  %8538 = vst [vmem:[#allocation26_spill] sm:$0xff] %v7129_v15  ;;  %v8539_v28 = vmov 0  ;;  %v834_v38 = vand.u32 15, %v654_v54 }
 0x102   : > { %6244 = vmatmul.mubr.msk.f32.gmra.mxu1 %vm225_vm1, %v7107_v41  ;;  %v6204_v60 = vpop.f32.mrf.mxu0  ;;  %v7118_v61 = vld [vmem:[#allocation2 + $0xa8] sm:$0xff]  ;;  %v8540_v28 = vsel %vm7136_vm13, 4294967295, %v8539_v28 }
 0x103   : > { %8537 = vst [vmem:[#allocation25_spill] sm:$0xff] %v7118_v61  ;;  %v7120_v3 = vld [vmem:[#allocation2 + $0xa7] sm:$0xff]  ;;  %619 = vst.msk [vmem:[#allocation2 + $0xc8] sm:$0xff] %vm225_vm1, %v549_v55  ;;  %v564_v8 = vadd.f32 %v6204_v60, %v6848_v48  ;;  %6296 = vmatprep.mubr.msk.f32.mxu0 %vm225_vm1, %v7118_v61  ;;  %v7134_v27 = vld [vmem:[#allocation2 + $0xaf] sm:$0xff]  ;;  %v656_v55 = vadd.s32 208, %v6805_v35  ;;  %vm7163_vm14 = vcmp.gt.s32.totalorder %v834_v38, 0 }
 0x104   : > { %v1162_v14 = vsel %vm7109_vm12, %v7120_v3, 0.0  ;;  %v558_v19 = vpop.f32.mrf.mxu0  ;;  %6297 = vmatmul.mubr.msk.f32.gmra.mxu0 %vm225_vm1, %v7129_v15  ;;  %8541 = vst [vmem:[#allocation27_spill] sm:$0xff] %v8540_v28  ;;  %v659_v28 = vadd.s32 232, %v6805_v35 }
 0x105   : > { %6246 = vmatprep.mubr.msk.f32.mxu1 %vm225_vm1, %v1162_v14  ;;  %622 = vst.msk [vmem:[#allocation2 + $0xe0] sm:$0xff] %vm225_vm1, %v564_v8  ;;  %v559_v60 = vadd.f32 %v6848_v48, %v558_v19  ;;  %v7156_v8 = vld [vmem:[#allocation2 + $0xc0] sm:$0xff] }
 0x106   : > { %6247 = vmatmul.mubr.msk.f32.gmra.mxu1 %vm225_vm1, %v7134_v27  ;;  %v6207_v14 = vpop.f32.mrf.mxu0  ;;  %v7145_v61 = vld [vmem:[#allocation2 + $0xb8] sm:$0xff]  ;;  %8543 = vst [vmem:[#allocation29_spill] sm:$0xff] %v7156_v8 }
 0x107   : > { %8542 = vst [vmem:[#allocation28_spill] sm:$0xff] %v7145_v61  ;;  %v7147_v15 = vld [vmem:[#allocation2 + $0xb7] sm:$0xff]  ;;  %621 = vst.msk [vmem:[#allocation2 + $0xd8] sm:$0xff] %vm225_vm1, %v559_v60  ;;  %v574_v51 = vadd.f32 %v6207_v14, %v6848_v48  ;;  %6299 = vmatprep.mubr.msk.f32.mxu0 %vm225_vm1, %v7145_v61  ;;  %v7161_v34 = vld [vmem:[#allocation2 + $0xbf] sm:$0xff]  ;;  %v8544_v60 = vmov 0  ;;  %v848_v14 = vand.u32 15, %v656_v55 }
 0x108   : > { %v1164_v54 = vsel %vm7136_vm13, %v7147_v15, 0.0  ;;  %v568_v19 = vpop.f32.mrf.mxu0  ;;  %6300 = vmatmul.mubr.msk.f32.gmra.mxu0 %vm225_vm1, %v7156_v8  ;;  %v8545_v60 = vsel %vm7163_vm14, 4294967295, %v8544_v60  ;;  %v658_v61 = vadd.s32 224, %v6805_v35 }
 0x109   : > { %6249 = vmatprep.mubr.msk.f32.mxu1 %vm225_vm1, %v1164_v54  ;;  %8546 = vst [vmem:[#allocation30_spill] sm:$0xff] %v8545_v60  ;;  %624 = vst.msk [vmem:[#allocation2 + $0xf0] sm:$0xff] %vm225_vm1, %v574_v51  ;;  %v569_v25 = vadd.f32 %v6848_v48, %v568_v19  ;;  %v7183_v51 = vld [vmem:[#allocation2 + $0xd0] sm:$0xff]  ;;  %vm7190_vm15 = vcmp.gt.s32.totalorder %v848_v14, 0  ;;  %v661_v60 = vadd.s32 248, %v6805_v35 }
 0x10a   : > { %6250 = vmatmul.mubr.msk.f32.gmra.mxu1 %vm225_vm1, %v7161_v34  ;;  %v6210_v54 = vpop.f32.mrf.mxu0  ;;  %v7172_v63 = vld [vmem:[#allocation2 + $0xc8] sm:$0xff]  ;;  %8548 = vst [vmem:[#allocation32_spill] sm:$0xff] %v7183_v51 }
 0x10b   : > { %8547 = vst [vmem:[#allocation31_spill] sm:$0xff] %v7172_v63  ;;  %v7174_v8 = vld [vmem:[#allocation2 + $0xc7] sm:$0xff]  ;;  %623 = vst.msk [vmem:[#allocation2 + $0xe8] sm:$0xff] %vm225_vm1, %v569_v25  ;;  %v584_v38 = vadd.f32 %v6210_v54, %v6848_v48  ;;  %6302 = vmatprep.mubr.msk.f32.mxu0 %vm225_vm1, %v7172_v63  ;;  %v7188_v56 = vld [vmem:[#allocation2 + $0xcf] sm:$0xff]  ;;  %v8549_v25 = vmov 0  ;;  %v862_v54 = vand.u32 15, %v658_v61 }
 0x10c   : > { %v1166_v55 = vsel %vm7163_vm14, %v7174_v8, 0.0  ;;  %v578_v19 = vpop.f32.mrf.mxu0  ;;  %6303 = vmatmul.mubr.msk.f32.gmra.mxu0 %vm225_vm1, %v7183_v51  ;;  %v8550_v25 = vsel %vm7190_vm15, 4294967295, %v8549_v25  ;;  %v660_v63 = vadd.s32 240, %v6805_v35 }
 0x10d   : > { %6252 = vmatprep.mubr.msk.f32.mxu1 %vm225_vm1, %v1166_v55  ;;  %626 = vst.msk [vmem:[#allocation2 + $0x100] sm:$0xff] %vm225_vm1, %v584_v38  ;;  %v579_v40 = vadd.f32 %v6848_v48, %v578_v19  ;;  %v7210_v38 = vld [vmem:[#allocation2 + $0xe0] sm:$0xff]  ;;  %vm7217_vm0 = vcmp.gt.s32.totalorder %v862_v54, 0 }
 0x10e   : > { %6253 = vmatmul.mubr.msk.f32.gmra.mxu1 %vm225_vm1, %v7188_v56  ;;  %v6213_v55 = vpop.f32.mrf.mxu0  ;;  %v7199_v31 = vld [vmem:[#allocation2 + $0xd8] sm:$0xff]  ;;  %8552 = vst [vmem:[#allocation34_spill] sm:$0xff] %v7210_v38 }
 0x10f   : > { %8551 = vst [vmem:[#allocation33_spill] sm:$0xff] %v7199_v31  ;;  %v7201_v51 = vld [vmem:[#allocation2 + $0xd7] sm:$0xff]  ;;  %625 = vst.msk [vmem:[#allocation2 + $0xf8] sm:$0xff] %vm225_vm1, %v579_v40  ;;  %v594_v14 = vadd.f32 %v6213_v55, %v6848_v48  ;;  %6305 = vmatprep.mubr.msk.f32.mxu0 %vm225_vm1, %v7199_v31  ;;  %v7215_v16 = vld [vmem:[#allocation2 + $0xdf] sm:$0xff]  ;;  %v8553_v40 = vmov 0  ;;  %v876_v55 = vand.u32 15, %v660_v63 }
 0x110   : > { %v1168_v61 = vsel %vm7190_vm15, %v7201_v51, 0.0  ;;  %v588_v19 = vpop.f32.mrf.mxu0  ;;  %6306 = vmatmul.mubr.msk.f32.gmra.mxu0 %vm225_vm1, %v7210_v38  ;;  %v8554_v40 = vsel %vm7217_vm0, 4294967295, %v8553_v40  ;;  %v7236_v54 = vld [vmem:[#allocation2 + $0xf0] sm:$0xff] }
 0x111   : > { %6255 = vmatprep.mubr.msk.f32.mxu1 %vm225_vm1, %v1168_v61  ;;  %628 = vst.msk [vmem:[#allocation2 + $0x110] sm:$0xff] %vm225_vm1, %v594_v14  ;;  %v589_v31 = vadd.f32 %v6848_v48, %v588_v19  ;;  %8556 = vst [vmem:[#allocation36_spill] sm:$0xff] %v7236_v54  ;;  %vm7243_vm15 = vcmp.gt.s32.totalorder %v876_v55, 0  ;;  %v8557_v14 = vmov 0  ;;  %v673_v19 = vand.u32 15, %v631_v10 }
 0x112   : > { %6256 = vmatmul.mubr.msk.f32.gmra.mxu1 %vm225_vm1, %v7215_v16  ;;  %v7226_v61 = vld [vmem:[#allocation2 + $0xe8] sm:$0xff]  ;;  %v8558_v14 = vsel %vm7243_vm15, 4294967295, %v8557_v14 }
 0x113   : > { %8555 = vst [vmem:[#allocation35_spill] sm:$0xff] %v7226_v61  ;;  %v7228_v62 = vld [vmem:[#allocation2 + $0xe7] sm:$0xff]  ;;  %627 = vst.msk [vmem:[#allocation2 + $0x108] sm:$0xff] %vm225_vm1, %v589_v31  ;;  %6308 = vmatprep.mubr.msk.f32.mxu0 %vm225_vm1, %v7226_v61  ;;  %v7241_v48 = vld [vmem:[#allocation2 + $0xef] sm:$0xff]  ;;  %v633_v31 = vadd.s32 24, %v6805_v35 }
 0x114   : > { %v1170_v63 = vsel %vm7217_vm0, %v7228_v62, 0.0  ;;  %6309 = vmatmul.mubr.msk.f32.gmra.mxu0 %vm225_vm1, %v7236_v54  ;;  %v1985_v54 = vld [vmem:[#allocation2 + $0x9] sm:$0xff] }
 0x115   : > { %6258 = vmatprep.mubr.msk.f32.mxu1 %vm225_vm1, %v1170_v63  ;;  %v7259_v63 = vld [vmem:[#allocation2 + $0x100] sm:$0xff]  ;;  %v687_v49 = vand.u32 15, %v633_v31  ;;  %v2505_v31 = vsel %vm6868_vm3, %v6904_v18, 0.0  ;;  %v701_v18 = vand.u32 15, %v635_v43  ;;  %vm8565_vm3 = vcmask 1043456  }
 0x116   : > { %6259 = vmatmul.mubr.msk.f32.gmra.mxu1 %vm225_vm1, %v7241_v48  ;;  %v7250_v61 = vld [vmem:[#allocation2 + $0xf8] sm:$0xff]  ;;  %8560 = vst [vmem:[#allocation38_spill] sm:$0xff] %v7259_v63  ;;  %vm8567_vm0 = vmmov %vm8565_vm3 }
 0x117   : > { %8559 = vst [vmem:[#allocation37_spill] sm:$0xff] %v7250_v61  ;;  %v7252_v38 = vld [vmem:[#allocation2 + $0xf7] sm:$0xff]  ;;  %6311 = vmatprep.mubr.msk.f32.mxu0 %vm225_vm1, %v7250_v61  ;;  %v7264_v10 = vld [vmem:[#allocation2 + $0xff] sm:$0xff]  ;;  %v8561_v61 = vmov 0  ;;  %vm7290_vm2 = vcmp.lt.s32.totalorder %v687_v49, 15  ;;  %v637_v49 = vadd.s32 56, %v6805_v35 }
 0x118   : > { %v1172_v55 = vsel %vm7243_vm15, %v7252_v38, 0.0  ;;  %6312 = vmatmul.mubr.msk.f32.gmra.mxu0 %vm225_vm1, %v7259_v63  ;;  %vm7272_vm15 = vcmp.lt.s32.totalorder %v673_v19, 15 }
 0x119   : > { %6261 = vmatprep.mubr.msk.f32.mxu1 %vm225_vm1, %v1172_v55  ;;  %6366 = vmatprep.mubr.msk.f32.mxu0 %vm225_vm1, %v2503_v58  ;;  %v8562_v61 = vsel %vm7272_vm15, 4294967295, %v8561_v61  ;;  %v1986_v55 = vld [vmem:[#allocation2 + $0x11] sm:$0xff]  ;;  %v715_v43 = vand.u32 15, %v637_v49  ;;  %v7354_v49 = vld [vmem:[#allocation2 + $0x39] sm:$0xff] }
 0x11a   : > { %6262 = vmatmul.mubr.msk.f32.gmra.mxu1 %vm225_vm1, %v7264_v10  ;;  %v7278_v63 = vld [vmem:[#allocation2 + $0x107] sm:$0xff]  ;;  %v2018_v58 = vsel %vm7272_vm15, %v1986_v55, 0.0  ;;  %vm8566_vm15 = vmmov %vm8565_vm3 }
 0x11b   : > { %6316 = vmatprep.mubr.msk.f32.mxu1 %vm225_vm1, %v1985_v54  ;;  %v7297_v54 = vld [vmem:[%s8426_s3 + $0x18] sm:$0xf]  ;;  %v7304_v55 = vld [vmem:[#allocation2 + $0x21] sm:$0xff] }
 0x11c   : > { %6367 = vmatmul.mubr.msk.f32.vlgmr.msra.gmra.mxu0 %vm225_vm1, %v6891_v11  ;;  %v7302_v11 = vld [vmem:[#allocation2 + $0x19] sm:$0xff]  ;;  %v2020_v33 = vsel %vm7290_vm2, %v7304_v55, 0.0 }
 0x11d   : > { %6369 = vmatprep.mubr.msk.f32.mxu0 %vm225_vm1, %v2505_v31  ;;  %6465 = vmatpush3.msk.msra.mxu0 %vm8566_vm15, %v6853_v50  ;;  %v7333_v50 = vld [vmem:[#allocation2 + $0x29] sm:$0xff]  ;;  %v6268_v31 = vpop.f32.mrf.mxu0  ;;  %vm7356_vm15 = vcmp.lt.s32.totalorder %v715_v43, 15 }
 0x11e   : > { %6317 = vmatmul.mubr.msk.f32.vlgmr.msra.gmra.mxu1 %vm225_vm1, %v2018_v58  ;;  %v639_v58 = vadd.s32 72, %v6805_v35 }
 0x11f   : > { %6415 = vmatpush3.msk.msra.mxu1 %vm8565_vm3, %v6841_v47  ;;  %6319 = vmatprep.mubr.msk.f32.mxu1 %vm225_vm1, %v7302_v11  ;;  %v2507_v47 = vsel %vm6893_vm4, %v6931_v30, 0.0  ;;  %vm8568_vm3 = vmmov %vm8567_vm0  ;;  %v1890_v30 = vld [vmem:[#allocation3 + $0x8] sm:$0xff]  ;;  %v1730_v29 = vpop.f32.mrf.mxu0 }
 0x120   : > { %6514 = vmatprep.subr.msk.mxu1 %vm8567_vm0, %v7297_v54  ;;  %6370 = vmatmul.mubr.msk.f32.gmra.mxu0 %vm225_vm1, %v6918_v23  ;;  %vm7335_vm0 = vcmp.lt.s32.totalorder %v701_v18, 15  ;;  %v7339_v23 = vld [vmem:[#allocation2 + $0x31] sm:$0xff]  ;;  %v729_v39 = vand.u32 15, %v639_v58  ;;  %v2511_v58 = vsel %vm6947_vm6, %v6985_v59, 0.0 }
 0x121   : > { %6564 = vmatprep.subr.msk.mxu0 %vm8568_vm3, %v7310_v6  ;;  %6372 = vmatprep.mubr.msk.f32.mxu0 %vm225_vm1, %v2507_v47  ;;  %v8570_v0 = vsel %vm7335_vm0, 4294967295, %v8569_v0  ;;  %v2022_v18 = vsel %vm7335_vm0, %v7339_v23, 0.0  ;;  %v1922_v47 = vadd.f32 %v6268_v31, %v1890_v30  ;;  %v7377_v31 = vld [vmem:[#allocation2 + $0x49] sm:$0xff]  ;;  %v643_v30 = vadd.s32 104, %v6805_v35 }
 0x122   : > { %6320 = vmatmul.mubr.msk.f32.gmra.mxu1 %vm225_vm1, %v2020_v33  ;;  %8571 = vst [vmem:[#allocation39_spill] sm:$0xff] %v8570_v0  ;;  %v2509_v33 = vsel %vm6920_vm5, %v6958_v44, 0.0  ;;  %v641_v0 = vadd.s32 88, %v6805_v35  ;;  %v1921_v44 = vadd.f32 %v1889_v21, %v1730_v29  ;;  %vm7379_vm3 = vcmp.lt.s32.totalorder %v729_v39, 15  ;;  %v7383_v29 = vld [vmem:[#allocation2 + $0x51] sm:$0xff] }
 0x123   : > { %6322 = vmatprep.mubr.msk.f32.mxu1 %vm225_vm1, %v7333_v50  ;;  %1954 = vst.msk [vmem:[#allocation3 + $0x8] sm:$0xff] %vm225_vm1, %v1922_v47  ;;  %v2026_v59 = vsel %vm7379_vm3, %v7383_v29, 0.0  ;;  %v2513_v39 = vsel %vm6974_vm7, %v7012_v13, 0.0  ;;  %v645_v47 = vadd.s32 120, %v6805_v35 }
 0x124   : > { %6373 = vmatmul.mubr.msk.f32.gmra.mxu0 %vm225_vm1, %v6945_v36  ;;  %v7360_v36 = vld [vmem:[#allocation2 + $0x41] sm:$0xff]  ;;  %1953 = vst.msk [vmem:[#allocation3] sm:$0xff] %vm225_vm1, %v1921_v44  ;;  %v2515_v44 = vsel %vm7001_vm8, %v7039_v32, 0.0 }
 0x125   : > { %6375 = vmatprep.mubr.msk.f32.mxu0 %vm225_vm1, %v2509_v33  ;;  %v2024_v43 = vsel %vm7356_vm15, %v7360_v36, 0.0  ;;  %v7404_v33 = vld [vmem:[#allocation2 + $0x61] sm:$0xff] }
 0x126   : > { %6323 = vmatmul.mubr.msk.f32.gmra.mxu1 %vm225_vm1, %v2022_v18 }
 0x127   : > { %6325 = vmatprep.mubr.msk.f32.mxu1 %vm225_vm1, %v7354_v49 }
 0x128   : > { %6376 = vmatmul.mubr.msk.f32.gmra.mxu0 %vm225_vm1, %v6972_v52  ;;  %v743_v52 = vand.u32 15, %v641_v0  ;;  %v7398_v0 = vld [vmem:[#allocation2 + $0x59] sm:$0xff] }
 0x129   : > { %6378 = vmatprep.mubr.msk.f32.mxu0 %vm225_vm1, %v2511_v58 }
 0x12a   : > { %6326 = vmatmul.mubr.msk.f32.gmra.mxu1 %vm225_vm1, %v2024_v43  ;;  %vm7400_vm6 = vcmp.lt.s32.totalorder %v743_v52, 15  ;;  %v7419_v43 = vld [vmem:[#allocation2 + $0x69] sm:$0xff]  ;;  %v7425_v52 = vld [vmem:[#allocation2 + $0x71] sm:$0xff] }
 0x12b   : > { %6328 = vmatprep.mubr.msk.f32.mxu1 %vm225_vm1, %v7377_v31  ;;  %v2028_v13 = vsel %vm7400_vm6, %v7404_v33, 0.0 }
 0x12c   : > { %6379 = vmatmul.mubr.msk.f32.gmra.mxu0 %vm225_vm1, %v6999_v1  ;;  %v757_v1 = vand.u32 15, %v643_v30  ;;  %v647_v30 = vadd.s32 136, %v6805_v35 }
 0x12d   : > { %6381 = vmatprep.mubr.msk.f32.mxu0 %vm225_vm1, %v2513_v39  ;;  %v7440_v39 = vld [vmem:[#allocation2 + $0x79] sm:$0xff] }
 0x12e   : > { %6329 = vmatmul.mubr.msk.f32.gmra.mxu1 %vm225_vm1, %v2026_v59  ;;  %vm7421_vm7 = vcmp.lt.s32.totalorder %v757_v1, 15  ;;  %v2517_v59 = vsel %vm7028_vm9, %v7066_v57, 0.0 }
 0x12f   : > { %6331 = vmatprep.mubr.msk.f32.mxu1 %vm225_vm1, %v7398_v0  ;;  %v2030_v32 = vsel %vm7421_vm7, %v7425_v52, 0.0 }
 0x130   : > { %6382 = vmatmul.mubr.msk.f32.gmra.mxu0 %vm225_vm1, %v7026_v20  ;;  %v771_v20 = vand.u32 15, %v645_v47  ;;  %v7446_v47 = vld [vmem:[#allocation2 + $0x81] sm:$0xff] }
 0x131   : > { %6384 = vmatprep.mubr.msk.f32.mxu0 %vm225_vm1, %v2515_v44  ;;  %v2519_v44 = vsel %vm7055_vm10, %v7093_v26, 0.0 }
 0x132   : > { %6332 = vmatmul.mubr.msk.f32.gmra.mxu1 %vm225_vm1, %v2028_v13  ;;  %vm7442_vm8 = vcmp.lt.s32.totalorder %v771_v20, 15  ;;  %v649_v13 = vadd.s32 152, %v6805_v35  ;;  %v7461_v20 = vld [vmem:[#allocation2 + $0x89] sm:$0xff] }
 0x133   : > { %6334 = vmatprep.mubr.msk.f32.mxu1 %vm225_vm1, %v7419_v43  ;;  %v2032_v57 = vsel %vm7442_vm8, %v7446_v47, 0.0 }
 0x134   : > { %6385 = vmatmul.mubr.msk.f32.gmra.mxu0 %vm225_vm1, %v7053_v42  ;;  %v785_v42 = vand.u32 15, %v647_v30 }
 0x135   : > { %6387 = vmatprep.mubr.msk.f32.mxu0 %vm225_vm1, %v2517_v59  ;;  %v651_v59 = vadd.s32 168, %v6805_v35  ;;  %v8596_v35 = vmov 0 }
 0x136   : > { %6335 = vmatmul.mubr.msk.f32.gmra.mxu1 %vm225_vm1, %v2030_v32  ;;  %vm7463_vm9 = vcmp.lt.s32.totalorder %v785_v42, 15  ;;  %v7467_v32 = vld [vmem:[#allocation2 + $0x91] sm:$0xff]  ;;  %v2521_v42 = vsel %vm7082_vm11, %v7120_v3, 0.0 }
 0x137   : > { %6337 = vmatprep.mubr.msk.f32.mxu1 %vm225_vm1, %v7440_v39  ;;  %v2034_v26 = vsel %vm7463_vm9, %v7467_v32, 0.0 }
 0x138   : > { %6388 = vmatmul.mubr.msk.f32.gmra.mxu0 %vm225_vm1, %v7080_v4  ;;  %v799_v4 = vand.u32 15, %v649_v13  ;;  %v7482_v13 = vld [vmem:[#allocation2 + $0x99] sm:$0xff] }
 0x139   : > { %6390 = vmatprep.mubr.msk.f32.mxu0 %vm225_vm1, %v2519_v44  ;;  %v7488_v44 = vld [vmem:[#allocation2 + $0xa1] sm:$0xff] }
 0x13a   : > { %6338 = vmatmul.mubr.msk.f32.gmra.mxu1 %vm225_vm1, %v2032_v57  ;;  %vm7484_vm10 = vcmp.lt.s32.totalorder %v799_v4, 15  ;;  %v2523_v4 = vsel %vm7109_vm12, %v7147_v15, 0.0 }
 0x13b   : > { %6340 = vmatprep.mubr.msk.f32.mxu1 %vm225_vm1, %v7461_v20  ;;  %v2036_v3 = vsel %vm7484_vm10, %v7488_v44, 0.0 }
 0x13c   : > { %6391 = vmatmul.mubr.msk.f32.gmra.mxu0 %vm225_vm1, %v7107_v41  ;;  %v813_v41 = vand.u32 15, %v651_v59  ;;  %v7503_v59 = vld [vmem:[#allocation2 + $0xa9] sm:$0xff] }
 0x13d   : > { %6393 = vmatprep.mubr.msk.f32.mxu0 %vm225_vm1, %v2521_v42  ;;  %v7509_v42 = vld [vmem:[#allocation2 + $0xb1] sm:$0xff] }
 0x13e   : > { %6341 = vmatmul.mubr.msk.f32.gmra.mxu1 %vm225_vm1, %v2034_v26  ;;  %vm7505_vm11 = vcmp.lt.s32.totalorder %v813_v41, 15  ;;  %v2525_v41 = vsel %vm7136_vm13, %v7174_v8, 0.0 }
 0x13f   : > { %6343 = vmatprep.mubr.msk.f32.mxu1 %vm225_vm1, %v7482_v13  ;;  %v2038_v15 = vsel %vm7505_vm11, %v7509_v42, 0.0 }
 0x140   : > { %6394 = vmatmul.mubr.msk.f32.gmra.mxu0 %vm225_vm1, %v7134_v27  ;;  %v827_v27 = vand.u32 15, %v653_v45  ;;  %v7524_v45 = vld [vmem:[#allocation2 + $0xb9] sm:$0xff] }
 0x141   : > { %6396 = vmatprep.mubr.msk.f32.mxu0 %vm225_vm1, %v2523_v4  ;;  %v7530_v4 = vld [vmem:[#allocation2 + $0xc1] sm:$0xff] }
 0x142   : > { %6344 = vmatmul.mubr.msk.f32.gmra.mxu1 %vm225_vm1, %v2036_v3  ;;  %vm7526_vm12 = vcmp.lt.s32.totalorder %v827_v27, 15  ;;  %v2527_v27 = vsel %vm7163_vm14, %v7201_v51, 0.0  ;;  %vm8592_vm14 = vnez %v8550_v25 }
 0x143   : > { %6346 = vmatprep.mubr.msk.f32.mxu1 %vm225_vm1, %v7503_v59  ;;  %v2040_v8 = vsel %vm7526_vm12, %v7530_v4, 0.0 }
 0x144   : > { %6397 = vmatmul.mubr.msk.f32.gmra.mxu0 %vm225_vm1, %v7161_v34  ;;  %v841_v34 = vand.u32 15, %v655_v7  ;;  %v7545_v7 = vld [vmem:[#allocation2 + $0xc9] sm:$0xff] }
 0x145   : > { %6399 = vmatprep.mubr.msk.f32.mxu0 %vm225_vm1, %v2525_v41  ;;  %v7551_v41 = vld [vmem:[#allocation2 + $0xd1] sm:$0xff] }
 0x146   : > { %6347 = vmatmul.mubr.msk.f32.gmra.mxu1 %vm225_vm1, %v2038_v15  ;;  %vm7547_vm13 = vcmp.lt.s32.totalorder %v841_v34, 15  ;;  %v2529_v34 = vsel %vm8592_vm14, %v7228_v62, 0.0  ;;  %vm8595_vm14 = vnez %v8554_v40 }
 0x147   : > { %6349 = vmatprep.mubr.msk.f32.mxu1 %vm225_vm1, %v7524_v45  ;;  %v2042_v51 = vsel %vm7547_vm13, %v7551_v41, 0.0 }
 0x148   : > { %6400 = vmatmul.mubr.msk.f32.gmra.mxu0 %vm225_vm1, %v7188_v56  ;;  %v855_v56 = vand.u32 15, %v657_v46  ;;  %v7566_v46 = vld [vmem:[#allocation2 + $0xd9] sm:$0xff] }
 0x149   : > { %6402 = vmatprep.mubr.msk.f32.mxu0 %vm225_vm1, %v2527_v27  ;;  %v7572_v27 = vld [vmem:[#allocation2 + $0xe1] sm:$0xff] }
 0x14a   : > { %6350 = vmatmul.mubr.msk.f32.gmra.mxu1 %vm225_vm1, %v2040_v8  ;;  %vm7568_vm5 = vcmp.lt.s32.totalorder %v855_v56, 15  ;;  %v8593_v8 = vmov 0  ;;  %v2531_v56 = vsel %vm8595_vm14, %v7252_v38, 0.0  ;;  %vm8598_vm14 = vnez %v8558_v14 }
 0x14b   : > { %6352 = vmatprep.mubr.msk.f32.mxu1 %vm225_vm1, %v7545_v7  ;;  %v8594_v8 = vsel %vm7568_vm5, 4294967295, %v8593_v8  ;;  %v2044_v62 = vsel %vm7568_vm5, %v7572_v27, 0.0 }
 0x14c   : > { %6403 = vmatmul.mubr.msk.f32.gmra.mxu0 %vm225_vm1, %v7215_v16  ;;  %v869_v16 = vand.u32 15, %v659_v28  ;;  %v7587_v28 = vld [vmem:[#allocation2 + $0xe9] sm:$0xff] }
 0x14d   : > { %6405 = vmatprep.mubr.msk.f32.mxu0 %vm225_vm1, %v2529_v34  ;;  %v2533_v34 = vsel %vm8598_vm14, %v7278_v63, 0.0  ;;  %vm8601_vm14 = vnez %v8562_v61 }
 0x14e   : > { %6353 = vmatmul.mubr.msk.f32.gmra.mxu1 %vm225_vm1, %v2042_v51  ;;  %vm7589_vm4 = vcmp.lt.s32.totalorder %v869_v16, 15  ;;  %v7593_v51 = vld [vmem:[#allocation2 + $0xf1] sm:$0xff]  ;;  %v7607_v16 = vld [vmem:[#allocation2 + $0xf9] sm:$0xff] }
 0x14f   : > { %6355 = vmatprep.mubr.msk.f32.mxu1 %vm225_vm1, %v7566_v46  ;;  %v8597_v35 = vsel %vm7589_vm4, 4294967295, %v8596_v35  ;;  %v2046_v38 = vsel %vm7589_vm4, %v7593_v51, 0.0 }
 0x150   : > { %6406 = vmatmul.mubr.msk.f32.gmra.mxu0 %vm225_vm1, %v7241_v48  ;;  %v883_v48 = vand.u32 15, %v661_v60  ;;  %v8599_v60 = vmov 0 }
 0x151   : > { %6408 = vmatprep.mubr.msk.f32.mxu0 %vm225_vm1, %v2531_v56 }
 0x152   : > { %6356 = vmatmul.mubr.msk.f32.gmra.mxu1 %vm225_vm1, %v2044_v62  ;;  %vm7609_vm5 = vcmp.lt.s32.totalorder %v883_v48, 15  ;;  %v7613_v62 = vld [vmem:[#allocation2 + $0x101] sm:$0xff]  ;;  %v3444_v48 = vsel %vm8601_vm14, %v7304_v55, 0.0 }
 0x153   : > { %6358 = vmatprep.mubr.msk.f32.mxu1 %vm225_vm1, %v7587_v28  ;;  %v8600_v60 = vsel %vm7609_vm5, 4294967295, %v8599_v60  ;;  %v2048_v56 = vsel %vm7609_vm5, %v7613_v62, 0.0  ;;  %vm8602_vm5 = vcmask 1043456   ;;  %v8609_v55 = vld [vmem:[#allocation10_spill] sm:$0xff] }
 0x154   : > { %6409 = vmatmul.mubr.msk.f32.gmra.mxu0 %vm225_vm1, %v7264_v10  ;;  %v7617_v10 = vld [vmem:[#allocation2 + $0x10f] sm:$0xff]  ;;  %vm8603_vm14 = vmmov %vm8602_vm5 }
 0x155   : > { %6411 = vmatprep.mubr.msk.f32.mxu0 %vm225_vm1, %v2533_v34  ;;  %vm8604_vm4 = vmmov %vm8602_vm5  ;;  %v8614_v34 = vld [vmem:[#allocation15_spill] sm:$0xff] }
 0x156   : > { %6359 = vmatmul.mubr.msk.f32.gmra.mxu1 %vm225_vm1, %v2046_v38  ;;  %v7636_v38 = vld [vmem:[%s8426_s3 + $0x20] sm:$0xf] }
 0x157   : > { %6361 = vmatprep.mubr.msk.f32.mxu1 %vm225_vm1, %v7607_v16 }
 0x158   : > { %6412 = vmatmul.mubr.msk.f32.gmra.mxu0 %vm225_vm1, %v7617_v10 }
 0x159   : > { %6466 = vmatprep.mubr.msk.f32.mxu0 %vm225_vm1, %v7302_v11  ;;  %v3448_v11 = vsel %vm7335_vm0, %v7360_v36, 0.0  ;;  %v3452_v36 = vsel %vm7379_vm3, %v7404_v33, 0.0  ;;  %v8615_v33 = vld [vmem:[#allocation16_spill] sm:$0xff] }
 0x15a   : > { %6362 = vmatmul.mubr.msk.f32.gmra.mxu1 %vm225_vm1, %v2048_v56  ;;  %v8616_v56 = vld [vmem:[#allocation17_spill] sm:$0xff] }
 0x15b   : > { %6416 = vmatprep.mubr.msk.f32.mxu1 %vm225_vm1, %v6875_v5  ;;  %v3446_v5 = vsel %vm7290_vm2, %v7339_v23, 0.0  ;;  %v8610_v23 = vld [vmem:[#allocation11_spill] sm:$0xff] }
 0x15c   : > { %6467 = vmatmul.mubr.msk.f32.vlgmr.msra.gmra.mxu0 %vm225_vm1, %v3444_v48  ;;  %v8618_v48 = vld [vmem:[#allocation20_spill] sm:$0xff] }
 0x15d   : > { %6469 = vmatprep.mubr.msk.f32.mxu0 %vm225_vm1, %v7333_v50  ;;  %6565 = vmatpush3.msk.msra.mxu0 %vm8603_vm14, %v7310_v6  ;;  %v8608_v6 = vld [vmem:[#allocation9_spill] sm:$0xff]  ;;  %v3450_v50 = vsel %vm7356_vm15, %v7383_v29, 0.0  ;;  %v8613_v29 = vld [vmem:[#allocation14_spill] sm:$0xff]  ;;  %vm8635_vm14 = vnez %v8600_v60 }
 0x15e   : > { %6417 = vmatmul.mubr.msk.f32.vlgmr.msra.gmra.mxu1 %vm225_vm1, %v6886_v9  ;;  %v8605_v9 = vld [vmem:[#allocation7_spill] sm:$0xff] }
 0x15f   : > { %6515 = vmatpush3.msk.msra.mxu1 %vm8602_vm5, %v7297_v54  ;;  %6419 = vmatprep.mubr.msk.f32.mxu1 %vm225_vm1, %v6902_v17  ;;  %v8606_v54 = vld [vmem:[#allocation8_spill] sm:$0xff]  ;;  %vm8633_vm5 = vnez %v8597_v35 }
 0x160   : > { %6614 = vmatprep.subr.msk.mxu1 %vm8604_vm4, %v7636_v38  ;;  %6470 = vmatmul.mubr.msk.f32.gmra.mxu0 %vm225_vm1, %v3446_v5  ;;  %v8620_v5 = vld [vmem:[#allocation23_spill] sm:$0xff]  ;;  %vm8630_vm4 = vnez %v8594_v8 }
 0x161   : > { %6472 = vmatprep.mubr.msk.f32.mxu0 %vm225_vm1, %v7354_v49  ;;  %v8611_v49 = vld [vmem:[#allocation12_spill] sm:$0xff] }
 0x162   : > { %6420 = vmatmul.mubr.msk.f32.gmra.mxu1 %vm225_vm1, %v8605_v9  ;;  %v8622_v9 = vld [vmem:[#allocation26_spill] sm:$0xff] }
 0x163   : > { %6422 = vmatprep.mubr.msk.f32.mxu1 %vm225_vm1, %v8606_v54  ;;  %v8624_v54 = vld [vmem:[#allocation29_spill] sm:$0xff] }
 0x164   : > { %6473 = vmatmul.mubr.msk.f32.gmra.mxu0 %vm225_vm1, %v3448_v11  ;;  %v8626_v11 = vld [vmem:[#allocation32_spill] sm:$0xff] }
 0x165   : > { %6475 = vmatprep.mubr.msk.f32.mxu0 %vm225_vm1, %v7377_v31  ;;  %v8612_v31 = vld [vmem:[#allocation13_spill] sm:$0xff] }
 0x166   : > { %6423 = vmatmul.mubr.msk.f32.gmra.mxu1 %vm225_vm1, %v8608_v6  ;;  %v8628_v6 = vld [vmem:[#allocation34_spill] sm:$0xff] }
 0x167   : > { %6425 = vmatprep.mubr.msk.f32.mxu1 %vm225_vm1, %v8609_v55  ;;  %v8631_v55 = vld [vmem:[#allocation36_spill] sm:$0xff] }
 0x168   : > { %6476 = vmatmul.mubr.msk.f32.gmra.mxu0 %vm225_vm1, %v3450_v50  ;;  %v3441_v50 = vld [vmem:[#allocation2 + $0x109] sm:$0xff] }
 0x169   : > { %6478 = vmatprep.mubr.msk.f32.mxu0 %vm225_vm1, %v7398_v0  ;;  %v3454_v0 = vsel %vm7400_vm6, %v7425_v52, 0.0  ;;  %v8617_v52 = vld [vmem:[#allocation19_spill] sm:$0xff] }
 0x16a   : > { %6426 = vmatmul.mubr.msk.f32.gmra.mxu1 %vm225_vm1, %v8610_v23  ;;  %v3442_v23 = vld [vmem:[#allocation2 + $0x111] sm:$0xff] }
 0x16b   : > { %6428 = vmatprep.mubr.msk.f32.mxu1 %vm225_vm1, %v8611_v49  ;;  %v7787_v49 = vld [vmem:[#allocation2 + $0x108] sm:$0xff] }
 0x16c   : > { %6479 = vmatmul.mubr.msk.f32.gmra.mxu0 %vm225_vm1, %v3452_v36  ;;  %v3474_v36 = vsel %vm8635_vm14, %v3442_v23, 0.0  ;;  %v4391_v23 = vld [vmem:[#allocation2 + $0x68] sm:$0xff] }
 0x16d   : > { %6481 = vmatprep.mubr.msk.f32.mxu0 %vm225_vm1, %v7419_v43  ;;  %v3456_v43 = vsel %vm7421_vm7, %v7446_v47, 0.0  ;;  %v8619_v47 = vld [vmem:[#allocation22_spill] sm:$0xff] }
 0x16e   : > { %6429 = vmatmul.mubr.msk.f32.gmra.mxu1 %vm225_vm1, %v8612_v31  ;;  %v4383_v31 = vld [vmem:[#allocation2 + $0x28] sm:$0xff] }
 0x16f   : > { %6431 = vmatprep.mubr.msk.f32.mxu1 %vm225_vm1, %v8613_v29  ;;  %v8636_v29 = vld [vmem:[#allocation4_spill] sm:$0xff] }
 0x170   : > { %6482 = vmatmul.mubr.msk.f32.gmra.mxu0 %vm225_vm1, %v3454_v0 }
 0x171   : > { %6484 = vmatprep.mubr.msk.f32.mxu0 %vm225_vm1, %v7440_v39  ;;  %v3458_v39 = vsel %vm7442_vm8, %v7467_v32, 0.0  ;;  %v8621_v32 = vld [vmem:[#allocation25_spill] sm:$0xff] }
 0x172   : > { %6432 = vmatmul.mubr.msk.f32.gmra.mxu1 %vm225_vm1, %v8614_v34  ;;  %v3899_v34 = vld [vmem:[#allocation2 + $0x37] sm:$0xff] }
 0x173   : > { %6434 = vmatprep.mubr.msk.f32.mxu1 %vm225_vm1, %v8615_v33  ;;  %v4384_v33 = vld [vmem:[#allocation2 + $0x30] sm:$0xff] }
 0x174   : > { %6485 = vmatmul.mubr.msk.f32.gmra.mxu0 %vm225_vm1, %v3456_v43  ;;  %v3898_v43 = vld [vmem:[#allocation2 + $0x2f] sm:$0xff] }
 0x175   : > { %6487 = vmatprep.mubr.msk.f32.mxu0 %vm225_vm1, %v7461_v20  ;;  %v3460_v20 = vsel %vm7463_vm9, %v7488_v44, 0.0  ;;  %v8623_v44 = vld [vmem:[#allocation28_spill] sm:$0xff] }
 0x176   : > { %6435 = vmatmul.mubr.msk.f32.gmra.mxu1 %vm225_vm1, %v8616_v56  ;;  %v4385_v56 = vld [vmem:[#allocation2 + $0x38] sm:$0xff] }
 0x177   : > { %6437 = vmatprep.mubr.msk.f32.mxu1 %vm225_vm1, %v8617_v52  ;;  %v8638_v52 = vld [vmem:[#allocation5_spill] sm:$0xff] }
 0x178   : > { %6488 = vmatmul.mubr.msk.f32.gmra.mxu0 %vm225_vm1, %v3458_v39  ;;  %vm8639_vm14 = vnez %v8638_v52  ;;  %v4393_v52 = vld [vmem:[#allocation2 + $0x78] sm:$0xff] }
 0x179   : > { %6490 = vmatprep.mubr.msk.f32.mxu0 %vm225_vm1, %v7482_v13  ;;  %v3462_v13 = vsel %vm7484_vm10, %v7509_v42, 0.0  ;;  %v8625_v42 = vld [vmem:[#allocation31_spill] sm:$0xff]  ;;  %v3931_v39 = vsel %vm8639_vm14, %v3899_v34, 0.0  ;;  %vm8644_vm14 = vnez %v8509_v37 }
 0x17a   : > { %6438 = vmatmul.mubr.msk.f32.gmra.mxu1 %vm225_vm1, %v8618_v48  ;;  %v3901_v48 = vld [vmem:[#allocation2 + $0x47] sm:$0xff]  ;;  %v3906_v37 = vld [vmem:[#allocation2 + $0x6f] sm:$0xff] }
 0x17b   : > { %6440 = vmatprep.mubr.msk.f32.mxu1 %vm225_vm1, %v8619_v47  ;;  %v4386_v47 = vld [vmem:[#allocation2 + $0x40] sm:$0xff] }
 0x17c   : > { %6491 = vmatmul.mubr.msk.f32.gmra.mxu0 %vm225_vm1, %v3460_v20 }
 0x17d   : > { %6493 = vmatprep.mubr.msk.f32.mxu0 %vm225_vm1, %v7503_v59  ;;  %v3464_v59 = vsel %vm7505_vm11, %v7530_v4, 0.0  ;;  %v8627_v4 = vld [vmem:[#allocation33_spill] sm:$0xff] }
 0x17e   : > { %6441 = vmatmul.mubr.msk.f32.gmra.mxu1 %vm225_vm1, %v8620_v5  ;;  %v3900_v5 = vld [vmem:[#allocation2 + $0x3f] sm:$0xff] }
 0x17f   : > { %6443 = vmatprep.mubr.msk.f32.mxu1 %vm225_vm1, %v8621_v32  ;;  %v4387_v32 = vld [vmem:[#allocation2 + $0x48] sm:$0xff] }
 0x180   : > { %6494 = vmatmul.mubr.msk.f32.gmra.mxu0 %vm225_vm1, %v3462_v13 }
 0x181   : > { %6496 = vmatprep.mubr.msk.f32.mxu0 %vm225_vm1, %v7524_v45  ;;  %v3466_v45 = vsel %vm7526_vm12, %v7551_v41, 0.0  ;;  %v8629_v41 = vld [vmem:[#allocation35_spill] sm:$0xff] }
 0x182   : > { %6444 = vmatmul.mubr.msk.f32.gmra.mxu1 %vm225_vm1, %v8622_v9  ;;  %v8641_v9 = vld [vmem:[#allocation6_spill] sm:$0xff] }
 0x183   : > { %6446 = vmatprep.mubr.msk.f32.mxu1 %vm225_vm1, %v8623_v44 }
 0x184   : > { %6497 = vmatmul.mubr.msk.f32.gmra.mxu0 %vm225_vm1, %v3464_v59  ;;  %v3903_v59 = vld [vmem:[#allocation2 + $0x57] sm:$0xff] }
 0x185   : > { %6499 = vmatprep.mubr.msk.f32.mxu0 %vm225_vm1, %v7545_v7  ;;  %v3468_v7 = vsel %vm7547_vm13, %v7572_v27, 0.0  ;;  %v8632_v27 = vld [vmem:[#allocation37_spill] sm:$0xff] }
 0x186   : > { %6447 = vmatmul.mubr.msk.f32.gmra.mxu1 %vm225_vm1, %v8624_v54 }
 0x187   : > { %6449 = vmatprep.mubr.msk.f32.mxu1 %vm225_vm1, %v8625_v42  ;;  %v4388_v42 = vld [vmem:[#allocation2 + $0x50] sm:$0xff] }
 0x188   : > { %6500 = vmatmul.mubr.msk.f32.gmra.mxu0 %vm225_vm1, %v3466_v45 }
 0x189   : > { %6502 = vmatprep.mubr.msk.f32.mxu0 %vm225_vm1, %v7566_v46  ;;  %v3470_v46 = vsel %vm8630_vm4, %v7593_v51, 0.0  ;;  %v8634_v51 = vld [vmem:[#allocation38_spill] sm:$0xff]  ;;  %vm8640_vm4 = vcmask 1043456  }
 0x18a   : > { %6450 = vmatmul.mubr.msk.f32.gmra.mxu1 %vm225_vm1, %v8626_v11  ;;  %v3902_v11 = vld [vmem:[#allocation2 + $0x4f] sm:$0xff] }
 0x18b   : > { %6452 = vmatprep.mubr.msk.f32.mxu1 %vm225_vm1, %v8627_v4  ;;  %v4389_v4 = vld [vmem:[#allocation2 + $0x58] sm:$0xff] }
 0x18c   : > { %6503 = vmatmul.mubr.msk.f32.gmra.mxu0 %vm225_vm1, %v3468_v7 }
 0x18d   : > { %6505 = vmatprep.mubr.msk.f32.mxu0 %vm225_vm1, %v7587_v28  ;;  %v3472_v28 = vsel %vm8633_vm5, %v7613_v62, 0.0  ;;  %v7794_v62 = vld [vmem:[#allocation2 + $0x110] sm:$0xff]  ;;  %vm8637_vm5 = vnez %v8636_v29 }
 0x18e   : > { %6453 = vmatmul.mubr.msk.f32.gmra.mxu1 %vm225_vm1, %v8628_v6  ;;  %v3907_v29 = vld [vmem:[#allocation2 + $0x77] sm:$0xff] }
 0x18f   : > { %6455 = vmatprep.mubr.msk.f32.mxu1 %vm225_vm1, %v8629_v41 }
 0x190   : > { %6506 = vmatmul.mubr.msk.f32.gmra.mxu0 %vm225_vm1, %v3470_v46  ;;  %v3905_v46 = vld [vmem:[#allocation2 + $0x67] sm:$0xff] }
 0x191   : > { %6508 = vmatprep.mubr.msk.f32.mxu0 %vm225_vm1, %v7607_v16  ;;  %v3897_v16 = vld [vmem:[#allocation2 + $0x27] sm:$0xff] }
 0x192   : > { %6456 = vmatmul.mubr.msk.f32.gmra.mxu1 %vm225_vm1, %v8631_v55  ;;  %v3929_v0 = vsel %vm8637_vm5, %v3897_v16, 0.0  ;;  %vm8642_vm5 = vnez %v8641_v9 }
 0x193   : > { %6458 = vmatprep.mubr.msk.f32.mxu1 %vm225_vm1, %v8632_v27  ;;  %v3933_v44 = vsel %vm8642_vm5, %v3901_v48, 0.0  ;;  %v4390_v27 = vld [vmem:[#allocation2 + $0x60] sm:$0xff]  ;;  %vm8645_vm5 = vnez %v8513_v53 }
 0x194   : > { %6509 = vmatmul.mubr.msk.f32.gmra.mxu0 %vm225_vm1, %v3472_v28  ;;  %v3908_v53 = vld [vmem:[#allocation2 + $0x7f] sm:$0xff] }
 0x195   : > { %6511 = vmatprep.mubr.msk.f32.mxu0 %vm225_vm1, %v3441_v50  ;;  %v3904_v50 = vld [vmem:[#allocation2 + $0x5f] sm:$0xff] }
 0x196   : > { %6459 = vmatmul.mubr.msk.f32.gmra.mxu1 %vm225_vm1, %v8634_v51 }
 0x197   : > { %6461 = vmatprep.mubr.msk.f32.mxu1 %vm225_vm1, %v7787_v49 }
 0x198   : > { %6512 = vmatmul.mubr.msk.f32.gmra.mxu0 %vm225_vm1, %v3474_v36 }
 0x199   : > { %6566 = vmatprep.mubr.msk.f32.mxu0 %vm225_vm1, %v4383_v31 }
 0x19a   : > { %6462 = vmatmul.mubr.msk.f32.gmra.mxu1 %vm225_vm1, %v7794_v62 }
 0x19b   : > { %6516 = vmatprep.mubr.msk.f32.mxu1 %vm225_vm1, %v3929_v0 }
 0x19c   : > { %6567 = vmatmul.mubr.msk.f32.vlgmr.msra.gmra.mxu0 %vm225_vm1, %v4384_v33  ;;  %v4392_v33 = vld [vmem:[#allocation2 + $0x70] sm:$0xff] }
 0x19d   : > { %6569 = vmatprep.mubr.msk.f32.mxu0 %vm225_vm1, %v4385_v56 }
 0x19e   : > { %6517 = vmatmul.mubr.msk.f32.vlgmr.msra.gmra.mxu1 %vm225_vm1, %v3898_v43 }
 0x19f   : > { %6615 = vmatpush3.msk.msra.mxu1 %vm8640_vm4, %v7636_v38  ;;  %6519 = vmatprep.mubr.msk.f32.mxu1 %vm225_vm1, %v3931_v39  ;;  %vm8643_vm4 = vnez %v8505_v24  ;;  %v3937_v24 = vsel %vm8644_vm14, %v3905_v46, 0.0  ;;  %vm8647_vm14 = vnez %v8521_v22  ;;  %v3912_v22 = vld [vmem:[#allocation2 + $0x9f] sm:$0xff] }
 0x1a0   : > { %v6271_v20 = vpop.f32.mrf.mxu0  ;;  %6570 = vmatmul.mubr.msk.f32.gmra.mxu0 %vm225_vm1, %v4386_v47  ;;  %v3935_v6 = vsel %vm8643_vm4, %v3903_v59, 0.0  ;;  %v3939_v47 = vsel %vm8645_vm5, %v3907_v29, 0.0  ;;  %vm8646_vm4 = vnez %v8517_v2  ;;  %v3910_v2 = vld [vmem:[#allocation2 + $0x8f] sm:$0xff] }
 0x1a1   : > { %6572 = vmatprep.mubr.msk.f32.mxu0 %vm225_vm1, %v4387_v32  ;;  %v3909_v32 = vld [vmem:[#allocation2 + $0x87] sm:$0xff] }
 0x1a2   : > { %v6221_v13 = vpop.f32.mrf.mxu1  ;;  %6520 = vmatmul.mubr.msk.f32.gmra.mxu1 %vm225_vm1, %v3900_v5  ;;  %v1740_v38 = vpop.f32.mrf.mxu0 }
 0x1a3   : > { %1502 = vst.msk [vmem:[#allocation3 + $0x18] sm:$0xff] %vm225_vm1, %v6221_v13  ;;  %6522 = vmatprep.mubr.msk.f32.mxu1 %vm225_vm1, %v3933_v44  ;;  %v4394_v44 = vld [vmem:[#allocation2 + $0x80] sm:$0xff] }
 0x1a4   : > { %v1350_v54 = vpop.f32.mrf.mxu1  ;;  %v6274_v45 = vpop.f32.mrf.mxu0  ;;  %6573 = vmatmul.mubr.msk.f32.gmra.mxu0 %vm225_vm1, %v4388_v42 }
 0x1a5   : > { %1501 = vst.msk [vmem:[#allocation3 + $0x10] sm:$0xff] %vm225_vm1, %v1350_v54  ;;  %6575 = vmatprep.mubr.msk.f32.mxu0 %vm225_vm1, %v4389_v4  ;;  %v4395_v54 = vld [vmem:[#allocation2 + $0x88] sm:$0xff] }
 0x1a6   : > { %v6224_v7 = vpop.f32.mrf.mxu1  ;;  %6523 = vmatmul.mubr.msk.f32.gmra.mxu1 %vm225_vm1, %v3902_v11  ;;  %v1750_v41 = vpop.f32.mrf.mxu0  ;;  %v3941_v11 = vsel %vm8646_vm4, %v3909_v32, 0.0 }
 0x1a7   : > { %1504 = vst.msk [vmem:[#allocation3 + $0x28] sm:$0xff] %vm225_vm1, %v6224_v7  ;;  %6525 = vmatprep.mubr.msk.f32.mxu1 %vm225_vm1, %v3935_v6  ;;  %v3911_v6 = vld [vmem:[#allocation2 + $0x97] sm:$0xff] }
 0x1a8   : > { %v1360_v55 = vpop.f32.mrf.mxu1  ;;  %v6277_v28 = vpop.f32.mrf.mxu0  ;;  %6576 = vmatmul.mubr.msk.f32.gmra.mxu0 %vm225_vm1, %v4390_v27 }
 0x1a9   : > { %1503 = vst.msk [vmem:[#allocation3 + $0x20] sm:$0xff] %vm225_vm1, %v1360_v55  ;;  %6578 = vmatprep.mubr.msk.f32.mxu0 %vm225_vm1, %v4391_v23  ;;  %v4396_v55 = vld [vmem:[#allocation2 + $0x90] sm:$0xff]  ;;  %v4397_v23 = vld [vmem:[#allocation2 + $0x98] sm:$0xff] }
 0x1aa   : > { %v1892_v51 = vld [vmem:[#allocation3 + $0x18] sm:$0xff]  ;;  %v6227_v16 = vpop.f32.mrf.mxu1  ;;  %6526 = vmatmul.mubr.msk.f32.gmra.mxu1 %vm225_vm1, %v3904_v50  ;;  %v1760_v31 = vpop.f32.mrf.mxu0 }
 0x1ab   : > { %v1924_v36 = vadd.f32 %v6271_v20, %v1892_v51  ;;  %1506 = vst.msk [vmem:[#allocation3 + $0x38] sm:$0xff] %vm225_vm1, %v6227_v16  ;;  %6528 = vmatprep.mubr.msk.f32.mxu1 %vm225_vm1, %v3937_v24  ;;  %v3943_v16 = vsel %vm8647_vm14, %v3911_v6, 0.0  ;;  %v3917_v6 = vld [vmem:[#allocation2 + $0xc7] sm:$0xff] }
 0x1ac   : > { %v1891_v0 = vld [vmem:[#allocation3 + $0x10] sm:$0xff]  ;;  %v1370_v34 = vpop.f32.mrf.mxu1  ;;  %v6280_v56 = vpop.f32.mrf.mxu0  ;;  %6579 = vmatmul.mubr.msk.f32.gmra.mxu0 %vm225_vm1, %v4392_v33 }
 0x1ad   : > { %1956 = vst.msk [vmem:[#allocation3 + $0x18] sm:$0xff] %vm225_vm1, %v1924_v36  ;;  %v1923_v43 = vadd.f32 %v1891_v0, %v1740_v38  ;;  %1505 = vst.msk [vmem:[#allocation3 + $0x30] sm:$0xff] %vm225_vm1, %v1370_v34  ;;  %6581 = vmatprep.mubr.msk.f32.mxu0 %vm225_vm1, %v4393_v52  ;;  %v4398_v34 = vld [vmem:[#allocation2 + $0xa0] sm:$0xff] }
 0x1ae   : > { %v1894_v39 = vld [vmem:[#allocation3 + $0x28] sm:$0xff]  ;;  %v6230_v48 = vpop.f32.mrf.mxu1  ;;  %6529 = vmatmul.mubr.msk.f32.gmra.mxu1 %vm225_vm1, %v3906_v37  ;;  %v1770_v5 = vpop.f32.mrf.mxu0  ;;  %v4399_v37 = vld [vmem:[#allocation2 + $0xa8] sm:$0xff] }
 0x1af   : > { %1955 = vst.msk [vmem:[#allocation3 + $0x10] sm:$0xff] %vm225_vm1, %v1923_v43  ;;  %v1926_v20 = vadd.f32 %v6274_v45, %v1894_v39  ;;  %1508 = vst.msk [vmem:[#allocation3 + $0x48] sm:$0xff] %vm225_vm1, %v6230_v48  ;;  %6531 = vmatprep.mubr.msk.f32.mxu1 %vm225_vm1, %v3939_v47  ;;  %v8648_v39 = vld [vmem:[#allocation18_spill] sm:$0xff] }
 0x1b0   : > { %v1893_v13 = vld [vmem:[#allocation3 + $0x20] sm:$0xff]  ;;  %v1380_v9 = vpop.f32.mrf.mxu1  ;;  %v6283_v59 = vpop.f32.mrf.mxu0  ;;  %6582 = vmatmul.mubr.msk.f32.gmra.mxu0 %vm225_vm1, %v4394_v44  ;;  %vm8649_vm5 = vnez %v8648_v39 }
 0x1b1   : > { %1958 = vst.msk [vmem:[#allocation3 + $0x28] sm:$0xff] %vm225_vm1, %v1926_v20  ;;  %v1925_v38 = vadd.f32 %v1893_v13, %v1750_v41  ;;  %1507 = vst.msk [vmem:[#allocation3 + $0x40] sm:$0xff] %vm225_vm1, %v1380_v9  ;;  %6584 = vmatprep.mubr.msk.f32.mxu0 %vm225_vm1, %v4395_v54  ;;  %v4400_v9 = vld [vmem:[#allocation2 + $0xb0] sm:$0xff]  ;;  %v4401_v54 = vld [vmem:[#allocation2 + $0xb8] sm:$0xff] }
 0x1b2   : > { %v1896_v42 = vld [vmem:[#allocation3 + $0x38] sm:$0xff]  ;;  %v6233_v45 = vpop.f32.mrf.mxu1  ;;  %6532 = vmatmul.mubr.msk.f32.gmra.mxu1 %vm225_vm1, %v3908_v53  ;;  %v1780_v7 = vpop.f32.mrf.mxu0 }
 0x1b3   : > { %1957 = vst.msk [vmem:[#allocation3 + $0x20] sm:$0xff] %vm225_vm1, %v1925_v38  ;;  %v1928_v4 = vadd.f32 %v6277_v28, %v1896_v42  ;;  %1510 = vst.msk [vmem:[#allocation3 + $0x58] sm:$0xff] %vm225_vm1, %v6233_v45  ;;  %6534 = vmatprep.mubr.msk.f32.mxu1 %vm225_vm1, %v3941_v11  ;;  %v3914_v53 = vld [vmem:[#allocation2 + $0xaf] sm:$0xff]  ;;  %v8650_v45 = vld [vmem:[#allocation21_spill] sm:$0xff] }
 0x1b4   : > { %v1895_v41 = vld [vmem:[#allocation3 + $0x30] sm:$0xff]  ;;  %v1390_v46 = vpop.f32.mrf.mxu1  ;;  %v6286_v50 = vpop.f32.mrf.mxu0  ;;  %6585 = vmatmul.mubr.msk.f32.gmra.mxu0 %vm225_vm1, %v4396_v55  ;;  %vm8651_vm4 = vnez %v8650_v45 }
 0x1b5   : > { %1960 = vst.msk [vmem:[#allocation3 + $0x38] sm:$0xff] %vm225_vm1, %v1928_v4  ;;  %v1927_v27 = vadd.f32 %v1895_v41, %v1760_v31  ;;  %1509 = vst.msk [vmem:[#allocation3 + $0x50] sm:$0xff] %vm225_vm1, %v1390_v46  ;;  %6587 = vmatprep.mubr.msk.f32.mxu0 %vm225_vm1, %v4397_v23  ;;  %v3913_v31 = vld [vmem:[#allocation2 + $0xa7] sm:$0xff]  ;;  %v3916_v23 = vld [vmem:[#allocation2 + $0xbf] sm:$0xff] }
 0x1b6   : > { %v1898_v28 = vld [vmem:[#allocation3 + $0x48] sm:$0xff]  ;;  %v6236_v51 = vpop.f32.mrf.mxu1  ;;  %6535 = vmatmul.mubr.msk.f32.gmra.mxu1 %vm225_vm1, %v3910_v2  ;;  %v1790_v36 = vpop.f32.mrf.mxu0  ;;  %v3945_v48 = vsel %vm8649_vm5, %v3913_v31, 0.0  ;;  %v4402_v55 = vld [vmem:[#allocation2 + $0xc0] sm:$0xff] }
 0x1b7   : > { %1959 = vst.msk [vmem:[#allocation3 + $0x30] sm:$0xff] %vm225_vm1, %v1927_v27  ;;  %v1930_v24 = vadd.f32 %v6280_v56, %v1898_v28  ;;  %1512 = vst.msk [vmem:[#allocation3 + $0x68] sm:$0xff] %vm225_vm1, %v6236_v51  ;;  %6537 = vmatprep.mubr.msk.f32.mxu1 %vm225_vm1, %v3943_v16  ;;  %v4403_v28 = vld [vmem:[#allocation2 + $0xc8] sm:$0xff]  ;;  %v8652_v16 = vld [vmem:[#allocation24_spill] sm:$0xff] }
 0x1b8   : > { %v1897_v29 = vld [vmem:[#allocation3 + $0x40] sm:$0xff]  ;;  %v1400_v0 = vpop.f32.mrf.mxu1  ;;  %v6289_v43 = vpop.f32.mrf.mxu0  ;;  %6588 = vmatmul.mubr.msk.f32.gmra.mxu0 %vm225_vm1, %v4398_v34  ;;  %vm8653_vm14 = vnez %v8652_v16  ;;  %v2377_v19 = vld [vmem:[#allocation3 + $0x10] sm:$0xff] }
 0x1b9   : > { %1962 = vst.msk [vmem:[#allocation3 + $0x48] sm:$0xff] %vm225_vm1, %v1930_v24  ;;  %v1929_v33 = vadd.f32 %v1897_v29, %v1770_v5  ;;  %1511 = vst.msk [vmem:[#allocation3 + $0x60] sm:$0xff] %vm225_vm1, %v1400_v0  ;;  %6590 = vmatprep.mubr.msk.f32.mxu0 %vm225_vm1, %v4399_v37  ;;  %v3915_v5 = vld [vmem:[#allocation2 + $0xb7] sm:$0xff]  ;;  %v3949_v24 = vsel %vm8653_vm14, %v3917_v6, 0.0  ;;  %vm8658_vm14 = vnez %v8550_v25  ;;  %v3924_v25 = vld [vmem:[#allocation2 + $0xff] sm:$0xff] }
 0x1ba   : > { %v1900_v56 = vld [vmem:[#allocation3 + $0x58] sm:$0xff]  ;;  %v6239_v52 = vpop.f32.mrf.mxu1  ;;  %6538 = vmatmul.mubr.msk.f32.gmra.mxu1 %vm225_vm1, %v3912_v22  ;;  %v1800_v20 = vpop.f32.mrf.mxu0  ;;  %v3947_v11 = vsel %vm8651_vm4, %v3915_v5, 0.0  ;;  %v3919_v29 = vld [vmem:[#allocation2 + $0xd7] sm:$0xff] }
 0x1bb   : > { %1961 = vst.msk [vmem:[#allocation3 + $0x40] sm:$0xff] %vm225_vm1, %v1929_v33  ;;  %v1932_v47 = vadd.f32 %v6283_v59, %v1900_v56  ;;  %1514 = vst.msk [vmem:[#allocation3 + $0x78] sm:$0xff] %vm225_vm1, %v6239_v52  ;;  %6540 = vmatprep.mubr.msk.f32.mxu1 %vm225_vm1, %v3945_v48  ;;  %v4404_v33 = vld [vmem:[#allocation2 + $0xd0] sm:$0xff]  ;;  %v4405_v52 = vld [vmem:[#allocation2 + $0xd8] sm:$0xff] }
 0x1bc   : > { %v1899_v32 = vld [vmem:[#allocation3 + $0x50] sm:$0xff]  ;;  %v1410_v13 = vpop.f32.mrf.mxu1  ;;  %v6292_v38 = vpop.f32.mrf.mxu0  ;;  %6591 = vmatmul.mubr.msk.f32.gmra.mxu0 %vm225_vm1, %v4400_v9  ;;  %v3918_v56 = vld [vmem:[#allocation2 + $0xcf] sm:$0xff] }
 0x1bd   : > { %1964 = vst.msk [vmem:[#allocation3 + $0x58] sm:$0xff] %vm225_vm1, %v1932_v47  ;;  %v1931_v44 = vadd.f32 %v1899_v32, %v1780_v7  ;;  %1513 = vst.msk [vmem:[#allocation3 + $0x70] sm:$0xff] %vm225_vm1, %v1410_v13  ;;  %6593 = vmatprep.mubr.msk.f32.mxu0 %vm225_vm1, %v4401_v54  ;;  %v8654_v48 = vld [vmem:[#allocation27_spill] sm:$0xff] }
 0x1be   : > { %v1902_v59 = vld [vmem:[#allocation3 + $0x68] sm:$0xff]  ;;  %v6242_v42 = vpop.f32.mrf.mxu1  ;;  %6541 = vmatmul.mubr.msk.f32.gmra.mxu1 %vm225_vm1, %v3914_v53  ;;  %v1810_v7 = vpop.f32.mrf.mxu0  ;;  %vm8655_vm5 = vnez %v8654_v48  ;;  %v3921_v32 = vld [vmem:[#allocation2 + $0xe7] sm:$0xff] }
 0x1bf   : > { %1963 = vst.msk [vmem:[#allocation3 + $0x50] sm:$0xff] %vm225_vm1, %v1931_v44  ;;  %v1934_v4 = vadd.f32 %v6286_v50, %v1902_v59  ;;  %1516 = vst.msk [vmem:[#allocation3 + $0x88] sm:$0xff] %vm225_vm1, %v6242_v42  ;;  %6543 = vmatprep.mubr.msk.f32.mxu1 %vm225_vm1, %v3947_v11  ;;  %v3951_v47 = vsel %vm8655_vm5, %v3919_v29, 0.0  ;;  %v4406_v44 = vld [vmem:[#allocation2 + $0xe0] sm:$0xff]  ;;  %v4407_v42 = vld [vmem:[#allocation2 + $0xe8] sm:$0xff]  ;;  %vm8659_vm5 = vnez %v8554_v40 }
 0x1c0   : > { %v1901_v41 = vld [vmem:[#allocation3 + $0x60] sm:$0xff]  ;;  %v1420_v46 = vpop.f32.mrf.mxu1  ;;  %v6295_v2 = vpop.f32.mrf.mxu0  ;;  %6594 = vmatmul.mubr.msk.f32.gmra.mxu0 %vm225_vm1, %v4402_v55  ;;  %v3920_v59 = vld [vmem:[#allocation2 + $0xdf] sm:$0xff] }
 0x1c1   : > { %1966 = vst.msk [vmem:[#allocation3 + $0x68] sm:$0xff] %vm225_vm1, %v1934_v4  ;;  %v1933_v27 = vadd.f32 %v1901_v41, %v1790_v36  ;;  %1515 = vst.msk [vmem:[#allocation3 + $0x80] sm:$0xff] %vm225_vm1, %v1420_v46  ;;  %6596 = vmatprep.mubr.msk.f32.mxu0 %vm225_vm1, %v4403_v28  ;;  %v8656_v11 = vld [vmem:[#allocation30_spill] sm:$0xff]  ;;  %v3923_v41 = vld [vmem:[#allocation2 + $0xf7] sm:$0xff] }
 0x1c2   : > { %v1904_v50 = vld [vmem:[#allocation3 + $0x78] sm:$0xff]  ;;  %v6245_v51 = vpop.f32.mrf.mxu1  ;;  %6544 = vmatmul.mubr.msk.f32.gmra.mxu1 %vm225_vm1, %v3916_v23  ;;  %v1820_v36 = vpop.f32.mrf.mxu0  ;;  %vm8657_vm4 = vnez %v8656_v11  ;;  %v3927_v48 = vld [vmem:[#allocation2 + $0x117] sm:$0xff] }
 0x1c3   : > { %1965 = vst.msk [vmem:[#allocation3 + $0x60] sm:$0xff] %vm225_vm1, %v1933_v27  ;;  %v1936_v31 = vadd.f32 %v6289_v43, %v1904_v50  ;;  %1518 = vst.msk [vmem:[#allocation3 + $0x98] sm:$0xff] %vm225_vm1, %v6245_v51  ;;  %6546 = vmatprep.mubr.msk.f32.mxu1 %vm225_vm1, %v3949_v24  ;;  %v3953_v4 = vsel %vm8657_vm4, %v3921_v32, 0.0  ;;  %v4408_v27 = vld [vmem:[#allocation2 + $0xf0] sm:$0xff]  ;;  %v4409_v51 = vld [vmem:[#allocation2 + $0xf8] sm:$0xff]  ;;  %v3955_v24 = vsel %vm8658_vm14, %v3923_v41, 0.0  ;;  %vm8661_vm4 = vnez %v8558_v14 }
 0x1c4   : > { %v1903_v0 = vld [vmem:[#allocation3 + $0x70] sm:$0xff]  ;;  %v1430_v34 = vpop.f32.mrf.mxu1  ;;  %v6298_v37 = vpop.f32.mrf.mxu0  ;;  %6597 = vmatmul.mubr.msk.f32.gmra.mxu0 %vm225_vm1, %v4404_v33  ;;  %v3922_v50 = vld [vmem:[#allocation2 + $0xef] sm:$0xff]  ;;  %v3959_v40 = vsel %vm8661_vm4, %v3927_v48, 0.0  ;;  %vm8662_vm14 = vnez %v8562_v61 }
 0x1c5   : > { %1968 = vst.msk [vmem:[#allocation3 + $0x78] sm:$0xff] %vm225_vm1, %v1936_v31  ;;  %v1935_v22 = vadd.f32 %v1903_v0, %v1800_v20  ;;  %1517 = vst.msk [vmem:[#allocation3 + $0x90] sm:$0xff] %vm225_vm1, %v1430_v34  ;;  %6599 = vmatprep.mubr.msk.f32.mxu0 %vm225_vm1, %v4405_v52  ;;  %v4410_v34 = vld [vmem:[#allocation2 + $0x100] sm:$0xff]  ;;  %v4838_v11 = vld [vmem:[#allocation2 + $0x31] sm:$0xff] }
 0x1c6   : > { %v1906_v43 = vld [vmem:[#allocation3 + $0x88] sm:$0xff]  ;;  %v6248_v39 = vpop.f32.mrf.mxu1  ;;  %6547 = vmatmul.mubr.msk.f32.gmra.mxu1 %vm225_vm1, %v3918_v56  ;;  %v1830_v20 = vpop.f32.mrf.mxu0 }
 0x1c7   : > { %1967 = vst.msk [vmem:[#allocation3 + $0x70] sm:$0xff] %vm225_vm1, %v1935_v22  ;;  %v1938_v5 = vadd.f32 %v6292_v38, %v1906_v43  ;;  %1520 = vst.msk [vmem:[#allocation3 + $0xa8] sm:$0xff] %vm225_vm1, %v6248_v39  ;;  %6549 = vmatprep.mubr.msk.f32.mxu1 %vm225_vm1, %v3951_v47  ;;  %v8660_v39 = vsel %vm8659_vm5, %v7278_v63, 0.0  ;;  %v4413_v47 = vld [vmem:[#allocation2 + $0x118] sm:$0xff]  ;;  %v4414_v63 = vld [vmem:[#allocation2 + $0x120] sm:$0xff] }
 0x1c8   : > { %v1905_v13 = vld [vmem:[#allocation3 + $0x80] sm:$0xff]  ;;  %v1440_v9 = vpop.f32.mrf.mxu1  ;;  %v6301_v54 = vpop.f32.mrf.mxu0  ;;  %6600 = vmatmul.mubr.msk.f32.gmra.mxu0 %vm225_vm1, %v4406_v44 }
 0x1c9   : > { %1970 = vst.msk [vmem:[#allocation3 + $0x88] sm:$0xff] %vm225_vm1, %v1938_v5  ;;  %v1937_v53 = vadd.f32 %v1905_v13, %v1810_v7  ;;  %1519 = vst.msk [vmem:[#allocation3 + $0xa0] sm:$0xff] %vm225_vm1, %v1440_v9  ;;  %6602 = vmatprep.mubr.msk.f32.mxu0 %vm225_vm1, %v4407_v42 }
 0x1ca   : > { %v1908_v38 = vld [vmem:[#allocation3 + $0x98] sm:$0xff]  ;;  %v6251_v45 = vpop.f32.mrf.mxu1  ;;  %6550 = vmatmul.mubr.msk.f32.gmra.mxu1 %vm225_vm1, %v3920_v59  ;;  %v1840_v7 = vpop.f32.mrf.mxu0 }
 0x1cb   : > { %1969 = vst.msk [vmem:[#allocation3 + $0x80] sm:$0xff] %vm225_vm1, %v1937_v53  ;;  %v1940_v6 = vadd.f32 %v6295_v2, %v1908_v38  ;;  %1522 = vst.msk [vmem:[#allocation3 + $0xb8] sm:$0xff] %vm225_vm1, %v6251_v45  ;;  %6552 = vmatprep.mubr.msk.f32.mxu1 %vm225_vm1, %v3953_v4  ;;  %v4837_v45 = vld [vmem:[#allocation2 + $0x29] sm:$0xff] }
 0x1cc   : > { %v1907_v46 = vld [vmem:[#allocation3 + $0x90] sm:$0xff]  ;;  %v1450_v55 = vpop.f32.mrf.mxu1  ;;  %v6304_v28 = vpop.f32.mrf.mxu0  ;;  %6603 = vmatmul.mubr.msk.f32.gmra.mxu0 %vm225_vm1, %v4408_v27  ;;  %v4870_v27 = vsel %vm8662_vm14, %v4838_v11, 0.0 }
 0x1cd   : > { %1972 = vst.msk [vmem:[#allocation3 + $0x98] sm:$0xff] %vm225_vm1, %v1940_v6  ;;  %v1939_v23 = vadd.f32 %v1907_v46, %v1820_v36  ;;  %1521 = vst.msk [vmem:[#allocation3 + $0xb0] sm:$0xff] %vm225_vm1, %v1450_v55  ;;  %6605 = vmatprep.mubr.msk.f32.mxu0 %vm225_vm1, %v4409_v51  ;;  %v2376_v51 = vld [vmem:[#allocation3 + $0x8] sm:$0xff] }
 0x1ce   : > { %v1910_v2 = vld [vmem:[#allocation3 + $0xa8] sm:$0xff]  ;;  %v6254_v16 = vpop.f32.mrf.mxu1  ;;  %6553 = vmatmul.mubr.msk.f32.gmra.mxu1 %vm225_vm1, %v3922_v50  ;;  %v1850_v36 = vpop.f32.mrf.mxu0 }
 0x1cf   : > { %1971 = vst.msk [vmem:[#allocation3 + $0x90] sm:$0xff] %vm225_vm1, %v1939_v23  ;;  %v1942_v31 = vadd.f32 %v6298_v37, %v1910_v2  ;;  %1524 = vst.msk [vmem:[#allocation3 + $0xc8] sm:$0xff] %vm225_vm1, %v6254_v16  ;;  %6555 = vmatprep.mubr.msk.f32.mxu1 %vm225_vm1, %v3955_v24  ;;  %v4839_v23 = vld [vmem:[#allocation2 + $0x39] sm:$0xff]  ;;  %v4840_v2 = vld [vmem:[#allocation2 + $0x41] sm:$0xff] }
 0x1d0   : > { %v1909_v29 = vld [vmem:[#allocation3 + $0xa0] sm:$0xff]  ;;  %v1460_v0 = vpop.f32.mrf.mxu1  ;;  %v6307_v22 = vpop.f32.mrf.mxu0  ;;  %6606 = vmatmul.mubr.msk.f32.gmra.mxu0 %vm225_vm1, %v4410_v34 }
 0x1d1   : > { %1974 = vst.msk [vmem:[#allocation3 + $0xa8] sm:$0xff] %vm225_vm1, %v1942_v31  ;;  %v1941_v33 = vadd.f32 %v1909_v29, %v1830_v20  ;;  %1523 = vst.msk [vmem:[#allocation3 + $0xc0] sm:$0xff] %vm225_vm1, %v1460_v0  ;;  %6608 = vmatprep.mubr.msk.f32.mxu0 %vm225_vm1, %v7787_v49  ;;  %v2375_v0 = vld [vmem:[#allocation3] sm:$0xff] }
 0x1d2   : > { %v1912_v56 = vld [vmem:[#allocation3 + $0xb8] sm:$0xff]  ;;  %v6257_v52 = vpop.f32.mrf.mxu1  ;;  %6556 = vmatmul.mubr.msk.f32.gmra.mxu1 %vm225_vm1, %v3924_v25  ;;  %v1860_v43 = vpop.f32.mrf.mxu0 }
 0x1d3   : > { %1973 = vst.msk [vmem:[#allocation3 + $0xa0] sm:$0xff] %vm225_vm1, %v1941_v33  ;;  %v1944_v37 = vadd.f32 %v6301_v54, %v1912_v56  ;;  %1526 = vst.msk [vmem:[#allocation3 + $0xd8] sm:$0xff] %vm225_vm1, %v6257_v52  ;;  %6558 = vmatprep.mubr.msk.f32.mxu1 %vm225_vm1, %v8660_v39  ;;  %v4841_v25 = vld [vmem:[#allocation2 + $0x49] sm:$0xff] }
 0x1d4   : > { %v1911_v5 = vld [vmem:[#allocation3 + $0xb0] sm:$0xff]  ;;  %v1470_v20 = vpop.f32.mrf.mxu1  ;;  %v6310_v49 = vpop.f32.mrf.mxu0  ;;  %6609 = vmatmul.mubr.msk.f32.gmra.mxu0 %vm225_vm1, %v7794_v62 }
 0x1d5   : > { %1976 = vst.msk [vmem:[#allocation3 + $0xb8] sm:$0xff] %vm225_vm1, %v1944_v37  ;;  %v1943_v32 = vadd.f32 %v1911_v5, %v1840_v7  ;;  %1525 = vst.msk [vmem:[#allocation3 + $0xd0] sm:$0xff] %vm225_vm1, %v1470_v20  ;;  %6611 = vmatprep.mubr.msk.f32.mxu0 %vm225_vm1, %v4413_v47  ;;  %v3928_v62 = vld [vmem:[#allocation2 + $0x11f] sm:$0xff]  ;;  %v2378_v37 = vld [vmem:[#allocation3 + $0x18] sm:$0xff] }
 0x1d6   : > { %v1914_v13 = vld [vmem:[#allocation3 + $0xc8] sm:$0xff]  ;;  %v6260_v9 = vpop.f32.mrf.mxu1  ;;  %6559 = vmatmul.mubr.msk.f32.gmra.mxu1 %vm225_vm1, %v7617_v10  ;;  %v1870_v53 = vpop.f32.mrf.mxu0 }
 0x1d7   : > { %1975 = vst.msk [vmem:[#allocation3 + $0xb0] sm:$0xff] %vm225_vm1, %v1943_v32  ;;  %v1946_v44 = vadd.f32 %v6304_v28, %v1914_v13  ;;  %1528 = vst.msk [vmem:[#allocation3 + $0xe8] sm:$0xff] %vm225_vm1, %v6260_v9  ;;  %6561 = vmatprep.mubr.msk.f32.mxu1 %vm225_vm1, %v3959_v40 }
 0x1d8   : > { %v1913_v54 = vld [vmem:[#allocation3 + $0xc0] sm:$0xff]  ;;  %v1480_v59 = vpop.f32.mrf.mxu1  ;;  %v6313_v14 = vpop.f32.mrf.mxu0  ;;  %6612 = vmatmul.mubr.msk.f32.gmra.mxu0 %vm225_vm1, %v4414_v63  ;;  %v2380_v63 = vld [vmem:[#allocation3 + $0x28] sm:$0xff] }
 0x1d9   : > { %1978 = vst.msk [vmem:[#allocation3 + $0xc8] sm:$0xff] %vm225_vm1, %v1946_v44  ;;  %v1945_v10 = vadd.f32 %v1913_v54, %v1850_v36  ;;  %1527 = vst.msk [vmem:[#allocation3 + $0xe0] sm:$0xff] %vm225_vm1, %v1480_v59  ;;  %v4843_v44 = vld [vmem:[#allocation2 + $0x59] sm:$0xff] }
 0x1da   : > { %v1916_v42 = vld [vmem:[#allocation3 + $0xd8] sm:$0xff]  ;;  %v6263_v38 = vpop.f32.mrf.mxu1  ;;  %6562 = vmatmul.mubr.msk.f32.gmra.mxu1 %vm225_vm1, %v3928_v62  ;;  %v1880_v6 = vpop.f32.mrf.mxu0 }
 0x1db   : > { %1977 = vst.msk [vmem:[#allocation3 + $0xc0] sm:$0xff] %vm225_vm1, %v1945_v10  ;;  %v1948_v4 = vadd.f32 %v6307_v22, %v1916_v42  ;;  %1530 = vst.msk [vmem:[#allocation3 + $0xf8] sm:$0xff] %vm225_vm1, %v6263_v38  ;;  %6616 = vmatprep.mubr.msk.f32.mxu1 %vm225_vm1, %v4837_v45  ;;  %v4872_v22 = vsel %vm7290_vm2, %v4840_v2, 0.0  ;;  %v2379_v10 = vld [vmem:[#allocation3 + $0x20] sm:$0xff]  ;;  %vm8663_vm2 = vnez %v8594_v8 }
 0x1dc   : > { %v1915_v7 = vld [vmem:[#allocation3 + $0xd0] sm:$0xff]  ;;  %v1490_v41 = vpop.f32.mrf.mxu1  ;;  %v6368_v55 = vpop.f32.mrf.mxu0  ;;  %v4845_v45 = vld [vmem:[#allocation2 + $0x69] sm:$0xff] }
 0x1dd   : > { %1980 = vst.msk [vmem:[#allocation3 + $0xd8] sm:$0xff] %vm225_vm1, %v1948_v4  ;;  %v1947_v46 = vadd.f32 %v1915_v7, %v1860_v43  ;;  %1529 = vst.msk [vmem:[#allocation3 + $0xf0] sm:$0xff] %vm225_vm1, %v1490_v41  ;;  %v4842_v43 = vld [vmem:[#allocation2 + $0x51] sm:$0xff] }
 0x1de   : > { %v1918_v28 = vld [vmem:[#allocation3 + $0xe8] sm:$0xff]  ;;  %v6318_v50 = vpop.f32.mrf.mxu1  ;;  %6617 = vmatmul.mubr.msk.f32.vlgmr.msra.gmra.mxu1 %vm225_vm1, %v4870_v27  ;;  %v2702_v31 = vpop.f32.mrf.mxu0  ;;  %v4874_v9 = vsel %vm7335_vm0, %v4842_v43, 0.0  ;;  %v4849_v43 = vld [vmem:[#allocation2 + $0x89] sm:$0xff] }
 0x1df   : > { %1979 = vst.msk [vmem:[#allocation3 + $0xd0] sm:$0xff] %vm225_vm1, %v1947_v46  ;;  %v1950_v16 = vadd.f32 %v6310_v49, %v1918_v28  ;;  %v2408_v24 = vadd.f32 %v6318_v50, %v2376_v51  ;;  %6619 = vmatprep.mubr.msk.f32.mxu1 %vm225_vm1, %v4839_v23  ;;  %v4846_v7 = vld [vmem:[#allocation2 + $0x71] sm:$0xff]  ;;  %v2381_v28 = vld [vmem:[#allocation3 + $0x30] sm:$0xff] }
 0x1e0   : > { %v1917_v36 = vld [vmem:[#allocation3 + $0xe0] sm:$0xff]  ;;  %v2216_v29 = vpop.f32.mrf.mxu1  ;;  %v6371_v33 = vpop.f32.mrf.mxu0  ;;  %v4878_v2 = vsel %vm7379_vm3, %v4846_v7, 0.0 }
 0x1e1   : > { %1982 = vst.msk [vmem:[#allocation3 + $0xe8] sm:$0xff] %vm225_vm1, %v1950_v16  ;;  %v1949_v61 = vadd.f32 %v1917_v36, %v1870_v53  ;;  %2440 = vst.msk [vmem:[#allocation3 + $0x8] sm:$0xff] %vm225_vm1, %v2408_v24  ;;  %v2407_v34 = vadd.f32 %v2375_v0, %v2216_v29  ;;  %v4844_v53 = vld [vmem:[#allocation2 + $0x61] sm:$0xff]  ;;  %v4847_v16 = vld [vmem:[#allocation2 + $0x79] sm:$0xff] }
 0x1e2   : > { %v1920_v56 = vld [vmem:[#allocation3 + $0xf8] sm:$0xff]  ;;  %v6321_v52 = vpop.f32.mrf.mxu1  ;;  %6620 = vmatmul.mubr.msk.f32.gmra.mxu1 %vm225_vm1, %v4872_v22  ;;  %v2712_v47 = vpop.f32.mrf.mxu0  ;;  %v4876_v38 = vsel %vm7356_vm15, %v4844_v53, 0.0  ;;  %v2384_v29 = vld [vmem:[#allocation3 + $0x48] sm:$0xff] }
 0x1e3   : > { %1981 = vst.msk [vmem:[#allocation3 + $0xe0] sm:$0xff] %vm225_vm1, %v1949_v61  ;;  %v1952_v39 = vadd.f32 %v6313_v14, %v1920_v56  ;;  %2439 = vst.msk [vmem:[#allocation3] sm:$0xff] %vm225_vm1, %v2407_v34  ;;  %v2410_v48 = vadd.f32 %v6321_v52, %v2378_v37  ;;  %6622 = vmatprep.mubr.msk.f32.mxu1 %vm225_vm1, %v4841_v25  ;;  %v2383_v25 = vld [vmem:[#allocation3 + $0x40] sm:$0xff]  ;;  %v4851_v53 = vld [vmem:[#allocation2 + $0x99] sm:$0xff] }
 0x1e4   : > { %v1919_v5 = vld [vmem:[#allocation3 + $0xf0] sm:$0xff]  ;;  %v2226_v20 = vpop.f32.mrf.mxu1  ;;  %v6374_v13 = vpop.f32.mrf.mxu0 }
 0x1e5   : > { %1984 = vst.msk [vmem:[#allocation3 + $0xf8] sm:$0xff] %vm225_vm1, %v1952_v39  ;;  %v1951_v32 = vadd.f32 %v1919_v5, %v1880_v6  ;;  %2442 = vst.msk [vmem:[#allocation3 + $0x18] sm:$0xff] %vm225_vm1, %v2410_v48  ;;  %v2409_v49 = vadd.f32 %v2377_v19, %v2226_v20  ;;  %v2382_v6 = vld [vmem:[#allocation3 + $0x38] sm:$0xff] }
 0x1e6   : > { %v6324_v40 = vpop.f32.mrf.mxu1  ;;  %6623 = vmatmul.mubr.msk.f32.gmra.mxu1 %vm225_vm1, %v4874_v9  ;;  %v7977_v54 = vpop.f32.mrf.mxu0  ;;  %v2386_v5 = vld [vmem:[#allocation3 + $0x58] sm:$0xff]  ;;  %v2385_v9 = vld [vmem:[#allocation3 + $0x50] sm:$0xff] }
 0x1e7   : > { %1983 = vst.msk [vmem:[#allocation3 + $0xf0] sm:$0xff] %vm225_vm1, %v1951_v32  ;;  %2441 = vst.msk [vmem:[#allocation3 + $0x10] sm:$0xff] %vm225_vm1, %v2409_v49  ;;  %v2412_v62 = vadd.f32 %v6324_v40, %v2380_v63  ;;  %6625 = vmatprep.mubr.msk.f32.mxu1 %vm225_vm1, %v4843_v44 }
 0x1e8   : > { %v2236_v59 = vpop.f32.mrf.mxu1  ;;  %v2862_v14 = vld [vmem:[#allocation3 + $0x8] sm:$0xff]  ;;  %v7981_v42 = vpop.f32.mrf.mxu0 }
 0x1e9   : > { %2444 = vst.msk [vmem:[#allocation3 + $0x28] sm:$0xff] %vm225_vm1, %v2412_v62  ;;  %v2411_v17 = vadd.f32 %v2379_v10, %v2236_v59  ;;  %v2894_v11 = vadd.f32 %v6368_v55, %v2862_v14  ;;  %v2388_v10 = vld [vmem:[#allocation3 + $0x68] sm:$0xff] }
 0x1ea   : > { %v6327_v4 = vpop.f32.mrf.mxu1  ;;  %6626 = vmatmul.mubr.msk.f32.gmra.mxu1 %vm225_vm1, %v4876_v38  ;;  %v2861_v41 = vld [vmem:[#allocation3] sm:$0xff]  ;;  %v7987_v27 = vpop.f32.mrf.mxu0 }
 0x1eb   : > { %2443 = vst.msk [vmem:[#allocation3 + $0x20] sm:$0xff] %vm225_vm1, %v2411_v17  ;;  %v2414_v46 = vadd.f32 %v6327_v4, %v2382_v6  ;;  %6628 = vmatprep.mubr.msk.f32.mxu1 %vm225_vm1, %v4845_v45  ;;  %2926 = vst.msk [vmem:[#allocation3 + $0x8] sm:$0xff] %vm225_vm1, %v2894_v11  ;;  %v2893_v23 = vadd.f32 %v2861_v41, %v2702_v31  ;;  %v4848_v31 = vld [vmem:[#allocation2 + $0x81] sm:$0xff]  ;;  %v2387_v11 = vld [vmem:[#allocation3 + $0x60] sm:$0xff] }
 0x1ec   : > { %v2246_v12 = vpop.f32.mrf.mxu1  ;;  %v2864_v50 = vld [vmem:[#allocation3 + $0x18] sm:$0xff]  ;;  %v7992_v51 = vpop.f32.mrf.mxu0  ;;  %v4880_v37 = vsel %vm7400_vm6, %v4848_v31, 0.0  ;;  %v4855_v31 = vld [vmem:[#allocation2 + $0xb9] sm:$0xff]  ;;  %vm8664_vm6 = vnez %v8597_v35 }
 0x1ed   : > { %2446 = vst.msk [vmem:[#allocation3 + $0x38] sm:$0xff] %vm225_vm1, %v2414_v46  ;;  %v2413_v55 = vadd.f32 %v2381_v28, %v2246_v12  ;;  %2925 = vst.msk [vmem:[#allocation3] sm:$0xff] %vm225_vm1, %v2893_v23  ;;  %v2896_v24 = vadd.f32 %v6371_v33, %v2864_v50  ;;  %v4853_v41 = vld [vmem:[#allocation2 + $0xa9] sm:$0xff] }
 0x1ee   : > { %v6330_v36 = vpop.f32.mrf.mxu1  ;;  %6629 = vmatmul.mubr.msk.f32.gmra.mxu1 %vm225_vm1, %v4878_v2  ;;  %v2863_v0 = vld [vmem:[#allocation3 + $0x10] sm:$0xff]  ;;  %v7999_v34 = vpop.f32.mrf.mxu0  ;;  %v2390_v12 = vld [vmem:[#allocation3 + $0x78] sm:$0xff] }
 0x1ef   : > { %2445 = vst.msk [vmem:[#allocation3 + $0x30] sm:$0xff] %vm225_vm1, %v2413_v55  ;;  %v2416_v61 = vadd.f32 %v6330_v36, %v2384_v29  ;;  %6631 = vmatprep.mubr.msk.f32.mxu1 %vm225_vm1, %v4847_v16  ;;  %2928 = vst.msk [vmem:[#allocation3 + $0x18] sm:$0xff] %vm225_vm1, %v2896_v24  ;;  %v2895_v21 = vadd.f32 %v2863_v0, %v2712_v47  ;;  %v4850_v47 = vld [vmem:[#allocation2 + $0x91] sm:$0xff]  ;;  %v2389_v16 = vld [vmem:[#allocation3 + $0x70] sm:$0xff] }
 0x1f0   : > { %v2256_v22 = vpop.f32.mrf.mxu1  ;;  %v2866_v56 = vld [vmem:[#allocation3 + $0x28] sm:$0xff]  ;;  %v8004_v52 = vpop.f32.mrf.mxu0  ;;  %v4882_v44 = vsel %vm7421_vm7, %v4850_v47, 0.0  ;;  %vm8665_vm7 = vnez %v8600_v60 }
 0x1f1   : > { %2448 = vst.msk [vmem:[#allocation3 + $0x48] sm:$0xff] %vm225_vm1, %v2416_v61  ;;  %v2415_v33 = vadd.f32 %v2383_v25, %v2256_v22  ;;  %2927 = vst.msk [vmem:[#allocation3 + $0x10] sm:$0xff] %vm225_vm1, %v2895_v21  ;;  %v2898_v39 = vadd.f32 %v6374_v13, %v2866_v56  ;;  %v2392_v21 = vld [vmem:[#allocation3 + $0x88] sm:$0xff] }
 0x1f2   : > { %v6333_v48 = vpop.f32.mrf.mxu1  ;;  %6632 = vmatmul.mubr.msk.f32.gmra.mxu1 %vm225_vm1, %v4880_v37  ;;  %v2865_v20 = vld [vmem:[#allocation3 + $0x20] sm:$0xff]  ;;  %v8011_v32 = vpop.f32.mrf.mxu0 }
 0x1f3   : > { %2447 = vst.msk [vmem:[#allocation3 + $0x40] sm:$0xff] %vm225_vm1, %v2415_v33  ;;  %v2418_v19 = vadd.f32 %v6333_v48, %v2386_v5  ;;  %6634 = vmatprep.mubr.msk.f32.mxu1 %vm225_vm1, %v4849_v43  ;;  %2930 = vst.msk [vmem:[#allocation3 + $0x28] sm:$0xff] %vm225_vm1, %v2898_v39  ;;  %v2897_v18 = vadd.f32 %v2865_v20, %v7977_v54  ;;  %v4852_v54 = vld [vmem:[#allocation2 + $0xa1] sm:$0xff]  ;;  %v2391_v37 = vld [vmem:[#allocation3 + $0x80] sm:$0xff] }
 0x1f4   : > { %v2266_v49 = vpop.f32.mrf.mxu1  ;;  %v2868_v13 = vld [vmem:[#allocation3 + $0x38] sm:$0xff]  ;;  %v8017_v63 = vpop.f32.mrf.mxu0  ;;  %v4884_v7 = vsel %vm7442_vm8, %v4852_v54, 0.0 }
 0x1f5   : > { %2450 = vst.msk [vmem:[#allocation3 + $0x58] sm:$0xff] %vm225_vm1, %v2418_v19  ;;  %v2417_v40 = vadd.f32 %v2385_v9, %v2266_v49  ;;  %2929 = vst.msk [vmem:[#allocation3 + $0x20] sm:$0xff] %vm225_vm1, %v2897_v18  ;;  %v2900_v62 = vadd.f32 %v7981_v42, %v2868_v13  ;;  %v4857_v5 = vld [vmem:[#allocation2 + $0xc9] sm:$0xff] }
 0x1f6   : > { %v6336_v59 = vpop.f32.mrf.mxu1  ;;  %6635 = vmatmul.mubr.msk.f32.gmra.mxu1 %vm225_vm1, %v4882_v44  ;;  %v2867_v14 = vld [vmem:[#allocation3 + $0x30] sm:$0xff]  ;;  %v8025_v38 = vpop.f32.mrf.mxu0  ;;  %v2394_v19 = vld [vmem:[#allocation3 + $0x98] sm:$0xff] }
 0x1f7   : > { %2449 = vst.msk [vmem:[#allocation3 + $0x50] sm:$0xff] %vm225_vm1, %v2417_v40  ;;  %v2420_v17 = vadd.f32 %v6336_v59, %v2388_v10  ;;  %6637 = vmatprep.mubr.msk.f32.mxu1 %vm225_vm1, %v4851_v53  ;;  %2932 = vst.msk [vmem:[#allocation3 + $0x38] sm:$0xff] %vm225_vm1, %v2900_v62  ;;  %v2899_v58 = vadd.f32 %v2867_v14, %v7987_v27  ;;  %v4854_v27 = vld [vmem:[#allocation2 + $0xb1] sm:$0xff]  ;;  %v2393_v40 = vld [vmem:[#allocation3 + $0x90] sm:$0xff] }
 0x1f8   : > { %v2276_v45 = vpop.f32.mrf.mxu1  ;;  %v2870_v42 = vld [vmem:[#allocation3 + $0x48] sm:$0xff]  ;;  %v8031_v6 = vpop.f32.mrf.mxu0  ;;  %v4886_v29 = vsel %vm7463_vm9, %v4854_v27, 0.0  ;;  %v2398_v27 = vld [vmem:[#allocation3 + $0xb8] sm:$0xff] }
 0x1f9   : > { %2452 = vst.msk [vmem:[#allocation3 + $0x68] sm:$0xff] %vm225_vm1, %v2420_v17  ;;  %v2419_v4 = vadd.f32 %v2387_v11, %v2276_v45  ;;  %2931 = vst.msk [vmem:[#allocation3 + $0x30] sm:$0xff] %vm225_vm1, %v2899_v58  ;;  %v2902_v46 = vadd.f32 %v7992_v51, %v2870_v42  ;;  %v4859_v59 = vld [vmem:[#allocation2 + $0xd9] sm:$0xff]  ;;  %v4860_v17 = vld [vmem:[#allocation2 + $0xe1] sm:$0xff] }
 0x1fa   : > { %v6339_v23 = vpop.f32.mrf.mxu1  ;;  %6638 = vmatmul.mubr.msk.f32.gmra.mxu1 %vm225_vm1, %v4884_v7  ;;  %v2869_v28 = vld [vmem:[#allocation3 + $0x40] sm:$0xff]  ;;  %v8039_v55 = vpop.f32.mrf.mxu0  ;;  %v2396_v14 = vld [vmem:[#allocation3 + $0xa8] sm:$0xff] }
 0x1fb   : > { %2451 = vst.msk [vmem:[#allocation3 + $0x60] sm:$0xff] %vm225_vm1, %v2419_v4  ;;  %v2422_v50 = vadd.f32 %v6339_v23, %v2390_v12  ;;  %6640 = vmatprep.mubr.msk.f32.mxu1 %vm225_vm1, %v4853_v41  ;;  %2934 = vst.msk [vmem:[#allocation3 + $0x48] sm:$0xff] %vm225_vm1, %v2902_v46  ;;  %v2901_v1 = vadd.f32 %v2869_v28, %v7999_v34  ;;  %v4856_v34 = vld [vmem:[#allocation2 + $0xc1] sm:$0xff]  ;;  %v2395_v42 = vld [vmem:[#allocation3 + $0xa0] sm:$0xff]  ;;  %v4892_v41 = vsel %vm7526_vm12, %v4860_v17, 0.0 }
 0x1fc   : > { %v2286_v2 = vpop.f32.mrf.mxu1  ;;  %v2872_v51 = vld [vmem:[#allocation3 + $0x58] sm:$0xff]  ;;  %v8045_v36 = vpop.f32.mrf.mxu0  ;;  %v4888_v48 = vsel %vm7484_vm10, %v4856_v34, 0.0  ;;  %v4862_v28 = vld [vmem:[#allocation2 + $0xf1] sm:$0xff] }
 0x1fd   : > { %2454 = vst.msk [vmem:[#allocation3 + $0x78] sm:$0xff] %vm225_vm1, %v2422_v50  ;;  %v2421_v24 = vadd.f32 %v2389_v16, %v2286_v2  ;;  %2933 = vst.msk [vmem:[#allocation3 + $0x40] sm:$0xff] %vm225_vm1, %v2901_v1  ;;  %v2904_v0 = vadd.f32 %v8004_v52, %v2872_v51  ;;  %v4861_v46 = vld [vmem:[#allocation2 + $0xe9] sm:$0xff]  ;;  %v2397_v16 = vld [vmem:[#allocation3 + $0xb0] sm:$0xff] }
 0x1fe   : > { %v6342_v61 = vpop.f32.mrf.mxu1  ;;  %6641 = vmatmul.mubr.msk.f32.gmra.mxu1 %vm225_vm1, %v4886_v29  ;;  %v2871_v22 = vld [vmem:[#allocation3 + $0x50] sm:$0xff]  ;;  %v8053_v56 = vpop.f32.mrf.mxu0  ;;  %v4894_v29 = vsel %vm7547_vm13, %v4862_v28, 0.0 }
 0x1ff   : > { %2453 = vst.msk [vmem:[#allocation3 + $0x70] sm:$0xff] %vm225_vm1, %v2421_v24  ;;  %v2424_v25 = vadd.f32 %v6342_v61, %v2392_v21  ;;  %6643 = vmatprep.mubr.msk.f32.mxu1 %vm225_vm1, %v4855_v31  ;;  %2936 = vst.msk [vmem:[#allocation3 + $0x58] sm:$0xff] %vm225_vm1, %v2904_v0  ;;  %v2903_v30 = vadd.f32 %v2871_v22, %v8011_v32  ;;  %v4858_v32 = vld [vmem:[#allocation2 + $0xd1] sm:$0xff]  ;;  %v4863_v31 = vld [vmem:[#allocation2 + $0xf9] sm:$0xff] }
 0x200   : > { %v2296_v33 = vpop.f32.mrf.mxu1  ;;  %v2874_v52 = vld [vmem:[#allocation3 + $0x68] sm:$0xff]  ;;  %v8059_v39 = vpop.f32.mrf.mxu0  ;;  %v4890_v62 = vsel %vm7505_vm11, %v4858_v32, 0.0  ;;  %v4864_v34 = vld [vmem:[#allocation2 + $0x101] sm:$0xff] }
 0x201   : > { %2456 = vst.msk [vmem:[#allocation3 + $0x88] sm:$0xff] %vm225_vm1, %v2424_v25  ;;  %v2423_v43 = vadd.f32 %v2391_v37, %v2296_v33  ;;  %2935 = vst.msk [vmem:[#allocation3 + $0x50] sm:$0xff] %vm225_vm1, %v2903_v30  ;;  %v2906_v47 = vadd.f32 %v8017_v63, %v2874_v52  ;;  %v2400_v21 = vld [vmem:[#allocation3 + $0xc8] sm:$0xff]  ;;  %v2399_v33 = vld [vmem:[#allocation3 + $0xc0] sm:$0xff] }
 0x202   : > { %v6345_v20 = vpop.f32.mrf.mxu1  ;;  %6644 = vmatmul.mubr.msk.f32.gmra.mxu1 %vm225_vm1, %v4888_v48  ;;  %v2873_v18 = vld [vmem:[#allocation3 + $0x60] sm:$0xff]  ;;  %v8067_v9 = vpop.f32.mrf.mxu0  ;;  %v2405_v28 = vld [vmem:[#allocation3 + $0xf0] sm:$0xff] }
 0x203   : > { %2455 = vst.msk [vmem:[#allocation3 + $0x80] sm:$0xff] %vm225_vm1, %v2423_v43  ;;  %v2426_v49 = vadd.f32 %v6345_v20, %v2394_v19  ;;  %6646 = vmatprep.mubr.msk.f32.mxu1 %vm225_vm1, %v4857_v5  ;;  %2938 = vst.msk [vmem:[#allocation3 + $0x68] sm:$0xff] %vm225_vm1, %v2906_v47  ;;  %v2905_v57 = vadd.f32 %v2873_v18, %v8025_v38  ;;  %v4865_v48 = vld [vmem:[#allocation2 + $0x109] sm:$0xff]  ;;  %v4866_v19 = vld [vmem:[#allocation2 + $0x111] sm:$0xff] }
 0x204   : > { %v2306_v13 = vpop.f32.mrf.mxu1  ;;  %v2876_v63 = vld [vmem:[#allocation3 + $0x78] sm:$0xff]  ;;  %v8073_v53 = vpop.f32.mrf.mxu0 }
 0x205   : > { %2458 = vst.msk [vmem:[#allocation3 + $0x98] sm:$0xff] %vm225_vm1, %v2426_v49  ;;  %v2425_v44 = vadd.f32 %v2393_v40, %v2306_v13  ;;  %2937 = vst.msk [vmem:[#allocation3 + $0x60] sm:$0xff] %vm225_vm1, %v2905_v57  ;;  %v2908_v10 = vadd.f32 %v8031_v6, %v2876_v63  ;;  %v2402_v20 = vld [vmem:[#allocation3 + $0xd8] sm:$0xff]  ;;  %v2401_v13 = vld [vmem:[#allocation3 + $0xd0] sm:$0xff] }
 0x206   : > { %v6348_v54 = vpop.f32.mrf.mxu1  ;;  %6647 = vmatmul.mubr.msk.f32.gmra.mxu1 %vm225_vm1, %v4890_v62  ;;  %v2875_v38 = vld [vmem:[#allocation3 + $0x70] sm:$0xff]  ;;  %v8081_v45 = vpop.f32.mrf.mxu0  ;;  %v4898_v62 = vsel %vm8664_vm6, %v4866_v19, 0.0  ;;  %v3320_v19 = vld [vmem:[#allocation3 + $0x28] sm:$0xff] }
 0x207   : > { %2457 = vst.msk [vmem:[#allocation3 + $0x90] sm:$0xff] %vm225_vm1, %v2425_v44  ;;  %v2428_v58 = vadd.f32 %v6348_v54, %v2396_v14  ;;  %6649 = vmatprep.mubr.msk.f32.mxu1 %vm225_vm1, %v4859_v59  ;;  %2940 = vst.msk [vmem:[#allocation3 + $0x78] sm:$0xff] %vm225_vm1, %v2908_v10  ;;  %v2907_v26 = vadd.f32 %v2875_v38, %v8039_v55  ;;  %v4868_v40 = vld [vmem:[#allocation2 + $0x121] sm:$0xff]  ;;  %v2404_v54 = vld [vmem:[#allocation3 + $0xe8] sm:$0xff] }
 0x208   : > { %v2316_v11 = vpop.f32.mrf.mxu1  ;;  %v2878_v4 = vld [vmem:[#allocation3 + $0x88] sm:$0xff]  ;;  %v8087_v7 = vpop.f32.mrf.mxu0 }
 0x209   : > { %2460 = vst.msk [vmem:[#allocation3 + $0xa8] sm:$0xff] %vm225_vm1, %v2428_v58  ;;  %v2427_v6 = vadd.f32 %v2395_v42, %v2316_v11  ;;  %2939 = vst.msk [vmem:[#allocation3 + $0x70] sm:$0xff] %vm225_vm1, %v2907_v26  ;;  %v2910_v23 = vadd.f32 %v8045_v36, %v2878_v4  ;;  %v4900_v58 = vsel %vm8665_vm7, %v4868_v40, 0.0  ;;  %v2403_v26 = vld [vmem:[#allocation3 + $0xe0] sm:$0xff] }
 0x20a   : > { %v6351_v12 = vpop.f32.mrf.mxu1  ;;  %6650 = vmatmul.mubr.msk.f32.gmra.mxu1 %vm225_vm1, %v4892_v41  ;;  %v2877_v50 = vld [vmem:[#allocation3 + $0x80] sm:$0xff]  ;;  %v8095_v1 = vpop.f32.mrf.mxu0  ;;  %v2406_v41 = vld [vmem:[#allocation3 + $0xf8] sm:$0xff] }
 0x20b   : > { %2459 = vst.msk [vmem:[#allocation3 + $0xa0] sm:$0xff] %vm225_vm1, %v2427_v6  ;;  %v2430_v55 = vadd.f32 %v6351_v12, %v2398_v27  ;;  %6652 = vmatprep.mubr.msk.f32.mxu1 %vm225_vm1, %v4861_v46  ;;  %2942 = vst.msk [vmem:[#allocation3 + $0x88] sm:$0xff] %vm225_vm1, %v2910_v23  ;;  %v2909_v3 = vadd.f32 %v2877_v50, %v8053_v56 }
 0x20c   : > { %v2326_v2 = vpop.f32.mrf.mxu1  ;;  %v2880_v51 = vld [vmem:[#allocation3 + $0x98] sm:$0xff]  ;;  %v8101_v36 = vpop.f32.mrf.mxu0 }
 0x20d   : > { %2462 = vst.msk [vmem:[#allocation3 + $0xb8] sm:$0xff] %vm225_vm1, %v2430_v55  ;;  %v2429_v24 = vadd.f32 %v2397_v16, %v2326_v2  ;;  %2941 = vst.msk [vmem:[#allocation3 + $0x80] sm:$0xff] %vm225_vm1, %v2909_v3  ;;  %v2912_v0 = vadd.f32 %v8059_v39, %v2880_v51  ;;  %v4896_v39 = vsel %vm8663_vm2, %v4864_v34, 0.0  ;;  %v3316_v16 = vld [vmem:[#allocation3 + $0x8] sm:$0xff] }
 0x20e   : > { %v6354_v61 = vpop.f32.mrf.mxu1  ;;  %6653 = vmatmul.mubr.msk.f32.gmra.mxu1 %vm225_vm1, %v4894_v29  ;;  %v2879_v22 = vld [vmem:[#allocation3 + $0x90] sm:$0xff]  ;;  %v8109_v56 = vpop.f32.mrf.mxu0 }
 0x20f   : > { %2461 = vst.msk [vmem:[#allocation3 + $0xb0] sm:$0xff] %vm225_vm1, %v2429_v24  ;;  %v2432_v25 = vadd.f32 %v6354_v61, %v2400_v21  ;;  %6655 = vmatprep.mubr.msk.f32.mxu1 %vm225_vm1, %v4863_v31  ;;  %2944 = vst.msk [vmem:[#allocation3 + $0x98] sm:$0xff] %vm225_vm1, %v2912_v0  ;;  %v2911_v15 = vadd.f32 %v2879_v22, %v8067_v9  ;;  %v4867_v9 = vld [vmem:[#allocation2 + $0x119] sm:$0xff]  ;;  %v3315_v0 = vld [vmem:[#allocation3] sm:$0xff] }
 0x210   : > { %v2336_v30 = vpop.f32.mrf.mxu1  ;;  %v2882_v37 = vld [vmem:[#allocation3 + $0xa8] sm:$0xff]  ;;  %v6407_v43 = vpop.f32.mrf.mxu0 }
 0x211   : > { %2464 = vst.msk [vmem:[#allocation3 + $0xc8] sm:$0xff] %vm225_vm1, %v2432_v25  ;;  %v2431_v52 = vadd.f32 %v2399_v33, %v2336_v30  ;;  %2943 = vst.msk [vmem:[#allocation3 + $0x90] sm:$0xff] %vm225_vm1, %v2911_v15  ;;  %v2914_v5 = vadd.f32 %v8073_v53, %v2882_v37 }
 0x212   : > { %v6357_v47 = vpop.f32.mrf.mxu1  ;;  %6656 = vmatmul.mubr.msk.f32.gmra.mxu1 %vm225_vm1, %v4896_v39  ;;  %v2881_v32 = vld [vmem:[#allocation3 + $0xa0] sm:$0xff]  ;;  %v2832_v49 = vpop.f32.mrf.mxu0 }
 0x213   : > { %2463 = vst.msk [vmem:[#allocation3 + $0xc0] sm:$0xff] %vm225_vm1, %v2431_v52  ;;  %v2434_v18 = vadd.f32 %v6357_v47, %v2402_v20  ;;  %6658 = vmatprep.mubr.msk.f32.mxu1 %vm225_vm1, %v4865_v48  ;;  %2946 = vst.msk [vmem:[#allocation3 + $0xa8] sm:$0xff] %vm225_vm1, %v2914_v5  ;;  %v2913_v8 = vadd.f32 %v2881_v32, %v8081_v45 }
 0x214   : > { %v2346_v57 = vpop.f32.mrf.mxu1  ;;  %v2884_v63 = vld [vmem:[#allocation3 + $0xb8] sm:$0xff]  ;;  %v6410_v53 = vpop.f32.mrf.mxu0 }
 0x215   : > { %2466 = vst.msk [vmem:[#allocation3 + $0xd8] sm:$0xff] %vm225_vm1, %v2434_v18  ;;  %v2433_v44 = vadd.f32 %v2401_v13, %v2346_v57  ;;  %2945 = vst.msk [vmem:[#allocation3 + $0xa0] sm:$0xff] %vm225_vm1, %v2913_v8  ;;  %v2916_v59 = vadd.f32 %v8087_v7, %v2884_v63  ;;  %v3319_v57 = vld [vmem:[#allocation3 + $0x20] sm:$0xff] }
 0x216   : > { %v6360_v10 = vpop.f32.mrf.mxu1  ;;  %6659 = vmatmul.mubr.msk.f32.gmra.mxu1 %vm225_vm1, %v4898_v62  ;;  %v2883_v14 = vld [vmem:[#allocation3 + $0xb0] sm:$0xff]  ;;  %v2842_v38 = vpop.f32.mrf.mxu0  ;;  %v3322_v62 = vld [vmem:[#allocation3 + $0x38] sm:$0xff] }
 0x217   : > { %2465 = vst.msk [vmem:[#allocation3 + $0xd0] sm:$0xff] %vm225_vm1, %v2433_v44  ;;  %v2436_v17 = vadd.f32 %v6360_v10, %v2404_v54  ;;  %6661 = vmatprep.mubr.msk.f32.mxu1 %vm225_vm1, %v4867_v9  ;;  %2948 = vst.msk [vmem:[#allocation3 + $0xb8] sm:$0xff] %vm225_vm1, %v2916_v59  ;;  %v2915_v35 = vadd.f32 %v2883_v14, %v8095_v1 }
 0x218   : > { %v2356_v45 = vpop.f32.mrf.mxu1  ;;  %v2886_v11 = vld [vmem:[#allocation3 + $0xc8] sm:$0xff]  ;;  %v6413_v4 = vpop.f32.mrf.mxu0 }
 0x219   : > { %2468 = vst.msk [vmem:[#allocation3 + $0xe8] sm:$0xff] %vm225_vm1, %v2436_v17  ;;  %v2435_v42 = vadd.f32 %v2403_v26, %v2356_v45  ;;  %2947 = vst.msk [vmem:[#allocation3 + $0xb0] sm:$0xff] %vm225_vm1, %v2915_v35  ;;  %v2918_v6 = vadd.f32 %v8101_v36, %v2886_v11 }
 0x21a   : > { %v6363_v7 = vpop.f32.mrf.mxu1  ;;  %6662 = vmatmul.mubr.msk.f32.gmra.mxu1 %vm225_vm1, %v4900_v58  ;;  %v2885_v60 = vld [vmem:[#allocation3 + $0xc0] sm:$0xff]  ;;  %v2852_v23 = vpop.f32.mrf.mxu0 }
 0x21b   : > { %2467 = vst.msk [vmem:[#allocation3 + $0xe0] sm:$0xff] %vm225_vm1, %v2435_v42  ;;  %v2438_v46 = vadd.f32 %v6363_v7, %v2406_v41  ;;  %2950 = vst.msk [vmem:[#allocation3 + $0xc8] sm:$0xff] %vm225_vm1, %v2918_v6  ;;  %v2917_v12 = vadd.f32 %v2885_v60, %v8109_v56  ;;  %v3318_v56 = vld [vmem:[#allocation3 + $0x18] sm:$0xff]  ;;  %v3324_v42 = vld [vmem:[#allocation3 + $0x48] sm:$0xff] }
 0x21c   : > { %v2366_v27 = vpop.f32.mrf.mxu1  ;;  %v2888_v50 = vld [vmem:[#allocation3 + $0xd8] sm:$0xff]  ;;  %v6468_v1 = vpop.f32.mrf.mxu0 }
 0x21d   : > { %2470 = vst.msk [vmem:[#allocation3 + $0xf8] sm:$0xff] %vm225_vm1, %v2438_v46  ;;  %v2437_v55 = vadd.f32 %v2405_v28, %v2366_v27  ;;  %2949 = vst.msk [vmem:[#allocation3 + $0xc0] sm:$0xff] %vm225_vm1, %v2917_v12  ;;  %v2920_v3 = vadd.f32 %v6407_v43, %v2888_v50  ;;  %v3317_v43 = vld [vmem:[#allocation3 + $0x10] sm:$0xff]  ;;  %v3323_v46 = vld [vmem:[#allocation3 + $0x40] sm:$0xff] }
 0x21e   : > { %v6418_v2 = vpop.f32.mrf.mxu1  ;;  %v2887_v51 = vld [vmem:[#allocation3 + $0xd0] sm:$0xff]  ;;  %v3642_v36 = vpop.f32.mrf.mxu0 }
 0x21f   : > { %2469 = vst.msk [vmem:[#allocation3 + $0xf0] sm:$0xff] %vm225_vm1, %v2437_v55  ;;  %v3348_v24 = vadd.f32 %v6418_v2, %v3316_v16  ;;  %2952 = vst.msk [vmem:[#allocation3 + $0xd8] sm:$0xff] %vm225_vm1, %v2920_v3  ;;  %v2919_v29 = vadd.f32 %v2887_v51, %v2832_v49  ;;  %v3326_v55 = vld [vmem:[#allocation3 + $0x58] sm:$0xff] }
 0x220   : > { %v3156_v31 = vpop.f32.mrf.mxu1  ;;  %v2890_v61 = vld [vmem:[#allocation3 + $0xe8] sm:$0xff]  ;;  %v6471_v34 = vpop.f32.mrf.mxu0 }
 0x221   : > { %3380 = vst.msk [vmem:[#allocation3 + $0x8] sm:$0xff] %vm225_vm1, %v3348_v24  ;;  %v3347_v21 = vadd.f32 %v3315_v0, %v3156_v31  ;;  %2951 = vst.msk [vmem:[#allocation3 + $0xd0] sm:$0xff] %vm225_vm1, %v2919_v29  ;;  %v2922_v22 = vadd.f32 %v6410_v53, %v2890_v61  ;;  %v3325_v24 = vld [vmem:[#allocation3 + $0x50] sm:$0xff] }
 0x222   : > { %v6421_v25 = vpop.f32.mrf.mxu1  ;;  %v2889_v15 = vld [vmem:[#allocation3 + $0xe0] sm:$0xff]  ;;  %v3652_v33 = vpop.f32.mrf.mxu0 }
 0x223   : > { %3379 = vst.msk [vmem:[#allocation3] sm:$0xff] %vm225_vm1, %v3347_v21  ;;  %v3350_v30 = vadd.f32 %v6421_v25, %v3318_v56  ;;  %2954 = vst.msk [vmem:[#allocation3 + $0xe8] sm:$0xff] %vm225_vm1, %v2922_v22  ;;  %v2921_v37 = vadd.f32 %v2889_v15, %v2842_v38  ;;  %v3321_v38 = vld [vmem:[#allocation3 + $0x30] sm:$0xff]  ;;  %v3328_v21 = vld [vmem:[#allocation3 + $0x68] sm:$0xff] }
 0x224   : > { %v3166_v52 = vpop.f32.mrf.mxu1  ;;  %v2892_v39 = vld [vmem:[#allocation3 + $0xf8] sm:$0xff]  ;;  %v6474_v5 = vpop.f32.mrf.mxu0 }
 0x225   : > { %3382 = vst.msk [vmem:[#allocation3 + $0x18] sm:$0xff] %vm225_vm1, %v3350_v30  ;;  %v3349_v48 = vadd.f32 %v3317_v43, %v3166_v52  ;;  %2953 = vst.msk [vmem:[#allocation3 + $0xe0] sm:$0xff] %vm225_vm1, %v2921_v37  ;;  %v2924_v47 = vadd.f32 %v6413_v4, %v2892_v39  ;;  %v3327_v30 = vld [vmem:[#allocation3 + $0x60] sm:$0xff] }
 0x226   : > { %v6424_v20 = vpop.f32.mrf.mxu1  ;;  %v2891_v32 = vld [vmem:[#allocation3 + $0xf0] sm:$0xff]  ;;  %v3662_v49 = vpop.f32.mrf.mxu0 }
 0x227   : > { %3381 = vst.msk [vmem:[#allocation3 + $0x10] sm:$0xff] %vm225_vm1, %v3349_v48  ;;  %v3352_v18 = vadd.f32 %v6424_v20, %v3320_v19  ;;  %2956 = vst.msk [vmem:[#allocation3 + $0xf8] sm:$0xff] %vm225_vm1, %v2924_v47  ;;  %v2923_v9 = vadd.f32 %v2891_v32, %v2852_v23  ;;  %v3330_v48 = vld [vmem:[#allocation3 + $0x78] sm:$0xff] }
 0x228   : > { %v3176_v8 = vpop.f32.mrf.mxu1  ;;  %v3802_v13 = vld [vmem:[#allocation3 + $0x8] sm:$0xff]  ;;  %v6477_v63 = vpop.f32.mrf.mxu0 }
 0x229   : > { %3384 = vst.msk [vmem:[#allocation3 + $0x28] sm:$0xff] %vm225_vm1, %v3352_v18  ;;  %v3351_v40 = vadd.f32 %v3319_v57, %v3176_v8  ;;  %2955 = vst.msk [vmem:[#allocation3 + $0xf0] sm:$0xff] %vm225_vm1, %v2923_v9  ;;  %v3834_v44 = vadd.f32 %v6468_v1, %v3802_v13  ;;  %v3329_v18 = vld [vmem:[#allocation3 + $0x70] sm:$0xff] }
 0x22a   : > { %v6427_v53 = vpop.f32.mrf.mxu1  ;;  %v3801_v59 = vld [vmem:[#allocation3] sm:$0xff]  ;;  %v3672_v54 = vpop.f32.mrf.mxu0 }
 0x22b   : > { %3383 = vst.msk [vmem:[#allocation3 + $0x20] sm:$0xff] %vm225_vm1, %v3351_v40  ;;  %v3354_v10 = vadd.f32 %v6427_v53, %v3322_v62  ;;  %3866 = vst.msk [vmem:[#allocation3 + $0x8] sm:$0xff] %vm225_vm1, %v3834_v44  ;;  %v3833_v14 = vadd.f32 %v3801_v59, %v3642_v36  ;;  %v3332_v40 = vld [vmem:[#allocation3 + $0x88] sm:$0xff] }
 0x22c   : > { %v3186_v17 = vpop.f32.mrf.mxu1  ;;  %v3804_v58 = vld [vmem:[#allocation3 + $0x18] sm:$0xff]  ;;  %v6480_v45 = vpop.f32.mrf.mxu0 }
 0x22d   : > { %3386 = vst.msk [vmem:[#allocation3 + $0x38] sm:$0xff] %vm225_vm1, %v3354_v10  ;;  %v3353_v35 = vadd.f32 %v3321_v38, %v3186_v17  ;;  %3865 = vst.msk [vmem:[#allocation3] sm:$0xff] %vm225_vm1, %v3833_v14  ;;  %v3836_v26 = vadd.f32 %v6471_v34, %v3804_v58  ;;  %v3331_v10 = vld [vmem:[#allocation3 + $0x80] sm:$0xff] }
 0x22e   : > { %v6430_v11 = vpop.f32.mrf.mxu1  ;;  %v3803_v4 = vld [vmem:[#allocation3 + $0x10] sm:$0xff]  ;;  %v3682_v7 = vpop.f32.mrf.mxu0 }
 0x22f   : > { %3385 = vst.msk [vmem:[#allocation3 + $0x30] sm:$0xff] %vm225_vm1, %v3353_v35  ;;  %v3356_v6 = vadd.f32 %v6430_v11, %v3324_v42  ;;  %3868 = vst.msk [vmem:[#allocation3 + $0x18] sm:$0xff] %vm225_vm1, %v3836_v26  ;;  %v3835_v41 = vadd.f32 %v3803_v4, %v3652_v33  ;;  %v3334_v35 = vld [vmem:[#allocation3 + $0x98] sm:$0xff] }
 0x230   : > { %v3196_v60 = vpop.f32.mrf.mxu1  ;;  %v3806_v23 = vld [vmem:[#allocation3 + $0x28] sm:$0xff]  ;;  %v6483_v27 = vpop.f32.mrf.mxu0 }
 0x231   : > { %3388 = vst.msk [vmem:[#allocation3 + $0x48] sm:$0xff] %vm225_vm1, %v3356_v6  ;;  %v3355_v12 = vadd.f32 %v3323_v46, %v3196_v60  ;;  %3867 = vst.msk [vmem:[#allocation3 + $0x10] sm:$0xff] %vm225_vm1, %v3835_v41  ;;  %v3838_v28 = vadd.f32 %v6474_v5, %v3806_v23  ;;  %v3333_v6 = vld [vmem:[#allocation3 + $0x90] sm:$0xff] }
 0x232   : > { %v6433_v50 = vpop.f32.mrf.mxu1  ;;  %v3805_v1 = vld [vmem:[#allocation3 + $0x20] sm:$0xff]  ;;  %v3692_v2 = vpop.f32.mrf.mxu0 }
 0x233   : > { %3387 = vst.msk [vmem:[#allocation3 + $0x40] sm:$0xff] %vm225_vm1, %v3355_v12  ;;  %v3358_v3 = vadd.f32 %v6433_v50, %v3326_v55  ;;  %3870 = vst.msk [vmem:[#allocation3 + $0x28] sm:$0xff] %vm225_vm1, %v3838_v28  ;;  %v3837_v16 = vadd.f32 %v3805_v1, %v3662_v49  ;;  %v3336_v12 = vld [vmem:[#allocation3 + $0xa8] sm:$0xff] }
 0x234   : > { %v3206_v51 = vpop.f32.mrf.mxu1  ;;  %v3808_v36 = vld [vmem:[#allocation3 + $0x38] sm:$0xff]  ;;  %v6486_v31 = vpop.f32.mrf.mxu0 }
 0x235   : > { %3390 = vst.msk [vmem:[#allocation3 + $0x58] sm:$0xff] %vm225_vm1, %v3358_v3  ;;  %v3357_v29 = vadd.f32 %v3325_v24, %v3206_v51  ;;  %3869 = vst.msk [vmem:[#allocation3 + $0x20] sm:$0xff] %vm225_vm1, %v3837_v16  ;;  %v3840_v0 = vadd.f32 %v6477_v63, %v3808_v36  ;;  %v3335_v3 = vld [vmem:[#allocation3 + $0xa0] sm:$0xff] }
 0x236   : > { %v6436_v61 = vpop.f32.mrf.mxu1  ;;  %v3807_v34 = vld [vmem:[#allocation3 + $0x30] sm:$0xff]  ;;  %v3702_v25 = vpop.f32.mrf.mxu0 }
 0x237   : > { %3389 = vst.msk [vmem:[#allocation3 + $0x50] sm:$0xff] %vm225_vm1, %v3357_v29  ;;  %v3360_v22 = vadd.f32 %v6436_v61, %v3328_v21  ;;  %3872 = vst.msk [vmem:[#allocation3 + $0x38] sm:$0xff] %vm225_vm1, %v3840_v0  ;;  %v3839_v56 = vadd.f32 %v3807_v34, %v3672_v54  ;;  %v3338_v29 = vld [vmem:[#allocation3 + $0xb8] sm:$0xff] }
 0x238   : > { %v3216_v15 = vpop.f32.mrf.mxu1  ;;  %v3810_v33 = vld [vmem:[#allocation3 + $0x48] sm:$0xff]  ;;  %v6489_v52 = vpop.f32.mrf.mxu0 }
 0x239   : > { %3392 = vst.msk [vmem:[#allocation3 + $0x68] sm:$0xff] %vm225_vm1, %v3360_v22  ;;  %v3359_v37 = vadd.f32 %v3327_v30, %v3216_v15  ;;  %3871 = vst.msk [vmem:[#allocation3 + $0x30] sm:$0xff] %vm225_vm1, %v3839_v56  ;;  %v3842_v43 = vadd.f32 %v6480_v45, %v3810_v33  ;;  %v3337_v22 = vld [vmem:[#allocation3 + $0xb0] sm:$0xff] }
 0x23a   : > { %v6439_v39 = vpop.f32.mrf.mxu1  ;;  %v3809_v5 = vld [vmem:[#allocation3 + $0x40] sm:$0xff]  ;;  %v3712_v20 = vpop.f32.mrf.mxu0 }
 0x23b   : > { %3391 = vst.msk [vmem:[#allocation3 + $0x60] sm:$0xff] %vm225_vm1, %v3359_v37  ;;  %v3362_v47 = vadd.f32 %v6439_v39, %v3330_v48  ;;  %3874 = vst.msk [vmem:[#allocation3 + $0x48] sm:$0xff] %vm225_vm1, %v3842_v43  ;;  %v3841_v19 = vadd.f32 %v3809_v5, %v3682_v7  ;;  %v3340_v37 = vld [vmem:[#allocation3 + $0xc8] sm:$0xff] }
 0x23c   : > { %v3226_v32 = vpop.f32.mrf.mxu1  ;;  %v3812_v49 = vld [vmem:[#allocation3 + $0x58] sm:$0xff]  ;;  %v6492_v8 = vpop.f32.mrf.mxu0 }
 0x23d   : > { %3394 = vst.msk [vmem:[#allocation3 + $0x78] sm:$0xff] %vm225_vm1, %v3362_v47  ;;  %v3361_v9 = vadd.f32 %v3329_v18, %v3226_v32  ;;  %3873 = vst.msk [vmem:[#allocation3 + $0x40] sm:$0xff] %vm225_vm1, %v3841_v19  ;;  %v3844_v57 = vadd.f32 %v6483_v27, %v3812_v49  ;;  %v3339_v47 = vld [vmem:[#allocation3 + $0xc0] sm:$0xff] }
 0x23e   : > { %v6442_v13 = vpop.f32.mrf.mxu1  ;;  %v3811_v63 = vld [vmem:[#allocation3 + $0x50] sm:$0xff]  ;;  %v3722_v53 = vpop.f32.mrf.mxu0 }
 0x23f   : > { %3393 = vst.msk [vmem:[#allocation3 + $0x70] sm:$0xff] %vm225_vm1, %v3361_v9  ;;  %v3364_v44 = vadd.f32 %v6442_v13, %v3332_v40  ;;  %3876 = vst.msk [vmem:[#allocation3 + $0x58] sm:$0xff] %vm225_vm1, %v3844_v57  ;;  %v3843_v62 = vadd.f32 %v3811_v63, %v3692_v2  ;;  %v3342_v9 = vld [vmem:[#allocation3 + $0xd8] sm:$0xff] }
 0x240   : > { %v3236_v59 = vpop.f32.mrf.mxu1  ;;  %v3814_v54 = vld [vmem:[#allocation3 + $0x68] sm:$0xff]  ;;  %v6495_v17 = vpop.f32.mrf.mxu0 }
 0x241   : > { %3396 = vst.msk [vmem:[#allocation3 + $0x88] sm:$0xff] %vm225_vm1, %v3364_v44  ;;  %v3363_v14 = vadd.f32 %v3331_v10, %v3236_v59  ;;  %3875 = vst.msk [vmem:[#allocation3 + $0x50] sm:$0xff] %vm225_vm1, %v3843_v62  ;;  %v3846_v38 = vadd.f32 %v6486_v31, %v3814_v54  ;;  %v3341_v44 = vld [vmem:[#allocation3 + $0xd0] sm:$0xff] }
 0x242   : > { %v6445_v58 = vpop.f32.mrf.mxu1  ;;  %v3813_v45 = vld [vmem:[#allocation3 + $0x60] sm:$0xff]  ;;  %v3732_v11 = vpop.f32.mrf.mxu0 }
 0x243   : > { %3395 = vst.msk [vmem:[#allocation3 + $0x80] sm:$0xff] %vm225_vm1, %v3363_v14  ;;  %v3366_v26 = vadd.f32 %v6445_v58, %v3334_v35  ;;  %3878 = vst.msk [vmem:[#allocation3 + $0x68] sm:$0xff] %vm225_vm1, %v3846_v38  ;;  %v3845_v42 = vadd.f32 %v3813_v45, %v3702_v25  ;;  %v3344_v14 = vld [vmem:[#allocation3 + $0xe8] sm:$0xff] }
 0x244   : > { %v3246_v4 = vpop.f32.mrf.mxu1  ;;  %v3816_v7 = vld [vmem:[#allocation3 + $0x78] sm:$0xff]  ;;  %v6498_v60 = vpop.f32.mrf.mxu0 }
 0x245   : > { %3398 = vst.msk [vmem:[#allocation3 + $0x98] sm:$0xff] %vm225_vm1, %v3366_v26  ;;  %v3365_v41 = vadd.f32 %v3333_v6, %v3246_v4  ;;  %3877 = vst.msk [vmem:[#allocation3 + $0x60] sm:$0xff] %vm225_vm1, %v3845_v42  ;;  %v3848_v46 = vadd.f32 %v6489_v52, %v3816_v7  ;;  %v3343_v26 = vld [vmem:[#allocation3 + $0xe0] sm:$0xff] }
 0x246   : > { %v6448_v23 = vpop.f32.mrf.mxu1  ;;  %v3815_v27 = vld [vmem:[#allocation3 + $0x70] sm:$0xff]  ;;  %v3742_v50 = vpop.f32.mrf.mxu0 }
 0x247   : > { %3397 = vst.msk [vmem:[#allocation3 + $0x90] sm:$0xff] %vm225_vm1, %v3365_v41  ;;  %v3368_v28 = vadd.f32 %v6448_v23, %v3336_v12  ;;  %3880 = vst.msk [vmem:[#allocation3 + $0x78] sm:$0xff] %vm225_vm1, %v3848_v46  ;;  %v3847_v55 = vadd.f32 %v3815_v27, %v3712_v20  ;;  %v3346_v41 = vld [vmem:[#allocation3 + $0xf8] sm:$0xff] }
 0x248   : > { %v3256_v1 = vpop.f32.mrf.mxu1  ;;  %v3818_v2 = vld [vmem:[#allocation3 + $0x88] sm:$0xff]  ;;  %v6501_v51 = vpop.f32.mrf.mxu0 }
 0x249   : > { %3400 = vst.msk [vmem:[#allocation3 + $0xa8] sm:$0xff] %vm225_vm1, %v3368_v28  ;;  %v3367_v16 = vadd.f32 %v3335_v3, %v3256_v1  ;;  %3879 = vst.msk [vmem:[#allocation3 + $0x70] sm:$0xff] %vm225_vm1, %v3847_v55  ;;  %v3850_v24 = vadd.f32 %v6492_v8, %v3818_v2  ;;  %v3345_v28 = vld [vmem:[#allocation3 + $0xf0] sm:$0xff] }
 0x24a   : > { %v6451_v36 = vpop.f32.mrf.mxu1  ;;  %v3817_v31 = vld [vmem:[#allocation3 + $0x80] sm:$0xff]  ;;  %v3752_v61 = vpop.f32.mrf.mxu0 }
 0x24b   : > { %3399 = vst.msk [vmem:[#allocation3 + $0xa0] sm:$0xff] %vm225_vm1, %v3367_v16  ;;  %v3370_v0 = vadd.f32 %v6451_v36, %v3338_v29  ;;  %3882 = vst.msk [vmem:[#allocation3 + $0x88] sm:$0xff] %vm225_vm1, %v3850_v24  ;;  %v3849_v21 = vadd.f32 %v3817_v31, %v3722_v53  ;;  %v4288_v16 = vld [vmem:[#allocation3 + $0x8] sm:$0xff] }
 0x24c   : > { %v3266_v34 = vpop.f32.mrf.mxu1  ;;  %v3820_v25 = vld [vmem:[#allocation3 + $0x98] sm:$0xff]  ;;  %v6504_v15 = vpop.f32.mrf.mxu0 }
 0x24d   : > { %3402 = vst.msk [vmem:[#allocation3 + $0xb8] sm:$0xff] %vm225_vm1, %v3370_v0  ;;  %v3369_v56 = vadd.f32 %v3337_v22, %v3266_v34  ;;  %3881 = vst.msk [vmem:[#allocation3 + $0x80] sm:$0xff] %vm225_vm1, %v3849_v21  ;;  %v3852_v30 = vadd.f32 %v6495_v17, %v3820_v25  ;;  %v4287_v0 = vld [vmem:[#allocation3] sm:$0xff] }
 0x24e   : > { %v6454_v33 = vpop.f32.mrf.mxu1  ;;  %v3819_v52 = vld [vmem:[#allocation3 + $0x90] sm:$0xff]  ;;  %v3762_v39 = vpop.f32.mrf.mxu0 }
 0x24f   : > { %3401 = vst.msk [vmem:[#allocation3 + $0xb0] sm:$0xff] %vm225_vm1, %v3369_v56  ;;  %v3372_v43 = vadd.f32 %v6454_v33, %v3340_v37  ;;  %3884 = vst.msk [vmem:[#allocation3 + $0x98] sm:$0xff] %vm225_vm1, %v3852_v30  ;;  %v3851_v48 = vadd.f32 %v3819_v52, %v3732_v11  ;;  %v4290_v56 = vld [vmem:[#allocation3 + $0x18] sm:$0xff] }
 0x250   : > { %v3276_v5 = vpop.f32.mrf.mxu1  ;;  %v3822_v20 = vld [vmem:[#allocation3 + $0xa8] sm:$0xff]  ;;  %v6507_v32 = vpop.f32.mrf.mxu0 }
 0x251   : > { %3404 = vst.msk [vmem:[#allocation3 + $0xc8] sm:$0xff] %vm225_vm1, %v3372_v43  ;;  %v3371_v19 = vadd.f32 %v3339_v47, %v3276_v5  ;;  %3883 = vst.msk [vmem:[#allocation3 + $0x90] sm:$0xff] %vm225_vm1, %v3851_v48  ;;  %v3854_v18 = vadd.f32 %v6498_v60, %v3822_v20  ;;  %v4289_v43 = vld [vmem:[#allocation3 + $0x10] sm:$0xff] }
 0x252   : > { %v6457_v49 = vpop.f32.mrf.mxu1  ;;  %v3821_v8 = vld [vmem:[#allocation3 + $0xa0] sm:$0xff]  ;;  %v3772_v13 = vpop.f32.mrf.mxu0 }
 0x253   : > { %3403 = vst.msk [vmem:[#allocation3 + $0xc0] sm:$0xff] %vm225_vm1, %v3371_v19  ;;  %v3374_v57 = vadd.f32 %v6457_v49, %v3342_v9  ;;  %3886 = vst.msk [vmem:[#allocation3 + $0xa8] sm:$0xff] %vm225_vm1, %v3854_v18  ;;  %v3853_v40 = vadd.f32 %v3821_v8, %v3742_v50  ;;  %v4292_v19 = vld [vmem:[#allocation3 + $0x28] sm:$0xff] }
 0x254   : > { %v3286_v63 = vpop.f32.mrf.mxu1  ;;  %v3824_v53 = vld [vmem:[#allocation3 + $0xb8] sm:$0xff]  ;;  %v6510_v59 = vpop.f32.mrf.mxu0 }
 0x255   : > { %3406 = vst.msk [vmem:[#allocation3 + $0xd8] sm:$0xff] %vm225_vm1, %v3374_v57  ;;  %v3373_v62 = vadd.f32 %v3341_v44, %v3286_v63  ;;  %3885 = vst.msk [vmem:[#allocation3 + $0xa0] sm:$0xff] %vm225_vm1, %v3853_v40  ;;  %v3856_v10 = vadd.f32 %v6501_v51, %v3824_v53  ;;  %v4291_v57 = vld [vmem:[#allocation3 + $0x20] sm:$0xff] }
 0x256   : > { %v6460_v54 = vpop.f32.mrf.mxu1  ;;  %v3823_v17 = vld [vmem:[#allocation3 + $0xb0] sm:$0xff]  ;;  %v3782_v58 = vpop.f32.mrf.mxu0 }
 0x257   : > { %3405 = vst.msk [vmem:[#allocation3 + $0xd0] sm:$0xff] %vm225_vm1, %v3373_v62  ;;  %v3376_v38 = vadd.f32 %v6460_v54, %v3344_v14  ;;  %3888 = vst.msk [vmem:[#allocation3 + $0xb8] sm:$0xff] %vm225_vm1, %v3856_v10  ;;  %v3855_v35 = vadd.f32 %v3823_v17, %v3752_v61  ;;  %v4294_v62 = vld [vmem:[#allocation3 + $0x38] sm:$0xff] }
 0x258   : > { %v3296_v45 = vpop.f32.mrf.mxu1  ;;  %v3826_v11 = vld [vmem:[#allocation3 + $0xc8] sm:$0xff]  ;;  %v6513_v4 = vpop.f32.mrf.mxu0 }
 0x259   : > { %3408 = vst.msk [vmem:[#allocation3 + $0xe8] sm:$0xff] %vm225_vm1, %v3376_v38  ;;  %v3375_v42 = vadd.f32 %v3343_v26, %v3296_v45  ;;  %3887 = vst.msk [vmem:[#allocation3 + $0xb0] sm:$0xff] %vm225_vm1, %v3855_v35  ;;  %v3858_v6 = vadd.f32 %v6504_v15, %v3826_v11  ;;  %v4293_v38 = vld [vmem:[#allocation3 + $0x30] sm:$0xff] }
 0x25a   : > { %v6463_v7 = vpop.f32.mrf.mxu1  ;;  %v3825_v60 = vld [vmem:[#allocation3 + $0xc0] sm:$0xff]  ;;  %v3792_v23 = vpop.f32.mrf.mxu0 }
 0x25b   : > { %3407 = vst.msk [vmem:[#allocation3 + $0xe0] sm:$0xff] %vm225_vm1, %v3375_v42  ;;  %v3378_v46 = vadd.f32 %v6463_v7, %v3346_v41  ;;  %3890 = vst.msk [vmem:[#allocation3 + $0xc8] sm:$0xff] %vm225_vm1, %v3858_v6  ;;  %v3857_v12 = vadd.f32 %v3825_v60, %v3762_v39  ;;  %v4296_v42 = vld [vmem:[#allocation3 + $0x48] sm:$0xff] }
 0x25c   : > { %v3306_v27 = vpop.f32.mrf.mxu1  ;;  %v3828_v50 = vld [vmem:[#allocation3 + $0xd8] sm:$0xff]  ;;  %v6568_v1 = vpop.f32.mrf.mxu0 }
 0x25d   : > { %3410 = vst.msk [vmem:[#allocation3 + $0xf8] sm:$0xff] %vm225_vm1, %v3378_v46  ;;  %v3377_v55 = vadd.f32 %v3345_v28, %v3306_v27  ;;  %3889 = vst.msk [vmem:[#allocation3 + $0xc0] sm:$0xff] %vm225_vm1, %v3857_v12  ;;  %v3860_v3 = vadd.f32 %v6507_v32, %v3828_v50  ;;  %v4295_v46 = vld [vmem:[#allocation3 + $0x40] sm:$0xff] }
 0x25e   : > { %v6518_v2 = vpop.f32.mrf.mxu1  ;;  %v3827_v51 = vld [vmem:[#allocation3 + $0xd0] sm:$0xff]  ;;  %v4582_v36 = vpop.f32.mrf.mxu0 }
 0x25f   : > { %3409 = vst.msk [vmem:[#allocation3 + $0xf0] sm:$0xff] %vm225_vm1, %v3377_v55  ;;  %v4320_v24 = vadd.f32 %v6518_v2, %v4288_v16  ;;  %3892 = vst.msk [vmem:[#allocation3 + $0xd8] sm:$0xff] %vm225_vm1, %v3860_v3  ;;  %v3859_v29 = vadd.f32 %v3827_v51, %v3772_v13  ;;  %v4298_v55 = vld [vmem:[#allocation3 + $0x58] sm:$0xff] }
 0x260   : > { %v4128_v31 = vpop.f32.mrf.mxu1  ;;  %v3830_v61 = vld [vmem:[#allocation3 + $0xe8] sm:$0xff]  ;;  %v6571_v34 = vpop.f32.mrf.mxu0 }
 0x261   : > { %4352 = vst.msk [vmem:[#allocation3 + $0x8] sm:$0xff] %vm225_vm1, %v4320_v24  ;;  %v4319_v21 = vadd.f32 %v4287_v0, %v4128_v31  ;;  %3891 = vst.msk [vmem:[#allocation3 + $0xd0] sm:$0xff] %vm225_vm1, %v3859_v29  ;;  %v3862_v22 = vadd.f32 %v6510_v59, %v3830_v61  ;;  %v4297_v24 = vld [vmem:[#allocation3 + $0x50] sm:$0xff] }
 0x262   : > { %v6521_v25 = vpop.f32.mrf.mxu1  ;;  %v3829_v15 = vld [vmem:[#allocation3 + $0xe0] sm:$0xff]  ;;  %v4592_v33 = vpop.f32.mrf.mxu0 }
 0x263   : > { %4351 = vst.msk [vmem:[#allocation3] sm:$0xff] %vm225_vm1, %v4319_v21  ;;  %v4322_v30 = vadd.f32 %v6521_v25, %v4290_v56  ;;  %3894 = vst.msk [vmem:[#allocation3 + $0xe8] sm:$0xff] %vm225_vm1, %v3862_v22  ;;  %v3861_v37 = vadd.f32 %v3829_v15, %v3782_v58  ;;  %v4300_v21 = vld [vmem:[#allocation3 + $0x68] sm:$0xff] }
 0x264   : > { %v4138_v52 = vpop.f32.mrf.mxu1  ;;  %v3832_v39 = vld [vmem:[#allocation3 + $0xf8] sm:$0xff]  ;;  %v6574_v5 = vpop.f32.mrf.mxu0 }
 0x265   : > { %4354 = vst.msk [vmem:[#allocation3 + $0x18] sm:$0xff] %vm225_vm1, %v4322_v30  ;;  %v4321_v48 = vadd.f32 %v4289_v43, %v4138_v52  ;;  %3893 = vst.msk [vmem:[#allocation3 + $0xe0] sm:$0xff] %vm225_vm1, %v3861_v37  ;;  %v3864_v47 = vadd.f32 %v6513_v4, %v3832_v39  ;;  %v4299_v30 = vld [vmem:[#allocation3 + $0x60] sm:$0xff] }
 0x266   : > { %v6524_v20 = vpop.f32.mrf.mxu1  ;;  %v3831_v32 = vld [vmem:[#allocation3 + $0xf0] sm:$0xff]  ;;  %v4602_v49 = vpop.f32.mrf.mxu0 }
 0x267   : > { %4353 = vst.msk [vmem:[#allocation3 + $0x10] sm:$0xff] %vm225_vm1, %v4321_v48  ;;  %v4324_v18 = vadd.f32 %v6524_v20, %v4292_v19  ;;  %3896 = vst.msk [vmem:[#allocation3 + $0xf8] sm:$0xff] %vm225_vm1, %v3864_v47  ;;  %v3863_v9 = vadd.f32 %v3831_v32, %v3792_v23  ;;  %v4302_v48 = vld [vmem:[#allocation3 + $0x78] sm:$0xff] }
 0x268   : > { %v4148_v8 = vpop.f32.mrf.mxu1  ;;  %v4742_v13 = vld [vmem:[#allocation3 + $0x8] sm:$0xff]  ;;  %v6577_v63 = vpop.f32.mrf.mxu0 }
 0x269   : > { %4356 = vst.msk [vmem:[#allocation3 + $0x28] sm:$0xff] %vm225_vm1, %v4324_v18  ;;  %v4323_v40 = vadd.f32 %v4291_v57, %v4148_v8  ;;  %3895 = vst.msk [vmem:[#allocation3 + $0xf0] sm:$0xff] %vm225_vm1, %v3863_v9  ;;  %v4774_v44 = vadd.f32 %v6568_v1, %v4742_v13  ;;  %v4301_v18 = vld [vmem:[#allocation3 + $0x70] sm:$0xff] }
 0x26a   : > { %v6527_v53 = vpop.f32.mrf.mxu1  ;;  %v4741_v59 = vld [vmem:[#allocation3] sm:$0xff]  ;;  %v4612_v54 = vpop.f32.mrf.mxu0 }
 0x26b   : > { %4355 = vst.msk [vmem:[#allocation3 + $0x20] sm:$0xff] %vm225_vm1, %v4323_v40  ;;  %v4326_v10 = vadd.f32 %v6527_v53, %v4294_v62  ;;  %4806 = vst.msk [vmem:[#allocation3 + $0x8] sm:$0xff] %vm225_vm1, %v4774_v44  ;;  %v4773_v14 = vadd.f32 %v4741_v59, %v4582_v36  ;;  %v4304_v40 = vld [vmem:[#allocation3 + $0x88] sm:$0xff] }
 0x26c   : > { %v4158_v17 = vpop.f32.mrf.mxu1  ;;  %v4744_v58 = vld [vmem:[#allocation3 + $0x18] sm:$0xff]  ;;  %v6580_v45 = vpop.f32.mrf.mxu0 }
 0x26d   : > { %4358 = vst.msk [vmem:[#allocation3 + $0x38] sm:$0xff] %vm225_vm1, %v4326_v10  ;;  %v4325_v35 = vadd.f32 %v4293_v38, %v4158_v17  ;;  %4805 = vst.msk [vmem:[#allocation3] sm:$0xff] %vm225_vm1, %v4773_v14  ;;  %v4776_v26 = vadd.f32 %v6571_v34, %v4744_v58  ;;  %v4303_v10 = vld [vmem:[#allocation3 + $0x80] sm:$0xff] }
 0x26e   : > { %v6530_v11 = vpop.f32.mrf.mxu1  ;;  %v4743_v4 = vld [vmem:[#allocation3 + $0x10] sm:$0xff]  ;;  %v4622_v7 = vpop.f32.mrf.mxu0 }
 0x26f   : > { %4357 = vst.msk [vmem:[#allocation3 + $0x30] sm:$0xff] %vm225_vm1, %v4325_v35  ;;  %v4328_v6 = vadd.f32 %v6530_v11, %v4296_v42  ;;  %4808 = vst.msk [vmem:[#allocation3 + $0x18] sm:$0xff] %vm225_vm1, %v4776_v26  ;;  %v4775_v41 = vadd.f32 %v4743_v4, %v4592_v33  ;;  %v4306_v35 = vld [vmem:[#allocation3 + $0x98] sm:$0xff] }
 0x270   : > { %v4168_v60 = vpop.f32.mrf.mxu1  ;;  %v4746_v23 = vld [vmem:[#allocation3 + $0x28] sm:$0xff]  ;;  %v6583_v27 = vpop.f32.mrf.mxu0 }
 0x271   : > { %4360 = vst.msk [vmem:[#allocation3 + $0x48] sm:$0xff] %vm225_vm1, %v4328_v6  ;;  %v4327_v12 = vadd.f32 %v4295_v46, %v4168_v60  ;;  %4807 = vst.msk [vmem:[#allocation3 + $0x10] sm:$0xff] %vm225_vm1, %v4775_v41  ;;  %v4778_v28 = vadd.f32 %v6574_v5, %v4746_v23  ;;  %v4305_v6 = vld [vmem:[#allocation3 + $0x90] sm:$0xff] }
 0x272   : > { %v6533_v50 = vpop.f32.mrf.mxu1  ;;  %v4745_v1 = vld [vmem:[#allocation3 + $0x20] sm:$0xff]  ;;  %v4632_v2 = vpop.f32.mrf.mxu0 }
 0x273   : > { %4359 = vst.msk [vmem:[#allocation3 + $0x40] sm:$0xff] %vm225_vm1, %v4327_v12  ;;  %v4330_v3 = vadd.f32 %v6533_v50, %v4298_v55  ;;  %4810 = vst.msk [vmem:[#allocation3 + $0x28] sm:$0xff] %vm225_vm1, %v4778_v28  ;;  %v4777_v16 = vadd.f32 %v4745_v1, %v4602_v49  ;;  %v4308_v12 = vld [vmem:[#allocation3 + $0xa8] sm:$0xff] }
 0x274   : > { %v4178_v51 = vpop.f32.mrf.mxu1  ;;  %v4748_v36 = vld [vmem:[#allocation3 + $0x38] sm:$0xff]  ;;  %v6586_v31 = vpop.f32.mrf.mxu0 }
 0x275   : > { %4362 = vst.msk [vmem:[#allocation3 + $0x58] sm:$0xff] %vm225_vm1, %v4330_v3  ;;  %v4329_v29 = vadd.f32 %v4297_v24, %v4178_v51  ;;  %4809 = vst.msk [vmem:[#allocation3 + $0x20] sm:$0xff] %vm225_vm1, %v4777_v16  ;;  %v4780_v0 = vadd.f32 %v6577_v63, %v4748_v36  ;;  %v4307_v3 = vld [vmem:[#allocation3 + $0xa0] sm:$0xff] }
 0x276   : > { %v6536_v61 = vpop.f32.mrf.mxu1  ;;  %v4747_v34 = vld [vmem:[#allocation3 + $0x30] sm:$0xff]  ;;  %v4642_v25 = vpop.f32.mrf.mxu0 }
 0x277   : > { %4361 = vst.msk [vmem:[#allocation3 + $0x50] sm:$0xff] %vm225_vm1, %v4329_v29  ;;  %v4332_v22 = vadd.f32 %v6536_v61, %v4300_v21  ;;  %4812 = vst.msk [vmem:[#allocation3 + $0x38] sm:$0xff] %vm225_vm1, %v4780_v0  ;;  %v4779_v56 = vadd.f32 %v4747_v34, %v4612_v54  ;;  %v4310_v29 = vld [vmem:[#allocation3 + $0xb8] sm:$0xff] }
 0x278   : > { %v4188_v15 = vpop.f32.mrf.mxu1  ;;  %v4750_v33 = vld [vmem:[#allocation3 + $0x48] sm:$0xff]  ;;  %v6589_v52 = vpop.f32.mrf.mxu0 }
 0x279   : > { %4364 = vst.msk [vmem:[#allocation3 + $0x68] sm:$0xff] %vm225_vm1, %v4332_v22  ;;  %v4331_v37 = vadd.f32 %v4299_v30, %v4188_v15  ;;  %4811 = vst.msk [vmem:[#allocation3 + $0x30] sm:$0xff] %vm225_vm1, %v4779_v56  ;;  %v4782_v43 = vadd.f32 %v6580_v45, %v4750_v33  ;;  %v4309_v22 = vld [vmem:[#allocation3 + $0xb0] sm:$0xff] }
 0x27a   : > { %v6539_v39 = vpop.f32.mrf.mxu1  ;;  %v4749_v5 = vld [vmem:[#allocation3 + $0x40] sm:$0xff]  ;;  %v4652_v20 = vpop.f32.mrf.mxu0 }
 0x27b   : > { %4363 = vst.msk [vmem:[#allocation3 + $0x60] sm:$0xff] %vm225_vm1, %v4331_v37  ;;  %v4334_v47 = vadd.f32 %v6539_v39, %v4302_v48  ;;  %4814 = vst.msk [vmem:[#allocation3 + $0x48] sm:$0xff] %vm225_vm1, %v4782_v43  ;;  %v4781_v19 = vadd.f32 %v4749_v5, %v4622_v7  ;;  %v4312_v37 = vld [vmem:[#allocation3 + $0xc8] sm:$0xff] }
 0x27c   : > { %v4198_v32 = vpop.f32.mrf.mxu1  ;;  %v4752_v49 = vld [vmem:[#allocation3 + $0x58] sm:$0xff]  ;;  %v6592_v8 = vpop.f32.mrf.mxu0 }
 0x27d   : > { %4366 = vst.msk [vmem:[#allocation3 + $0x78] sm:$0xff] %vm225_vm1, %v4334_v47  ;;  %v4333_v9 = vadd.f32 %v4301_v18, %v4198_v32  ;;  %4813 = vst.msk [vmem:[#allocation3 + $0x40] sm:$0xff] %vm225_vm1, %v4781_v19  ;;  %v4784_v57 = vadd.f32 %v6583_v27, %v4752_v49  ;;  %v4311_v47 = vld [vmem:[#allocation3 + $0xc0] sm:$0xff] }
 0x27e   : > { %v6542_v13 = vpop.f32.mrf.mxu1  ;;  %v4751_v63 = vld [vmem:[#allocation3 + $0x50] sm:$0xff]  ;;  %v4662_v53 = vpop.f32.mrf.mxu0 }
 0x27f   : > { %4365 = vst.msk [vmem:[#allocation3 + $0x70] sm:$0xff] %vm225_vm1, %v4333_v9  ;;  %v4336_v44 = vadd.f32 %v6542_v13, %v4304_v40  ;;  %4816 = vst.msk [vmem:[#allocation3 + $0x58] sm:$0xff] %vm225_vm1, %v4784_v57  ;;  %v4783_v62 = vadd.f32 %v4751_v63, %v4632_v2  ;;  %v4314_v9 = vld [vmem:[#allocation3 + $0xd8] sm:$0xff]  ;;  %v4313_v63 = vld [vmem:[#allocation3 + $0xd0] sm:$0xff] }
 0x280   : > { %v4208_v59 = vpop.f32.mrf.mxu1  ;;  %v4754_v54 = vld [vmem:[#allocation3 + $0x68] sm:$0xff]  ;;  %v6595_v17 = vpop.f32.mrf.mxu0 }
 0x281   : > { %4368 = vst.msk [vmem:[#allocation3 + $0x88] sm:$0xff] %vm225_vm1, %v4336_v44  ;;  %v4335_v14 = vadd.f32 %v4303_v10, %v4208_v59  ;;  %4815 = vst.msk [vmem:[#allocation3 + $0x50] sm:$0xff] %vm225_vm1, %v4783_v62  ;;  %v4786_v38 = vadd.f32 %v6586_v31, %v4754_v54  ;;  %v4316_v54 = vld [vmem:[#allocation3 + $0xe8] sm:$0xff] }
 0x282   : > { %v6545_v58 = vpop.f32.mrf.mxu1  ;;  %v4753_v45 = vld [vmem:[#allocation3 + $0x60] sm:$0xff]  ;;  %v4672_v11 = vpop.f32.mrf.mxu0 }
 0x283   : > { %4367 = vst.msk [vmem:[#allocation3 + $0x80] sm:$0xff] %vm225_vm1, %v4335_v14  ;;  %v4338_v26 = vadd.f32 %v6545_v58, %v4306_v35  ;;  %4818 = vst.msk [vmem:[#allocation3 + $0x68] sm:$0xff] %vm225_vm1, %v4786_v38  ;;  %v4785_v42 = vadd.f32 %v4753_v45, %v4642_v25  ;;  %v4315_v35 = vld [vmem:[#allocation3 + $0xe0] sm:$0xff] }
 0x284   : > { %v4218_v4 = vpop.f32.mrf.mxu1  ;;  %v4756_v7 = vld [vmem:[#allocation3 + $0x78] sm:$0xff]  ;;  %v6598_v60 = vpop.f32.mrf.mxu0 }
 0x285   : > { %4370 = vst.msk [vmem:[#allocation3 + $0x98] sm:$0xff] %vm225_vm1, %v4338_v26  ;;  %v4337_v41 = vadd.f32 %v4305_v6, %v4218_v4  ;;  %4817 = vst.msk [vmem:[#allocation3 + $0x60] sm:$0xff] %vm225_vm1, %v4785_v42  ;;  %v4788_v46 = vadd.f32 %v6589_v52, %v4756_v7  ;;  %v4318_v6 = vld [vmem:[#allocation3 + $0xf8] sm:$0xff] }
 0x286   : > { %v6548_v23 = vpop.f32.mrf.mxu1  ;;  %v4755_v27 = vld [vmem:[#allocation3 + $0x70] sm:$0xff]  ;;  %v4682_v50 = vpop.f32.mrf.mxu0 }
 0x287   : > { %4369 = vst.msk [vmem:[#allocation3 + $0x90] sm:$0xff] %vm225_vm1, %v4337_v41  ;;  %v4340_v28 = vadd.f32 %v6548_v23, %v4308_v12  ;;  %4820 = vst.msk [vmem:[#allocation3 + $0x78] sm:$0xff] %vm225_vm1, %v4788_v46  ;;  %v4787_v55 = vadd.f32 %v4755_v27, %v4652_v20  ;;  %v4317_v23 = vld [vmem:[#allocation3 + $0xf0] sm:$0xff] }
 0x288   : > { %v4228_v1 = vpop.f32.mrf.mxu1  ;;  %v4758_v2 = vld [vmem:[#allocation3 + $0x88] sm:$0xff]  ;;  %v6601_v51 = vpop.f32.mrf.mxu0 }
 0x289   : > { %4372 = vst.msk [vmem:[#allocation3 + $0xa8] sm:$0xff] %vm225_vm1, %v4340_v28  ;;  %v4339_v16 = vadd.f32 %v4307_v3, %v4228_v1  ;;  %4819 = vst.msk [vmem:[#allocation3 + $0x70] sm:$0xff] %vm225_vm1, %v4787_v55  ;;  %v4790_v24 = vadd.f32 %v6592_v8, %v4758_v2  ;;  %v5228_v1 = vld [vmem:[#allocation3 + $0x8] sm:$0xff] }
 0x28a   : > { %v6551_v36 = vpop.f32.mrf.mxu1  ;;  %v4757_v31 = vld [vmem:[#allocation3 + $0x80] sm:$0xff]  ;;  %v4692_v61 = vpop.f32.mrf.mxu0 }
 0x28b   : > { %4371 = vst.msk [vmem:[#allocation3 + $0xa0] sm:$0xff] %vm225_vm1, %v4339_v16  ;;  %v4342_v0 = vadd.f32 %v6551_v36, %v4310_v29  ;;  %4822 = vst.msk [vmem:[#allocation3 + $0x88] sm:$0xff] %vm225_vm1, %v4790_v24  ;;  %v4789_v21 = vadd.f32 %v4757_v31, %v4662_v53  ;;  %v5227_v24 = vld [vmem:[#allocation3] sm:$0xff] }
 0x28c   : > { %v4238_v34 = vpop.f32.mrf.mxu1  ;;  %v4760_v25 = vld [vmem:[#allocation3 + $0x98] sm:$0xff]  ;;  %v6604_v15 = vpop.f32.mrf.mxu0 }
 0x28d   : > { %4374 = vst.msk [vmem:[#allocation3 + $0xb8] sm:$0xff] %vm225_vm1, %v4342_v0  ;;  %v4341_v56 = vadd.f32 %v4309_v22, %v4238_v34  ;;  %4821 = vst.msk [vmem:[#allocation3 + $0x80] sm:$0xff] %vm225_vm1, %v4789_v21  ;;  %v4792_v30 = vadd.f32 %v6595_v17, %v4760_v25  ;;  %v5230_v21 = vld [vmem:[#allocation3 + $0x18] sm:$0xff] }
 0x28e   : > { %v6554_v33 = vpop.f32.mrf.mxu1  ;;  %v4759_v52 = vld [vmem:[#allocation3 + $0x90] sm:$0xff]  ;;  %v4702_v39 = vpop.f32.mrf.mxu0 }
 0x28f   : > { %4373 = vst.msk [vmem:[#allocation3 + $0xb0] sm:$0xff] %vm225_vm1, %v4341_v56  ;;  %v4344_v43 = vadd.f32 %v6554_v33, %v4312_v37  ;;  %4824 = vst.msk [vmem:[#allocation3 + $0x98] sm:$0xff] %vm225_vm1, %v4792_v30  ;;  %v4791_v48 = vadd.f32 %v4759_v52, %v4672_v11  ;;  %v5229_v30 = vld [vmem:[#allocation3 + $0x10] sm:$0xff] }
 0x290   : > { %v4248_v5 = vpop.f32.mrf.mxu1  ;;  %v4762_v20 = vld [vmem:[#allocation3 + $0xa8] sm:$0xff]  ;;  %v6607_v18 = vpop.f32.mrf.mxu0 }
 0x291   : > { %4376 = vst.msk [vmem:[#allocation3 + $0xc8] sm:$0xff] %vm225_vm1, %v4344_v43  ;;  %v4343_v19 = vadd.f32 %v4311_v47, %v4248_v5  ;;  %4823 = vst.msk [vmem:[#allocation3 + $0x90] sm:$0xff] %vm225_vm1, %v4791_v48  ;;  %v4794_v32 = vadd.f32 %v6598_v60, %v4762_v20  ;;  %v8284_v43 = vld [vmem:[%s8427_s4] ss:$0 sm:$0xff]  ;;  %v5232_v5 = vld [vmem:[#allocation3 + $0x28] sm:$0xff] }
 0x292   : > { %v6557_v49 = vpop.f32.mrf.mxu1  ;;  %v4761_v8 = vld [vmem:[#allocation3 + $0xa0] sm:$0xff]  ;;  %v4712_v59 = vpop.f32.mrf.mxu0 }
 0x293   : > { %4375 = vst.msk [vmem:[#allocation3 + $0xc0] sm:$0xff] %vm225_vm1, %v4343_v19  ;;  %v4346_v57 = vadd.f32 %v6557_v49, %v4314_v9  ;;  %4826 = vst.msk [vmem:[#allocation3 + $0xa8] sm:$0xff] %vm225_vm1, %v4794_v32  ;;  %v4793_v13 = vadd.f32 %v4761_v8, %v4682_v50 }
 0x294   : > { %v4258_v40 = vpop.f32.mrf.mxu1  ;;  %v4764_v44 = vld [vmem:[#allocation3 + $0xb8] sm:$0xff]  ;;  %v6610_v42 = vpop.f32.mrf.mxu0 }
 0x295   : > { %4378 = vst.msk [vmem:[#allocation3 + $0xd8] sm:$0xff] %vm225_vm1, %v4346_v57  ;;  %v4345_v53 = vadd.f32 %v4313_v63, %v4258_v40  ;;  %4825 = vst.msk [vmem:[#allocation3 + $0xa0] sm:$0xff] %vm225_vm1, %v4793_v13  ;;  %v4796_v62 = vadd.f32 %v6601_v51, %v4764_v44  ;;  %v5234_v13 = vld [vmem:[#allocation3 + $0x38] sm:$0xff] }
 0x296   : > { %v6560_v10 = vpop.f32.mrf.mxu1  ;;  %v4763_v14 = vld [vmem:[#allocation3 + $0xb0] sm:$0xff]  ;;  %v4722_v50 = vpop.f32.mrf.mxu0 }
 0x297   : > { %4377 = vst.msk [vmem:[#allocation3 + $0xd0] sm:$0xff] %vm225_vm1, %v4345_v53  ;;  %v4348_v17 = vadd.f32 %v6560_v10, %v4316_v54  ;;  %4828 = vst.msk [vmem:[#allocation3 + $0xb8] sm:$0xff] %vm225_vm1, %v4796_v62  ;;  %v4795_v38 = vadd.f32 %v4763_v14, %v4692_v61  ;;  %v5233_v62 = vld [vmem:[#allocation3 + $0x30] sm:$0xff] }
 0x298   : > { %v4268_v58 = vpop.f32.mrf.mxu1  ;;  %v4766_v45 = vld [vmem:[#allocation3 + $0xc8] sm:$0xff]  ;;  %v6613_v36 = vpop.f32.mrf.mxu0 }
 0x299   : > { %4380 = vst.msk [vmem:[#allocation3 + $0xe8] sm:$0xff] %vm225_vm1, %v4348_v17  ;;  %v4347_v26 = vadd.f32 %v4315_v35, %v4268_v58  ;;  %4827 = vst.msk [vmem:[#allocation3 + $0xb0] sm:$0xff] %vm225_vm1, %v4795_v38  ;;  %v4798_v11 = vadd.f32 %v6604_v15, %v4766_v45  ;;  %v5236_v17 = vld [vmem:[#allocation3 + $0x48] sm:$0xff] }
 0x29a   : > { %v6563_v4 = vpop.f32.mrf.mxu1  ;;  %v4765_v7 = vld [vmem:[#allocation3 + $0xc0] sm:$0xff]  ;;  %v4732_v33 = vpop.f32.mrf.mxu0 }
 0x29b   : > { %4379 = vst.msk [vmem:[#allocation3 + $0xe0] sm:$0xff] %vm225_vm1, %v4347_v26  ;;  %v4350_v41 = vadd.f32 %v6563_v4, %v4318_v6  ;;  %4830 = vst.msk [vmem:[#allocation3 + $0xc8] sm:$0xff] %vm225_vm1, %v4798_v11  ;;  %v4797_v60 = vadd.f32 %v4765_v7, %v4702_v39  ;;  %v5235_v26 = vld [vmem:[#allocation3 + $0x40] sm:$0xff]  ;;  %v5238_v7 = vld [vmem:[#allocation3 + $0x58] sm:$0xff] }
 0x29c   : > { %v4278_v46 = vpop.f32.mrf.mxu1  ;;  %v4768_v12 = vld [vmem:[#allocation3 + $0xd8] sm:$0xff] }
 0x29d   : > { %4382 = vst.msk [vmem:[#allocation3 + $0xf8] sm:$0xff] %vm225_vm1, %v4350_v41  ;;  %v4349_v27 = vadd.f32 %v4317_v23, %v4278_v46  ;;  %4829 = vst.msk [vmem:[#allocation3 + $0xc0] sm:$0xff] %vm225_vm1, %v4797_v60  ;;  %v4800_v28 = vadd.f32 %v6607_v18, %v4768_v12  ;;  %v5231_v18 = vld [vmem:[#allocation3 + $0x20] sm:$0xff]  ;;  %v5237_v12 = vld [vmem:[#allocation3 + $0x50] sm:$0xff] }
 0x29e   : > { %v6618_v55 = vpop.f32.mrf.mxu1  ;;  %v4767_v3 = vld [vmem:[#allocation3 + $0xd0] sm:$0xff] }
 0x29f   : > { %4381 = vst.msk [vmem:[#allocation3 + $0xf0] sm:$0xff] %vm225_vm1, %v4349_v27  ;;  %v5260_v2 = vadd.f32 %v6618_v55, %v5228_v1  ;;  %4832 = vst.msk [vmem:[#allocation3 + $0xd8] sm:$0xff] %vm225_vm1, %v4800_v28  ;;  %v4799_v16 = vadd.f32 %v4767_v3, %v4712_v59  ;;  %v5240_v1 = vld [vmem:[#allocation3 + $0x68] sm:$0xff] }
 0x2a0   : > { %v5068_v51 = vpop.f32.mrf.mxu1  ;;  %v4770_v29 = vld [vmem:[#allocation3 + $0xe8] sm:$0xff] }
 0x2a1   : > { %5292 = vst.msk [vmem:[#allocation3 + $0x8] sm:$0xff] %vm225_vm1, %v5260_v2  ;;  %v5259_v31 = vadd.f32 %v5227_v24, %v5068_v51  ;;  %4831 = vst.msk [vmem:[#allocation3 + $0xd0] sm:$0xff] %vm225_vm1, %v4799_v16  ;;  %v4802_v0 = vadd.f32 %v6610_v42, %v4770_v29  ;;  %v5239_v24 = vld [vmem:[#allocation3 + $0x60] sm:$0xff] }
 0x2a2   : > { %v6621_v61 = vpop.f32.mrf.mxu1  ;;  %v4769_v34 = vld [vmem:[#allocation3 + $0xe0] sm:$0xff] }
 0x2a3   : > { %5291 = vst.msk [vmem:[#allocation3] sm:$0xff] %vm225_vm1, %v5259_v31  ;;  %v5262_v22 = vadd.f32 %v6621_v61, %v5230_v21  ;;  %4834 = vst.msk [vmem:[#allocation3 + $0xe8] sm:$0xff] %vm225_vm1, %v4802_v0  ;;  %v4801_v25 = vadd.f32 %v4769_v34, %v4722_v50  ;;  %v5242_v61 = vld [vmem:[#allocation3 + $0x78] sm:$0xff] }
 0x2a4   : > { %v4772_v56 = vld [vmem:[#allocation3 + $0xf8] sm:$0xff]  ;;  %v5078_v15 = vpop.f32.mrf.mxu1 }
 0x2a5   : > { %5294 = vst.msk [vmem:[#allocation3 + $0x18] sm:$0xff] %vm225_vm1, %v5262_v22  ;;  %v4804_v37 = vadd.f32 %v6613_v36, %v4772_v56  ;;  %v5261_v52 = vadd.f32 %v5229_v30, %v5078_v15  ;;  %4833 = vst.msk [vmem:[#allocation3 + $0xe0] sm:$0xff] %vm225_vm1, %v4801_v25  ;;  %v5241_v56 = vld [vmem:[#allocation3 + $0x70] sm:$0xff] }
 0x2a6   : > { %v4771_v39 = vld [vmem:[#allocation3 + $0xf0] sm:$0xff]  ;;  %v6624_v48 = vpop.f32.mrf.mxu1 }
 0x2a7   : > { %4836 = vst.msk [vmem:[#allocation3 + $0xf8] sm:$0xff] %vm225_vm1, %v4804_v37  ;;  %5293 = vst.msk [vmem:[#allocation3 + $0x10] sm:$0xff] %vm225_vm1, %v5261_v52  ;;  %v4803_v47 = vadd.f32 %v4771_v39, %v4732_v33  ;;  %v5264_v20 = vadd.f32 %v6624_v48, %v5232_v5  ;;  %v5244_v52 = vld [vmem:[#allocation3 + $0x88] sm:$0xff] }
 0x2a8   : > { %v5324_v19 = vld [vmem:[#allocation3 + $0x8] sm:$0xff]  ;;  %v5088_v32 = vpop.f32.mrf.mxu1 }
 0x2a9   : > { %v5363_v49 = vadd.f32 %v8284_v43, %v5324_v19  ;;  %4835 = vst.msk [vmem:[#allocation3 + $0xf0] sm:$0xff] %vm225_vm1, %v4803_v47  ;;  %5296 = vst.msk [vmem:[#allocation3 + $0x28] sm:$0xff] %vm225_vm1, %v5264_v20  ;;  %v5263_v9 = vadd.f32 %v5231_v18, %v5088_v32  ;;  %v5243_v20 = vld [vmem:[#allocation3 + $0x80] sm:$0xff] }
 0x2aa   : > { %v5323_v8 = vld [vmem:[#allocation3] sm:$0xff]  ;;  %v6627_v57 = vpop.f32.mrf.mxu1 }
 0x2ab   : > { %5395 = vst.msk [vmem:[%s8293_s28 + $0x8] sm:$0xff] %vm225_vm1, %v5363_v49  ;;  %v5362_v40 = vadd.f32 %v8284_v43, %v5323_v8  ;;  %5295 = vst.msk [vmem:[#allocation3 + $0x20] sm:$0xff] %vm225_vm1, %v5263_v9  ;;  %v5266_v63 = vadd.f32 %v6627_v57, %v5234_v13  ;;  %v5246_v9 = vld [vmem:[#allocation3 + $0x98] sm:$0xff] }
 0x2ac   : > { %v5326_v44 = vld [vmem:[#allocation3 + $0x18] sm:$0xff]  ;;  %v5098_v53 = vpop.f32.mrf.mxu1 }
 0x2ad   : > { %5394 = vst.msk [vmem:[%s8293_s28] sm:$0xff] %vm225_vm1, %v5362_v40  ;;  %v5365_v59 = vadd.f32 %v8284_v43, %v5326_v44  ;;  %5298 = vst.msk [vmem:[#allocation3 + $0x38] sm:$0xff] %vm225_vm1, %v5266_v63  ;;  %v5265_v10 = vadd.f32 %v5233_v62, %v5098_v53  ;;  %v5245_v63 = vld [vmem:[#allocation3 + $0x90] sm:$0xff] }
 0x2ae   : > { %v5325_v54 = vld [vmem:[#allocation3 + $0x10] sm:$0xff]  ;;  %v6630_v14 = vpop.f32.mrf.mxu1 }
 0x2af   : > { %5397 = vst.msk [vmem:[%s8293_s28 + $0x18] sm:$0xff] %vm225_vm1, %v5365_v59  ;;  %v5364_v38 = vadd.f32 %v8284_v43, %v5325_v54  ;;  %5297 = vst.msk [vmem:[#allocation3 + $0x30] sm:$0xff] %vm225_vm1, %v5265_v10  ;;  %v5268_v58 = vadd.f32 %v6630_v14, %v5236_v17  ;;  %v5248_v10 = vld [vmem:[#allocation3 + $0xa8] sm:$0xff] }
 0x2b0   : > { %v5328_v35 = vld [vmem:[#allocation3 + $0x28] sm:$0xff]  ;;  %v5108_v45 = vpop.f32.mrf.mxu1 }
 0x2b1   : > { %5396 = vst.msk [vmem:[%s8293_s28 + $0x10] sm:$0xff] %vm225_vm1, %v5364_v38  ;;  %v5367_v11 = vadd.f32 %v8284_v43, %v5328_v35  ;;  %5300 = vst.msk [vmem:[#allocation3 + $0x48] sm:$0xff] %vm225_vm1, %v5268_v58  ;;  %v5267_v42 = vadd.f32 %v5235_v26, %v5108_v45  ;;  %v5247_v58 = vld [vmem:[#allocation3 + $0xa0] sm:$0xff] }
 0x2b2   : > { %v5327_v4 = vld [vmem:[#allocation3 + $0x20] sm:$0xff]  ;;  %v6633_v6 = vpop.f32.mrf.mxu1 }
 0x2b3   : > { %5399 = vst.msk [vmem:[%s8293_s28 + $0x28] sm:$0xff] %vm225_vm1, %v5367_v11  ;;  %v5366_v41 = vadd.f32 %v8284_v43, %v5327_v4  ;;  %5299 = vst.msk [vmem:[#allocation3 + $0x40] sm:$0xff] %vm225_vm1, %v5267_v42  ;;  %v5270_v60 = vadd.f32 %v6633_v6, %v5238_v7  ;;  %v5250_v42 = vld [vmem:[#allocation3 + $0xb8] sm:$0xff] }
 0x2b4   : > { %v5330_v46 = vld [vmem:[#allocation3 + $0x38] sm:$0xff]  ;;  %v5118_v23 = vpop.f32.mrf.mxu1 }
 0x2b5   : > { %5398 = vst.msk [vmem:[%s8293_s28 + $0x20] sm:$0xff] %vm225_vm1, %v5366_v41  ;;  %v5369_v27 = vadd.f32 %v8284_v43, %v5330_v46  ;;  %5302 = vst.msk [vmem:[#allocation3 + $0x58] sm:$0xff] %vm225_vm1, %v5270_v60  ;;  %v5269_v28 = vadd.f32 %v5237_v12, %v5118_v23  ;;  %v5249_v60 = vld [vmem:[#allocation3 + $0xb0] sm:$0xff] }
 0x2b6   : > { %v5329_v50 = vld [vmem:[#allocation3 + $0x30] sm:$0xff]  ;;  %v6636_v55 = vpop.f32.mrf.mxu1 }
 0x2b7   : > { %5401 = vst.msk [vmem:[%s8293_s28 + $0x38] sm:$0xff] %vm225_vm1, %v5369_v27  ;;  %v5368_v3 = vadd.f32 %v8284_v43, %v5329_v50  ;;  %5301 = vst.msk [vmem:[#allocation3 + $0x50] sm:$0xff] %vm225_vm1, %v5269_v28  ;;  %v5272_v2 = vadd.f32 %v6636_v55, %v5240_v1  ;;  %v5252_v28 = vld [vmem:[#allocation3 + $0xc8] sm:$0xff] }
 0x2b8   : > { %v5332_v16 = vld [vmem:[#allocation3 + $0x48] sm:$0xff]  ;;  %v5128_v51 = vpop.f32.mrf.mxu1 }
 0x2b9   : > { %5400 = vst.msk [vmem:[%s8293_s28 + $0x30] sm:$0xff] %vm225_vm1, %v5368_v3  ;;  %v5371_v36 = vadd.f32 %v8284_v43, %v5332_v16  ;;  %5304 = vst.msk [vmem:[#allocation3 + $0x68] sm:$0xff] %vm225_vm1, %v5272_v2  ;;  %v5271_v29 = vadd.f32 %v5239_v24, %v5128_v51  ;;  %v5251_v2 = vld [vmem:[#allocation3 + $0xc0] sm:$0xff] }
 0x2ba   : > { %v5331_v31 = vld [vmem:[#allocation3 + $0x40] sm:$0xff]  ;;  %v6639_v0 = vpop.f32.mrf.mxu1 }
 0x2bb   : > { %5403 = vst.msk [vmem:[%s8293_s28 + $0x48] sm:$0xff] %vm225_vm1, %v5371_v36  ;;  %v5370_v21 = vadd.f32 %v8284_v43, %v5331_v31  ;;  %5303 = vst.msk [vmem:[#allocation3 + $0x60] sm:$0xff] %vm225_vm1, %v5271_v29  ;;  %v5274_v34 = vadd.f32 %v6639_v0, %v5242_v61  ;;  %v5254_v29 = vld [vmem:[#allocation3 + $0xd8] sm:$0xff] }
 0x2bc   : > { %v5334_v22 = vld [vmem:[#allocation3 + $0x58] sm:$0xff]  ;;  %v5138_v25 = vpop.f32.mrf.mxu1 }
 0x2bd   : > { %5402 = vst.msk [vmem:[%s8293_s28 + $0x40] sm:$0xff] %vm225_vm1, %v5370_v21  ;;  %v5373_v15 = vadd.f32 %v8284_v43, %v5334_v22  ;;  %5306 = vst.msk [vmem:[#allocation3 + $0x78] sm:$0xff] %vm225_vm1, %v5274_v34  ;;  %v5273_v30 = vadd.f32 %v5241_v56, %v5138_v25  ;;  %v5253_v34 = vld [vmem:[#allocation3 + $0xd0] sm:$0xff] }
 0x2be   : > { %v5333_v33 = vld [vmem:[#allocation3 + $0x50] sm:$0xff]  ;;  %v6642_v37 = vpop.f32.mrf.mxu1 }
 0x2bf   : > { %5405 = vst.msk [vmem:[%s8293_s28 + $0x58] sm:$0xff] %vm225_vm1, %v5373_v15  ;;  %v5372_v39 = vadd.f32 %v8284_v43, %v5333_v33  ;;  %5305 = vst.msk [vmem:[#allocation3 + $0x70] sm:$0xff] %vm225_vm1, %v5273_v30  ;;  %v5276_v48 = vadd.f32 %v6642_v37, %v5244_v52  ;;  %v5256_v30 = vld [vmem:[#allocation3 + $0xe8] sm:$0xff] }
 0x2c0   : > { %v5336_v5 = vld [vmem:[#allocation3 + $0x68] sm:$0xff]  ;;  %v5148_v47 = vpop.f32.mrf.mxu1 }
 0x2c1   : > { %5404 = vst.msk [vmem:[%s8293_s28 + $0x50] sm:$0xff] %vm225_vm1, %v5372_v39  ;;  %v5375_v19 = vadd.f32 %v8284_v43, %v5336_v5  ;;  %5308 = vst.msk [vmem:[#allocation3 + $0x88] sm:$0xff] %vm225_vm1, %v5276_v48  ;;  %v5275_v32 = vadd.f32 %v5243_v20, %v5148_v47  ;;  %v5255_v48 = vld [vmem:[#allocation3 + $0xe0] sm:$0xff] }
 0x2c2   : > { %v5335_v18 = vld [vmem:[#allocation3 + $0x60] sm:$0xff]  ;;  %v6645_v49 = vpop.f32.mrf.mxu1 }
 0x2c3   : > { %5407 = vst.msk [vmem:[%s8293_s28 + $0x68] sm:$0xff] %vm225_vm1, %v5375_v19  ;;  %v5374_v8 = vadd.f32 %v8284_v43, %v5335_v18  ;;  %5307 = vst.msk [vmem:[#allocation3 + $0x80] sm:$0xff] %vm225_vm1, %v5275_v32  ;;  %v5278_v57 = vadd.f32 %v6645_v49, %v5246_v9  ;;  %v5258_v32 = vld [vmem:[#allocation3 + $0xf8] sm:$0xff] }
 0x2c4   : > { %v5338_v13 = vld [vmem:[#allocation3 + $0x78] sm:$0xff]  ;;  %v5158_v40 = vpop.f32.mrf.mxu1 }
 0x2c5   : > { %5406 = vst.msk [vmem:[%s8293_s28 + $0x60] sm:$0xff] %vm225_vm1, %v5374_v8  ;;  %v5377_v44 = vadd.f32 %v8284_v43, %v5338_v13  ;;  %5310 = vst.msk [vmem:[#allocation3 + $0x98] sm:$0xff] %vm225_vm1, %v5278_v57  ;;  %v5277_v53 = vadd.f32 %v5245_v63, %v5158_v40  ;;  %v5257_v57 = vld [vmem:[#allocation3 + $0xf0] sm:$0xff] }
 0x2c6   : > { %v5337_v62 = vld [vmem:[#allocation3 + $0x70] sm:$0xff]  ;;  %v6648_v59 = vpop.f32.mrf.mxu1 }
 0x2c7   : > { %5409 = vst.msk [vmem:[%s8293_s28 + $0x78] sm:$0xff] %vm225_vm1, %v5377_v44  ;;  %v5376_v54 = vadd.f32 %v8284_v43, %v5337_v62  ;;  %5309 = vst.msk [vmem:[#allocation3 + $0x90] sm:$0xff] %vm225_vm1, %v5277_v53  ;;  %v5280_v14 = vadd.f32 %v6648_v59, %v5248_v10 }
 0x2c8   : > { %v5340_v17 = vld [vmem:[#allocation3 + $0x88] sm:$0xff]  ;;  %v5168_v38 = vpop.f32.mrf.mxu1 }
 0x2c9   : > { %5408 = vst.msk [vmem:[%s8293_s28 + $0x70] sm:$0xff] %vm225_vm1, %v5376_v54  ;;  %v5379_v35 = vadd.f32 %v8284_v43, %v5340_v17  ;;  %5312 = vst.msk [vmem:[#allocation3 + $0xa8] sm:$0xff] %vm225_vm1, %v5280_v14  ;;  %v5279_v45 = vadd.f32 %v5247_v58, %v5168_v38 }
 0x2ca   : > { %v5339_v26 = vld [vmem:[#allocation3 + $0x80] sm:$0xff]  ;;  %v6651_v11 = vpop.f32.mrf.mxu1 }
 0x2cb   : > { %5411 = vst.msk [vmem:[%s8293_s28 + $0x88] sm:$0xff] %vm225_vm1, %v5379_v35  ;;  %v5378_v4 = vadd.f32 %v8284_v43, %v5339_v26  ;;  %5311 = vst.msk [vmem:[#allocation3 + $0xa0] sm:$0xff] %vm225_vm1, %v5279_v45  ;;  %v5282_v6 = vadd.f32 %v6651_v11, %v5250_v42 }
 0x2cc   : > { %v5342_v7 = vld [vmem:[#allocation3 + $0x98] sm:$0xff]  ;;  %v5178_v41 = vpop.f32.mrf.mxu1 }
 0x2cd   : > { %5410 = vst.msk [vmem:[%s8293_s28 + $0x80] sm:$0xff] %vm225_vm1, %v5378_v4  ;;  %v5381_v46 = vadd.f32 %v8284_v43, %v5342_v7  ;;  %5314 = vst.msk [vmem:[#allocation3 + $0xb8] sm:$0xff] %vm225_vm1, %v5282_v6  ;;  %v5281_v23 = vadd.f32 %v5249_v60, %v5178_v41 }
 0x2ce   : > { %v5341_v12 = vld [vmem:[#allocation3 + $0x90] sm:$0xff]  ;;  %v6654_v27 = vpop.f32.mrf.mxu1 }
 0x2cf   : > { %5413 = vst.msk [vmem:[%s8293_s28 + $0x98] sm:$0xff] %vm225_vm1, %v5381_v46  ;;  %v5380_v50 = vadd.f32 %v8284_v43, %v5341_v12  ;;  %5313 = vst.msk [vmem:[#allocation3 + $0xb0] sm:$0xff] %vm225_vm1, %v5281_v23  ;;  %v5284_v55 = vadd.f32 %v6654_v27, %v5252_v28 }
 0x2d0   : > { %v5344_v1 = vld [vmem:[#allocation3 + $0xa8] sm:$0xff]  ;;  %v5188_v3 = vpop.f32.mrf.mxu1 }
 0x2d1   : > { %5412 = vst.msk [vmem:[%s8293_s28 + $0x90] sm:$0xff] %vm225_vm1, %v5380_v50  ;;  %v5383_v16 = vadd.f32 %v8284_v43, %v5344_v1  ;;  %5316 = vst.msk [vmem:[#allocation3 + $0xc8] sm:$0xff] %vm225_vm1, %v5284_v55  ;;  %v5283_v51 = vadd.f32 %v5251_v2, %v5188_v3 }
 0x2d2   : > { %v5343_v24 = vld [vmem:[#allocation3 + $0xa0] sm:$0xff]  ;;  %v6657_v36 = vpop.f32.mrf.mxu1 }
 0x2d3   : > { %5415 = vst.msk [vmem:[%s8293_s28 + $0xa8] sm:$0xff] %vm225_vm1, %v5383_v16  ;;  %v5382_v31 = vadd.f32 %v8284_v43, %v5343_v24  ;;  %5315 = vst.msk [vmem:[#allocation3 + $0xc0] sm:$0xff] %vm225_vm1, %v5283_v51  ;;  %v5286_v0 = vadd.f32 %v6657_v36, %v5254_v29 }
 0x2d4   : > { %v5346_v61 = vld [vmem:[#allocation3 + $0xb8] sm:$0xff]  ;;  %v5198_v21 = vpop.f32.mrf.mxu1 }
 0x2d5   : > { %5414 = vst.msk [vmem:[%s8293_s28 + $0xa0] sm:$0xff] %vm225_vm1, %v5382_v31  ;;  %v5385_v22 = vadd.f32 %v8284_v43, %v5346_v61  ;;  %5318 = vst.msk [vmem:[#allocation3 + $0xd8] sm:$0xff] %vm225_vm1, %v5286_v0  ;;  %v5285_v25 = vadd.f32 %v5253_v34, %v5198_v21 }
 0x2d6   : > { %v5345_v56 = vld [vmem:[#allocation3 + $0xb0] sm:$0xff]  ;;  %v6660_v15 = vpop.f32.mrf.mxu1 }
 0x2d7   : > { %5417 = vst.msk [vmem:[%s8293_s28 + $0xb8] sm:$0xff] %vm225_vm1, %v5385_v22  ;;  %v5384_v33 = vadd.f32 %v8284_v43, %v5345_v56  ;;  %5317 = vst.msk [vmem:[#allocation3 + $0xd0] sm:$0xff] %vm225_vm1, %v5285_v25  ;;  %v5288_v37 = vadd.f32 %v6660_v15, %v5256_v30 }
 0x2d8   : > { %v5348_v52 = vld [vmem:[#allocation3 + $0xc8] sm:$0xff]  ;;  %v5208_v39 = vpop.f32.mrf.mxu1 }
 0x2d9   : > { %5416 = vst.msk [vmem:[%s8293_s28 + $0xb0] sm:$0xff] %vm225_vm1, %v5384_v33  ;;  %v5387_v5 = vadd.f32 %v8284_v43, %v5348_v52  ;;  %5320 = vst.msk [vmem:[#allocation3 + $0xe8] sm:$0xff] %vm225_vm1, %v5288_v37  ;;  %v5287_v47 = vadd.f32 %v5255_v48, %v5208_v39 }
 0x2da   : > { %v5347_v20 = vld [vmem:[#allocation3 + $0xc0] sm:$0xff]  ;;  %v6663_v19 = vpop.f32.mrf.mxu1 }
 0x2db   : > { %5419 = vst.msk [vmem:[%s8293_s28 + $0xc8] sm:$0xff] %vm225_vm1, %v5387_v5  ;;  %v5386_v18 = vadd.f32 %v8284_v43, %v5347_v20  ;;  %5319 = vst.msk [vmem:[#allocation3 + $0xe0] sm:$0xff] %vm225_vm1, %v5287_v47  ;;  %v5290_v49 = vadd.f32 %v6663_v19, %v5258_v32 }
 0x2dc   : > { %v5350_v9 = vld [vmem:[#allocation3 + $0xd8] sm:$0xff]  ;;  %v5218_v8 = vpop.f32.mrf.mxu1 }
 0x2dd   : > { %5418 = vst.msk [vmem:[%s8293_s28 + $0xc0] sm:$0xff] %vm225_vm1, %v5386_v18  ;;  %v5389_v13 = vadd.f32 %v8284_v43, %v5350_v9  ;;  %5322 = vst.msk [vmem:[#allocation3 + $0xf8] sm:$0xff] %vm225_vm1, %v5290_v49  ;;  %v5289_v40 = vadd.f32 %v5257_v57, %v5218_v8 }
 0x2de   : > { %v5349_v63 = vld [vmem:[#allocation3 + $0xd0] sm:$0xff] }
 0x2df   : > { %5421 = vst.msk [vmem:[%s8293_s28 + $0xd8] sm:$0xff] %vm225_vm1, %v5389_v13  ;;  %v5388_v44 = vadd.f32 %v8284_v43, %v5349_v63  ;;  %5321 = vst.msk [vmem:[#allocation3 + $0xf0] sm:$0xff] %vm225_vm1, %v5289_v40 }
 0x2e0   : > { %v5352_v53 = vld [vmem:[#allocation3 + $0xe8] sm:$0xff] }
 0x2e1   : > { %5420 = vst.msk [vmem:[%s8293_s28 + $0xd0] sm:$0xff] %vm225_vm1, %v5388_v44  ;;  %v5391_v62 = vadd.f32 %v8284_v43, %v5352_v53 }
 0x2e2   : > { %v5351_v59 = vld [vmem:[#allocation3 + $0xe0] sm:$0xff] }
 0x2e3   : > { %5423 = vst.msk [vmem:[%s8293_s28 + $0xe8] sm:$0xff] %vm225_vm1, %v5391_v62  ;;  %v5390_v10 = vadd.f32 %v8284_v43, %v5351_v59 }
 0x2e4   : > { %v5354_v54 = vld [vmem:[#allocation3 + $0xf8] sm:$0xff] }
 0x2e5   : > { %5422 = vst.msk [vmem:[%s8293_s28 + $0xe0] sm:$0xff] %vm225_vm1, %v5390_v10  ;;  %v5393_v14 = vadd.f32 %v8284_v43, %v5354_v54 }
 0x2e6   : > { %v5353_v17 = vld [vmem:[#allocation3 + $0xf0] sm:$0xff] }
 0x2e7   : > { %5425 = vst.msk [vmem:[%s8293_s28 + $0xf8] sm:$0xff] %vm225_vm1, %v5393_v14  ;;  %v5392_v38 = vadd.f32 %v8284_v43, %v5353_v17 }
 0x2e9   : > { %5424 = vst.msk [vmem:[%s8293_s28 + $0xf0] sm:$0xff] %vm225_vm1, %v5392_v38 }
 0x2ea PF: > { %s15_s18 = sadd.s32 1, %s6679_s18  }
 0x2eb   : > { %p12_p4 = scmp.ge.s32.totalorder %s15_s18, 4  }
 0x2ed   :  { %14 = sbr.rel (!%p12_p4) target bundleno = 1 (0x1), region = 78 }

</bundles_post_ra>
